<compile_context>
chip_gen: v7x
topology: tpu7x:2x2x1
jax: 0.10.0
libtpu: 0.0.40
codegen_flags: <defaults>
</compile_context>

<pallas_src>
import functools

import jax
import jax.numpy as jnp
from jax.experimental import pallas as pl
from jax.experimental.pallas import tpu as pltpu


def _choose_time_block(seq_len, cap=16):
    """Pick a timestep block size that divides seq_len and satisfies the
    (8,128) BlockSpec constraint on the output block's second-to-last dim."""
    if seq_len <= cap:
        return seq_len
    for t in range(cap, 7, -1):
        if seq_len % t == 0 and t % 8 == 0:
            return t
    return seq_len  # fall back: whole sequence in one block


# ----------------------------------------------------------------------------
# Fused kernel: per-block GCN + GRU recurrence + output projection
# (grid is sequential over time blocks; h lives in VMEM scratch)
# ----------------------------------------------------------------------------
def tgcn_fused_kernel(x_ref, a_ref, wg_ref, bg_ref, wih_ref, bih_ref,
                      whh_ref, bhh_ref, wf_ref, bf_ref,
                      out_ref, h_ref, *, t_blk, n_total, cin, hidden, mxu_dtype):
    @pl.when(pl.program_id(0) == 0)
    def _init():
        h_ref[...] = jnp.zeros_like(h_ref)

    def mm(a, b):
        return jnp.dot(a.astype(mxu_dtype), b.astype(mxu_dtype),
                       preferred_element_type=jnp.float32)

    a_n = a_ref[...]
    wg = wg_ref[...]
    wih = wih_ref[...]
    whh = whh_ref[...]
    wf = wf_ref[...]
    bg = bg_ref[...]
    bih = bih_ref[...]
    bhh = bhh_ref[...]
    bf = bf_ref[...]

    # Hoisted input projection: one (T_blk*N, cin) @ (cin, H) matmul per block
    # instead of repeating a cin-deep (cin=4) contraction every timestep.
    x_all = x_ref[...].reshape(t_blk * n_total, cin)
    xw_all = mm(x_all, wg)                                   # (T_blk*N, H) f32

    h = h_ref[...]                                           # (N, H) f32
    for t in range(t_blk):                                   # fully unrolled (static)
        xw_t = xw_all[t * n_total:(t + 1) * n_total]         # sublane-aligned slice
        # GCN aggregate + bias + ReLU
        g = jnp.maximum(mm(a_n, xw_t) + bg, 0.0)             # (N, H)
        # fused gate projections (gates packed contiguously, no lane padding)
        gi = mm(g, wih) + bih                                 # (N, 3H)
        gh = mm(h, whh) + bhh                                 # (N, 3H)
        r = jax.nn.sigmoid(gi[:, 0:hidden] + gh[:, 0:hidden])
        z = jax.nn.sigmoid(gi[:, hidden:2 * hidden] + gh[:, hidden:2 * hidden])
        n = jnp.tanh(gi[:, 2 * hidden:3 * hidden] + r * gh[:, 2 * hidden:3 * hidden])
        h = (1.0 - z) * n + z * h
        # output projection, stored directly in (N, seq, cout) layout (unpadded)
        out = mm(h, wf) + bf                                  # (N, Cout)
        out_ref[:, t, :] = out.astype(out_ref.dtype)

    h_ref[...] = h


# ----------------------------------------------------------------------------
# Dense GCN normalization: D^-1/2 (A + I) D^-1/2 over ALL batch*num_nodes rows
# (exactly what PyG GCNConv does when handed the flattened (B*N, C) tensor).
# ----------------------------------------------------------------------------
def gcn_norm_dense(edge_index, num_nodes):
    src, dst = edge_index[0], edge_index[1]
    a = jnp.zeros((num_nodes, num_nodes), jnp.float32)
    a = a.at[dst, src].add(1.0)            # message from src j into dst i -> A[i, j]
    a = a + jnp.eye(num_nodes, dtype=jnp.float32)
    deg = a.sum(axis=1)
    dinv = jnp.where(deg > 0, 1.0 / jnp.sqrt(deg), 0.0)
    return dinv[:, None] * a * dinv[None, :]


# ----------------------------------------------------------------------------
# Wrapper
# ----------------------------------------------------------------------------
@functools.partial(jax.jit, static_argnames=("pre_len", "use_bf16_matmul"))
def tgcn_forward(x, edge_index, params, pre_len, use_bf16_matmul=False):
    """x: (batch, seq_len, num_nodes, in_channels) — same layout as the nn.Module."""
    batch, seq_len, num_nodes, cin = x.shape
    n_total = batch * num_nodes
    hidden = params["wg"].shape[1]
    cout = params["wf"].shape[1]
    mxu_dtype = jnp.bfloat16 if use_bf16_matmul else jnp.float32

    # Pack gate weights contiguously (no per-gate lane padding).
    wih_cat = jnp.concatenate([params["wih"][k] for k in range(3)], axis=1)   # (H, 3H)
    bih_cat = jnp.concatenate([params["bih"][k] for k in range(3)], axis=1)   # (1, 3H)
    whh_cat = jnp.concatenate([params["whh"][k] for k in range(3)], axis=1)   # (H, 3H)
    bhh_cat = jnp.concatenate([params["bhh"][k] for k in range(3)], axis=1)   # (1, 3H)

    a_norm = gcn_norm_dense(edge_index, n_total)

    # MXU-operand dtype; biases / accumulation stay f32.
    a_mx = a_norm.astype(mxu_dtype)
    wg = params["wg"].astype(mxu_dtype)
    wih_cat = wih_cat.astype(mxu_dtype)
    whh_cat = whh_cat.astype(mxu_dtype)
    wf = params["wf"].astype(mxu_dtype)
    bg = params["bg"].astype(jnp.float32)
    bih_cat = bih_cat.astype(jnp.float32)
    bhh_cat = bhh_cat.astype(jnp.float32)
    bf = params["bf"].astype(jnp.float32)

    # time-major node-flattened input: (seq, N, Cin)
    x_seq = jnp.transpose(x, (1, 0, 2, 3)).reshape(seq_len, n_total, cin)

    t_blk = _choose_time_block(seq_len)
    n_blocks = seq_len // t_blk

    const2 = lambda tb: (0, 0)

    out_nt = pl.pallas_call(
        functools.partial(tgcn_fused_kernel, t_blk=t_blk, n_total=n_total,
                          cin=cin, hidden=hidden, mxu_dtype=mxu_dtype),
        out_shape=jax.ShapeDtypeStruct((n_total, seq_len, cout), jnp.float32),
        grid_spec=pltpu.PrefetchScalarGridSpec(
            num_scalar_prefetch=0,
            grid=(n_blocks,),
            in_specs=[
                pl.BlockSpec((t_blk, n_total, cin), lambda tb: (tb, 0, 0)),   # x
                pl.BlockSpec((n_total, n_total), const2),                     # A_norm
                pl.BlockSpec((cin, hidden), const2),                          # wg
                pl.BlockSpec((1, hidden), const2),                            # bg
                pl.BlockSpec((hidden, 3 * hidden), const2),                   # wih_cat
                pl.BlockSpec((1, 3 * hidden), const2),                        # bih_cat
                pl.BlockSpec((hidden, 3 * hidden), const2),                   # whh_cat
                pl.BlockSpec((1, 3 * hidden), const2),                        # bhh_cat
                pl.BlockSpec((hidden, cout), const2),                         # wf
                pl.BlockSpec((1, cout), const2),                              # bf
            ],
            out_specs=pl.BlockSpec((n_total, t_blk, cout), lambda tb: (0, tb, 0)),
            scratch_shapes=[pltpu.VMEM((n_total, hidden), jnp.float32)],      # GRU state
        ),
        compiler_params=pltpu.CompilerParams(dimension_semantics=("arbitrary",)),
    )(x_seq, a_mx, wg, bg, wih_cat, bih_cat, whh_cat, bhh_cat, wf, bf)

    # Literal torch reshape of the contiguous (B*N, seq, Cout) array -> free
    # (no transpose); the pre_len slice only copies the small final view.
    out_all = out_nt.reshape(batch, seq_len, num_nodes, cout)
    return out_all[:, -pre_len:, :, :]


# ----------------------------------------------------------------------------
# Pure-JAX reference (mirrors the PyTorch forward) for verification
# ----------------------------------------------------------------------------
def tgcn_reference(x, edge_index, params, pre_len):
    batch, seq_len, num_nodes, cin = x.shape
    n_total = batch * num_nodes
    a_norm = gcn_norm_dense(edge_index, n_total)
    hidden = params["wg"].shape[1]
    h = jnp.zeros((n_total, hidden), jnp.float32)
    outs = []
    for t in range(seq_len):
        x_t = x[:, t].reshape(n_total, cin)
        g = jnp.maximum(a_norm @ (x_t @ params["wg"]) + params["bg"], 0.0)
        gi = [g @ params["wih"][k] + params["bih"][k] for k in range(3)]
        gh = [h @ params["whh"][k] + params["bhh"][k] for k in range(3)]
        r = jax.nn.sigmoid(gi[0] + gh[0])
        z = jax.nn.sigmoid(gi[1] + gh[1])
        n = jnp.tanh(gi[2] + r * gh[2])
        h = (1.0 - z) * n + z * h
        outs.append(h @ params["wf"] + params["bf"])
    out_all = jnp.stack(outs, axis=1)                           # (B*N, seq, Cout)
    out_all = out_all.reshape(batch, seq_len, num_nodes, -1)    # literal torch reshape
    return out_all[:, -pre_len:, :, :]


# ----------------------------------------------------------------------------
# Main
# ----------------------------------------------------------------------------
if __name__ == "__main__":
    batch, seq_len, num_nodes = 2, 8, 16
    in_channels, hidden_channels, out_channels, pre_len = 4, 32, 8, 3

    key = jax.random.PRNGKey(0)
    ks = jax.random.split(key, 10)

    scale = 0.1
    params = {
        "wg":  scale * jax.random.normal(ks[0], (in_channels, hidden_channels), jnp.float32),
        "bg":  scale * jax.random.normal(ks[1], (1, hidden_channels), jnp.float32),
        "wih": scale * jax.random.normal(ks[2], (3, hidden_channels, hidden_channels), jnp.float32),
        "bih": scale * jax.random.normal(ks[3], (3, 1, hidden_channels), jnp.float32),
        "whh": scale * jax.random.normal(ks[4], (3, hidden_channels, hidden_channels), jnp.float32),
        "bhh": scale * jax.random.normal(ks[5], (3, 1, hidden_channels), jnp.float32),
        "wf":  scale * jax.random.normal(ks[6], (hidden_channels, out_channels), jnp.float32),
        "bf":  scale * jax.random.normal(ks[7], (1, out_channels), jnp.float32),
    }

    # input: (batch, seq_len, num_nodes, in_channels), undirected ring graph
    x = jax.random.normal(ks[8], (batch, seq_len, num_nodes, in_channels), jnp.float32)
    src = jnp.arange(num_nodes, dtype=jnp.int32)
    dst = (src + 1) % num_nodes
    edge_index = jnp.stack([jnp.concatenate([src, dst]),
                            jnp.concatenate([dst, src])], axis=0)

    ref = tgcn_reference(x, edge_index, params, pre_len)

    # f32 path: matches PyTorch numerics
    out = tgcn_forward(x, edge_index, params, pre_len, use_bf16_matmul=False)
    out = jax.block_until_ready(out)
    assert out.shape == (batch, pre_len, num_nodes, out_channels)
    assert jnp.allclose(out, ref, atol=1e-4, rtol=1e-4), "f32 mismatch vs reference"

    # bf16 MXU-operand path (f32 accumulation): looser tolerance
    out_bf16 = tgcn_forward(x, edge_index, params, pre_len, use_bf16_matmul=True)
    out_bf16 = jax.block_until_ready(out_bf16)
    assert out_bf16.shape == (batch, pre_len, num_nodes, out_channels)
    assert jnp.allclose(out_bf16, ref, atol=5e-2, rtol=5e-2), "bf16 mismatch vs reference"

    print("KERNEL_OK")
</pallas_src>

<mosaic_0001>
module attributes {stable_mosaic.version = 11 : i64} {
  func.func private @main(%arg0: i32) attributes {dimension_semantics = [#tpu.dimension_semantics<core_parallel>], iteration_bounds = array<i64: 2>, tpu.core_type = #tpu.core_type<sc_scalar_subcore>, window_params = []} {
    return
  }
}

module attributes {stable_mosaic.version = 11 : i64} {
  func.func private @main(%arg0: i32) attributes {dimension_semantics = [#tpu.dimension_semantics<core_parallel>], iteration_bounds = array<i64: 2>, tpu.core_type = #tpu.core_type<sc_scalar_subcore>, window_params = []} {
    return
  }
}

module attributes {stable_mosaic.version = 11 : i64} {
  func.func @tgcn_fused_kernel(%arg0: i32, %arg1: memref<8x32x4xf32, #tpu.memory_space<vmem>>, %arg2: memref<32x32xf32, #tpu.memory_space<vmem>>, %arg3: memref<4x32xf32, #tpu.memory_space<vmem>>, %arg4: memref<1x32xf32, #tpu.memory_space<vmem>>, %arg5: memref<32x96xf32, #tpu.memory_space<vmem>>, %arg6: memref<1x96xf32, #tpu.memory_space<vmem>>, %arg7: memref<32x96xf32, #tpu.memory_space<vmem>>, %arg8: memref<1x96xf32, #tpu.memory_space<vmem>>, %arg9: memref<32x8xf32, #tpu.memory_space<vmem>>, %arg10: memref<1x8xf32, #tpu.memory_space<vmem>>, %arg11: memref<32x8x8xf32, #tpu.memory_space<vmem>>, %arg12: memref<32x32xf32, #tpu.memory_space<vmem>>) attributes {dimension_semantics = [#tpu.dimension_semantics<arbitrary>], iteration_bounds = array<i64: 1>, scalar_prefetch = 0 : i64, scratch_operands = 1 : i64, tpu.core_type = #tpu.core_type<tc>, window_params = [{transform_indices = @transform_0, window_bounds = array<i64: 8, 32, 4>}, {pipeline_mode = #tpu.pipeline_mode<synchronous>, transform_indices = @transform_1, window_bounds = array<i64: 32, 32>}, {pipeline_mode = #tpu.pipeline_mode<synchronous>, transform_indices = @transform_2, window_bounds = array<i64: 4, 32>}, {pipeline_mode = #tpu.pipeline_mode<synchronous>, transform_indices = @transform_3, window_bounds = array<i64: 1, 32>}, {pipeline_mode = #tpu.pipeline_mode<synchronous>, transform_indices = @transform_4, window_bounds = array<i64: 32, 96>}, {pipeline_mode = #tpu.pipeline_mode<synchronous>, transform_indices = @transform_5, window_bounds = array<i64: 1, 96>}, {pipeline_mode = #tpu.pipeline_mode<synchronous>, transform_indices = @transform_6, window_bounds = array<i64: 32, 96>}, {pipeline_mode = #tpu.pipeline_mode<synchronous>, transform_indices = @transform_7, window_bounds = array<i64: 1, 96>}, {pipeline_mode = #tpu.pipeline_mode<synchronous>, transform_indices = @transform_8, window_bounds = array<i64: 32, 8>}, {pipeline_mode = #tpu.pipeline_mode<synchronous>, transform_indices = @transform_9, window_bounds = array<i64: 1, 8>}, {transform_indices = @transform_10, window_bounds = array<i64: 32, 8, 8>}]} {
    %c0_i32 = arith.constant 0 : i32
    %0 = arith.cmpi eq, %arg0, %c0_i32 : i32
    %1 = arith.extui %0 : i1 to i32
    %c0_i32_0 = arith.constant 0 : i32
    %2 = arith.cmpi ne, %1, %c0_i32_0 : i32
    scf.if %2 {
      %cst_106 = arith.constant 0.000000e+00 : f32
      %369 = vector.broadcast %cst_106 : f32 to vector<32x32xf32>
      %c0_107 = arith.constant 0 : index
      %c0_108 = arith.constant 0 : index
      %370 = vector.load %arg12[%c0_107, %c0_108] : memref<32x32xf32, #tpu.memory_space<vmem>>, vector<32x32xf32>
      tpu.vector_store %arg12[%c0_107, %c0_108], %369 {strides = array<i32>} : memref<32x32xf32, #tpu.memory_space<vmem>>, vector<32x32xf32>,
    } else {
    }
    %c0 = arith.constant 0 : index
    %c0_1 = arith.constant 0 : index
    %3 = vector.load %arg2[%c0, %c0_1] : memref<32x32xf32, #tpu.memory_space<vmem>>, vector<32x32xf32>
    %c0_2 = arith.constant 0 : index
    %c0_3 = arith.constant 0 : index
    %4 = vector.load %arg3[%c0_2, %c0_3] : memref<4x32xf32, #tpu.memory_space<vmem>>, vector<4x32xf32>
    %c0_4 = arith.constant 0 : index
    %c0_5 = arith.constant 0 : index
    %5 = vector.load %arg5[%c0_4, %c0_5] : memref<32x96xf32, #tpu.memory_space<vmem>>, vector<32x96xf32>
    %c0_6 = arith.constant 0 : index
    %c0_7 = arith.constant 0 : index
    %6 = vector.load %arg7[%c0_6, %c0_7] : memref<32x96xf32, #tpu.memory_space<vmem>>, vector<32x96xf32>
    %c0_8 = arith.constant 0 : index
    %c0_9 = arith.constant 0 : index
    %7 = vector.load %arg9[%c0_8, %c0_9] : memref<32x8xf32, #tpu.memory_space<vmem>>, vector<32x8xf32>
    %c0_10 = arith.constant 0 : index
    %c0_11 = arith.constant 0 : index
    %8 = vector.load %arg4[%c0_10, %c0_11] : memref<1x32xf32, #tpu.memory_space<vmem>>, vector<1x32xf32>
    %c0_12 = arith.constant 0 : index
    %c0_13 = arith.constant 0 : index
    %9 = vector.load %arg6[%c0_12, %c0_13] : memref<1x96xf32, #tpu.memory_space<vmem>>, vector<1x96xf32>
    %c0_14 = arith.constant 0 : index
    %c0_15 = arith.constant 0 : index
    %10 = vector.load %arg8[%c0_14, %c0_15] : memref<1x96xf32, #tpu.memory_space<vmem>>, vector<1x96xf32>
    %c0_16 = arith.constant 0 : index
    %c0_17 = arith.constant 0 : index
    %11 = vector.load %arg10[%c0_16, %c0_17] : memref<1x8xf32, #tpu.memory_space<vmem>>, vector<1x8xf32>
    %c0_18 = arith.constant 0 : index
    %c0_19 = arith.constant 0 : index
    %c0_20 = arith.constant 0 : index
    %12 = vector.load %arg1[%c0_18, %c0_19, %c0_20] : memref<8x32x4xf32, #tpu.memory_space<vmem>>, vector<8x32x4xf32>
    %13 = vector.shape_cast %12 : vector<8x32x4xf32> to vector<256x4xf32>
    %cst = arith.constant dense<0.000000e+00> : vector<256x32xf32>
    %14 = tpu.matmul %13, %4, %cst {dimension_numbers = #tpu.dot_dimension_numbers<[1], [0], [0], [1], [0, 0, 1, 1], [], []>} : vector<256x4xf32>, vector<4x32xf32>, vector<256x32xf32> -> vector<256x32xf32>
    %c0_21 = arith.constant 0 : index
    %c0_22 = arith.constant 0 : index
    %15 = vector.load %arg12[%c0_21, %c0_22] : memref<32x32xf32, #tpu.memory_space<vmem>>, vector<32x32xf32>
    %16 = vector.extract_strided_slice %14 {offsets = [0, 0], sizes = [32, 32], strides = [1, 1]} : vector<256x32xf32> to vector<32x32xf32>
    %cst_23 = arith.constant dense<0.000000e+00> : vector<32x32xf32>
    %17 = tpu.matmul %3, %16, %cst_23 {dimension_numbers = #tpu.dot_dimension_numbers<[1], [0], [0], [1], [0, 0, 1, 1], [], []>} : vector<32x32xf32>, vector<32x32xf32>, vector<32x32xf32> -> vector<32x32xf32>
    %18 = vector.broadcast %8 : vector<1x32xf32> to vector<32x32xf32>
    %19 = arith.addf %17, %18 : vector<32x32xf32>
    %cst_24 = arith.constant 0.000000e+00 : f32
    %20 = vector.broadcast %cst_24 : f32 to vector<32x32xf32>
    %21 = arith.maximumf %19, %20 : vector<32x32xf32>
    %cst_25 = arith.constant dense<0.000000e+00> : vector<32x96xf32>
    %22 = tpu.matmul %21, %5, %cst_25 {dimension_numbers = #tpu.dot_dimension_numbers<[1], [0], [0], [1], [0, 0, 1, 1], [], []>} : vector<32x32xf32>, vector<32x96xf32>, vector<32x96xf32> -> vector<32x96xf32>
    %23 = vector.broadcast %9 : vector<1x96xf32> to vector<32x96xf32>
    %24 = arith.addf %22, %23 : vector<32x96xf32>
    %cst_26 = arith.constant dense<0.000000e+00> : vector<32x96xf32>
    %25 = tpu.matmul %15, %6, %cst_26 {dimension_numbers = #tpu.dot_dimension_numbers<[1], [0], [0], [1], [0, 0, 1, 1], [], []>} : vector<32x32xf32>, vector<32x96xf32>, vector<32x96xf32> -> vector<32x96xf32>
    %26 = vector.broadcast %10 : vector<1x96xf32> to vector<32x96xf32>
    %27 = arith.addf %25, %26 : vector<32x96xf32>
    %28 = vector.extract_strided_slice %24 {offsets = [0, 0], sizes = [32, 32], strides = [1, 1]} : vector<32x96xf32> to vector<32x32xf32>
    %29 = vector.extract_strided_slice %27 {offsets = [0, 0], sizes = [32, 32], strides = [1, 1]} : vector<32x96xf32> to vector<32x32xf32>
    %30 = arith.addf %28, %29 : vector<32x32xf32>
    %31 = arith.negf %30 : vector<32x32xf32>
    %32 = math.exp %31 : vector<32x32xf32>
    %cst_27 = arith.constant 1.000000e+00 : f32
    %33 = vector.broadcast %cst_27 : f32 to vector<32x32xf32>
    %34 = arith.addf %33, %32 : vector<32x32xf32>
    %35 = arith.divf %33, %34 : vector<32x32xf32>
    %36 = vector.extract_strided_slice %24 {offsets = [0, 32], sizes = [32, 32], strides = [1, 1]} : vector<32x96xf32> to vector<32x32xf32>
    %37 = vector.extract_strided_slice %27 {offsets = [0, 32], sizes = [32, 32], strides = [1, 1]} : vector<32x96xf32> to vector<32x32xf32>
    %38 = arith.addf %36, %37 : vector<32x32xf32>
    %39 = arith.negf %38 : vector<32x32xf32>
    %40 = math.exp %39 : vector<32x32xf32>
    %cst_28 = arith.constant 1.000000e+00 : f32
    %41 = vector.broadcast %cst_28 : f32 to vector<32x32xf32>
    %42 = arith.addf %41, %40 : vector<32x32xf32>
    %43 = arith.divf %41, %42 : vector<32x32xf32>
    %44 = vector.extract_strided_slice %24 {offsets = [0, 64], sizes = [32, 32], strides = [1, 1]} : vector<32x96xf32> to vector<32x32xf32>
    %45 = vector.extract_strided_slice %27 {offsets = [0, 64], sizes = [32, 32], strides = [1, 1]} : vector<32x96xf32> to vector<32x32xf32>
    %46 = arith.mulf %35, %45 : vector<32x32xf32>
    %47 = arith.addf %44, %46 : vector<32x32xf32>
    %48 = math.tanh %47 : vector<32x32xf32>
    %cst_29 = arith.constant 1.000000e+00 : f32
    %49 = vector.broadcast %cst_29 : f32 to vector<32x32xf32>
    %50 = arith.subf %49, %43 : vector<32x32xf32>
    %51 = arith.mulf %50, %48 : vector<32x32xf32>
    %52 = arith.mulf %43, %15 : vector<32x32xf32>
    %53 = arith.addf %51, %52 : vector<32x32xf32>
    %cst_30 = arith.constant dense<0.000000e+00> : vector<32x8xf32>
    %54 = tpu.matmul %53, %7, %cst_30 {dimension_numbers = #tpu.dot_dimension_numbers<[1], [0], [0], [1], [0, 0, 1, 1], [], []>} : vector<32x32xf32>, vector<32x8xf32>, vector<32x8xf32> -> vector<32x8xf32>
    %55 = vector.broadcast %11 : vector<1x8xf32> to vector<32x8xf32>
    %56 = arith.addf %54, %55 : vector<32x8xf32>
    %c0_31 = arith.constant 0 : index
    %c0_32 = arith.constant 0 : index
    %c0_33 = arith.constant 0 : index
    %57 = vector.load %arg11[%c0_31, %c0_32, %c0_33] : memref<32x8x8xf32, #tpu.memory_space<vmem>>, vector<32x1x8xf32>
    %58 = vector.shape_cast %57 : vector<32x1x8xf32> to vector<32x8xf32>
    %59 = vector.shape_cast %56 : vector<32x8xf32> to vector<32x1x8xf32>
    tpu.vector_store %arg11[%c0_31, %c0_32, %c0_33], %59 {strides = array<i32>} : memref<32x8x8xf32, #tpu.memory_space<vmem>>, vector<32x1x8xf32>,
    %60 = vector.extract_strided_slice %14 {offsets = [32, 0], sizes = [32, 32], strides = [1, 1]} : vector<256x32xf32> to vector<32x32xf32>
    %cst_34 = arith.constant dense<0.000000e+00> : vector<32x32xf32>
    %61 = tpu.matmul %3, %60, %cst_34 {dimension_numbers = #tpu.dot_dimension_numbers<[1], [0], [0], [1], [0, 0, 1, 1], [], []>} : vector<32x32xf32>, vector<32x32xf32>, vector<32x32xf32> -> vector<32x32xf32>
    %62 = vector.broadcast %8 : vector<1x32xf32> to vector<32x32xf32>
    %63 = arith.addf %61, %62 : vector<32x32xf32>
    %cst_35 = arith.constant 0.000000e+00 : f32
    %64 = vector.broadcast %cst_35 : f32 to vector<32x32xf32>
    %65 = arith.maximumf %63, %64 : vector<32x32xf32>
    %cst_36 = arith.constant dense<0.000000e+00> : vector<32x96xf32>
    %66 = tpu.matmul %65, %5, %cst_36 {dimension_numbers = #tpu.dot_dimension_numbers<[1], [0], [0], [1], [0, 0, 1, 1], [], []>} : vector<32x32xf32>, vector<32x96xf32>, vector<32x96xf32> -> vector<32x96xf32>
    %67 = vector.broadcast %9 : vector<1x96xf32> to vector<32x96xf32>
    %68 = arith.addf %66, %67 : vector<32x96xf32>
    %cst_37 = arith.constant dense<0.000000e+00> : vector<32x96xf32>
    %69 = tpu.matmul %53, %6, %cst_37 {dimension_numbers = #tpu.dot_dimension_numbers<[1], [0], [0], [1], [0, 0, 1, 1], [], []>} : vector<32x32xf32>, vector<32x96xf32>, vector<32x96xf32> -> vector<32x96xf32>
    %70 = vector.broadcast %10 : vector<1x96xf32> to vector<32x96xf32>
    %71 = arith.addf %69, %70 : vector<32x96xf32>
    %72 = vector.extract_strided_slice %68 {offsets = [0, 0], sizes = [32, 32], strides = [1, 1]} : vector<32x96xf32> to vector<32x32xf32>
    %73 = vector.extract_strided_slice %71 {offsets = [0, 0], sizes = [32, 32], strides = [1, 1]} : vector<32x96xf32> to vector<32x32xf32>
    %74 = arith.addf %72, %73 : vector<32x32xf32>
    %75 = arith.negf %74 : vector<32x32xf32>
    %76 = math.exp %75 : vector<32x32xf32>
    %cst_38 = arith.constant 1.000000e+00 : f32
    %77 = vector.broadcast %cst_38 : f32 to vector<32x32xf32>
    %78 = arith.addf %77, %76 : vector<32x32xf32>
    %79 = arith.divf %77, %78 : vector<32x32xf32>
    %80 = vector.extract_strided_slice %68 {offsets = [0, 32], sizes = [32, 32], strides = [1, 1]} : vector<32x96xf32> to vector<32x32xf32>
    %81 = vector.extract_strided_slice %71 {offsets = [0, 32], sizes = [32, 32], strides = [1, 1]} : vector<32x96xf32> to vector<32x32xf32>
    %82 = arith.addf %80, %81 : vector<32x32xf32>
    %83 = arith.negf %82 : vector<32x32xf32>
    %84 = math.exp %83 : vector<32x32xf32>
    %cst_39 = arith.constant 1.000000e+00 : f32
    %85 = vector.broadcast %cst_39 : f32 to vector<32x32xf32>
    %86 = arith.addf %85, %84 : vector<32x32xf32>
    %87 = arith.divf %85, %86 : vector<32x32xf32>
    %88 = vector.extract_strided_slice %68 {offsets = [0, 64], sizes = [32, 32], strides = [1, 1]} : vector<32x96xf32> to vector<32x32xf32>
    %89 = vector.extract_strided_slice %71 {offsets = [0, 64], sizes = [32, 32], strides = [1, 1]} : vector<32x96xf32> to vector<32x32xf32>
    %90 = arith.mulf %79, %89 : vector<32x32xf32>
    %91 = arith.addf %88, %90 : vector<32x32xf32>
    %92 = math.tanh %91 : vector<32x32xf32>
    %cst_40 = arith.constant 1.000000e+00 : f32
    %93 = vector.broadcast %cst_40 : f32 to vector<32x32xf32>
    %94 = arith.subf %93, %87 : vector<32x32xf32>
    %95 = arith.mulf %94, %92 : vector<32x32xf32>
    %96 = arith.mulf %87, %53 : vector<32x32xf32>
    %97 = arith.addf %95, %96 : vector<32x32xf32>
    %cst_41 = arith.constant dense<0.000000e+00> : vector<32x8xf32>
    %98 = tpu.matmul %97, %7, %cst_41 {dimension_numbers = #tpu.dot_dimension_numbers<[1], [0], [0], [1], [0, 0, 1, 1], [], []>} : vector<32x32xf32>, vector<32x8xf32>, vector<32x8xf32> -> vector<32x8xf32>
    %99 = vector.broadcast %11 : vector<1x8xf32> to vector<32x8xf32>
    %100 = arith.addf %98, %99 : vector<32x8xf32>
    %c0_42 = arith.constant 0 : index
    %c1 = arith.constant 1 : index
    %c0_43 = arith.constant 0 : index
    %101 = vector.load %arg11[%c0_42, %c1, %c0_43] : memref<32x8x8xf32, #tpu.memory_space<vmem>>, vector<32x1x8xf32>
    %102 = vector.shape_cast %101 : vector<32x1x8xf32> to vector<32x8xf32>
    %103 = vector.shape_cast %100 : vector<32x8xf32> to vector<32x1x8xf32>
    tpu.vector_store %arg11[%c0_42, %c1, %c0_43], %103 {strides = array<i32>} : memref<32x8x8xf32, #tpu.memory_space<vmem>>, vector<32x1x8xf32>,
    %104 = vector.extract_strided_slice %14 {offsets = [64, 0], sizes = [32, 32], strides = [1, 1]} : vector<256x32xf32> to vector<32x32xf32>
    %cst_44 = arith.constant dense<0.000000e+00> : vector<32x32xf32>
    %105 = tpu.matmul %3, %104, %cst_44 {dimension_numbers = #tpu.dot_dimension_numbers<[1], [0], [0], [1], [0, 0, 1, 1], [], []>} : vector<32x32xf32>, vector<32x32xf32>, vector<32x32xf32> -> vector<32x32xf32>
    %106 = vector.broadcast %8 : vector<1x32xf32> to vector<32x32xf32>
    %107 = arith.addf %105, %106 : vector<32x32xf32>
    %cst_45 = arith.constant 0.000000e+00 : f32
    %108 = vector.broadcast %cst_45 : f32 to vector<32x32xf32>
    %109 = arith.maximumf %107, %108 : vector<32x32xf32>
    %cst_46 = arith.constant dense<0.000000e+00> : vector<32x96xf32>
    %110 = tpu.matmul %109, %5, %cst_46 {dimension_numbers = #tpu.dot_dimension_numbers<[1], [0], [0], [1], [0, 0, 1, 1], [], []>} : vector<32x32xf32>, vector<32x96xf32>, vector<32x96xf32> -> vector<32x96xf32>
    %111 = vector.broadcast %9 : vector<1x96xf32> to vector<32x96xf32>
    %112 = arith.addf %110, %111 : vector<32x96xf32>
    %cst_47 = arith.constant dense<0.000000e+00> : vector<32x96xf32>
    %113 = tpu.matmul %97, %6, %cst_47 {dimension_numbers = #tpu.dot_dimension_numbers<[1], [0], [0], [1], [0, 0, 1, 1], [], []>} : vector<32x32xf32>, vector<32x96xf32>, vector<32x96xf32> -> vector<32x96xf32>
    %114 = vector.broadcast %10 : vector<1x96xf32> to vector<32x96xf32>
    %115 = arith.addf %113, %114 : vector<32x96xf32>
    %116 = vector.extract_strided_slice %112 {offsets = [0, 0], sizes = [32, 32], strides = [1, 1]} : vector<32x96xf32> to vector<32x32xf32>
    %117 = vector.extract_strided_slice %115 {offsets = [0, 0], sizes = [32, 32], strides = [1, 1]} : vector<32x96xf32> to vector<32x32xf32>
    %118 = arith.addf %116, %117 : vector<32x32xf32>
    %119 = arith.negf %118 : vector<32x32xf32>
    %120 = math.exp %119 : vector<32x32xf32>
    %cst_48 = arith.constant 1.000000e+00 : f32
    %121 = vector.broadcast %cst_48 : f32 to vector<32x32xf32>
    %122 = arith.addf %121, %120 : vector<32x32xf32>
    %123 = arith.divf %121, %122 : vector<32x32xf32>
    %124 = vector.extract_strided_slice %112 {offsets = [0, 32], sizes = [32, 32], strides = [1, 1]} : vector<32x96xf32> to vector<32x32xf32>
    %125 = vector.extract_strided_slice %115 {offsets = [0, 32], sizes = [32, 32], strides = [1, 1]} : vector<32x96xf32> to vector<32x32xf32>
    %126 = arith.addf %124, %125 : vector<32x32xf32>
    %127 = arith.negf %126 : vector<32x32xf32>
    %128 = math.exp %127 : vector<32x32xf32>
    %cst_49 = arith.constant 1.000000e+00 : f32
    %129 = vector.broadcast %cst_49 : f32 to vector<32x32xf32>
    %130 = arith.addf %129, %128 : vector<32x32xf32>
    %131 = arith.divf %129, %130 : vector<32x32xf32>
    %132 = vector.extract_strided_slice %112 {offsets = [0, 64], sizes = [32, 32], strides = [1, 1]} : vector<32x96xf32> to vector<32x32xf32>
    %133 = vector.extract_strided_slice %115 {offsets = [0, 64], sizes = [32, 32], strides = [1, 1]} : vector<32x96xf32> to vector<32x32xf32>
    %134 = arith.mulf %123, %133 : vector<32x32xf32>
    %135 = arith.addf %132, %134 : vector<32x32xf32>
    %136 = math.tanh %135 : vector<32x32xf32>
    %cst_50 = arith.constant 1.000000e+00 : f32
    %137 = vector.broadcast %cst_50 : f32 to vector<32x32xf32>
    %138 = arith.subf %137, %131 : vector<32x32xf32>
    %139 = arith.mulf %138, %136 : vector<32x32xf32>
    %140 = arith.mulf %131, %97 : vector<32x32xf32>
    %141 = arith.addf %139, %140 : vector<32x32xf32>
    %cst_51 = arith.constant dense<0.000000e+00> : vector<32x8xf32>
    %142 = tpu.matmul %141, %7, %cst_51 {dimension_numbers = #tpu.dot_dimension_numbers<[1], [0], [0], [1], [0, 0, 1, 1], [], []>} : vector<32x32xf32>, vector<32x8xf32>, vector<32x8xf32> -> vector<32x8xf32>
    %143 = vector.broadcast %11 : vector<1x8xf32> to vector<32x8xf32>
    %144 = arith.addf %142, %143 : vector<32x8xf32>
    %c0_52 = arith.constant 0 : index
    %c2 = arith.constant 2 : index
    %c0_53 = arith.constant 0 : index
    %145 = vector.load %arg11[%c0_52, %c2, %c0_53] : memref<32x8x8xf32, #tpu.memory_space<vmem>>, vector<32x1x8xf32>
    %146 = vector.shape_cast %145 : vector<32x1x8xf32> to vector<32x8xf32>
    %147 = vector.shape_cast %144 : vector<32x8xf32> to vector<32x1x8xf32>
    tpu.vector_store %arg11[%c0_52, %c2, %c0_53], %147 {strides = array<i32>} : memref<32x8x8xf32, #tpu.memory_space<vmem>>, vector<32x1x8xf32>,
    %148 = vector.extract_strided_slice %14 {offsets = [96, 0], sizes = [32, 32], strides = [1, 1]} : vector<256x32xf32> to vector<32x32xf32>
    %cst_54 = arith.constant dense<0.000000e+00> : vector<32x32xf32>
    %149 = tpu.matmul %3, %148, %cst_54 {dimension_numbers = #tpu.dot_dimension_numbers<[1], [0], [0], [1], [0, 0, 1, 1], [], []>} : vector<32x32xf32>, vector<32x32xf32>, vector<32x32xf32> -> vector<32x32xf32>
    %150 = vector.broadcast %8 : vector<1x32xf32> to vector<32x32xf32>
    %151 = arith.addf %149, %150 : vector<32x32xf32>
    %cst_55 = arith.constant 0.000000e+00 : f32
    %152 = vector.broadcast %cst_55 : f32 to vector<32x32xf32>
    %153 = arith.maximumf %151, %152 : vector<32x32xf32>
    %cst_56 = arith.constant dense<0.000000e+00> : vector<32x96xf32>
    %154 = tpu.matmul %153, %5, %cst_56 {dimension_numbers = #tpu.dot_dimension_numbers<[1], [0], [0], [1], [0, 0, 1, 1], [], []>} : vector<32x32xf32>, vector<32x96xf32>, vector<32x96xf32> -> vector<32x96xf32>
    %155 = vector.broadcast %9 : vector<1x96xf32> to vector<32x96xf32>
    %156 = arith.addf %154, %155 : vector<32x96xf32>
    %cst_57 = arith.constant dense<0.000000e+00> : vector<32x96xf32>
    %157 = tpu.matmul %141, %6, %cst_57 {dimension_numbers = #tpu.dot_dimension_numbers<[1], [0], [0], [1], [0, 0, 1, 1], [], []>} : vector<32x32xf32>, vector<32x96xf32>, vector<32x96xf32> -> vector<32x96xf32>
    %158 = vector.broadcast %10 : vector<1x96xf32> to vector<32x96xf32>
    %159 = arith.addf %157, %158 : vector<32x96xf32>
    %160 = vector.extract_strided_slice %156 {offsets = [0, 0], sizes = [32, 32], strides = [1, 1]} : vector<32x96xf32> to vector<32x32xf32>
    %161 = vector.extract_strided_slice %159 {offsets = [0, 0], sizes = [32, 32], strides = [1, 1]} : vector<32x96xf32> to vector<32x32xf32>
    %162 = arith.addf %160, %161 : vector<32x32xf32>
    %163 = arith.negf %162 : vector<32x32xf32>
    %164 = math.exp %163 : vector<32x32xf32>
    %cst_58 = arith.constant 1.000000e+00 : f32
    %165 = vector.broadcast %cst_58 : f32 to vector<32x32xf32>
    %166 = arith.addf %165, %164 : vector<32x32xf32>
    %167 = arith.divf %165, %166 : vector<32x32xf32>
    %168 = vector.extract_strided_slice %156 {offsets = [0, 32], sizes = [32, 32], strides = [1, 1]} : vector<32x96xf32> to vector<32x32xf32>
    %169 = vector.extract_strided_slice %159 {offsets = [0, 32], sizes = [32, 32], strides = [1, 1]} : vector<32x96xf32> to vector<32x32xf32>
    %170 = arith.addf %168, %169 : vector<32x32xf32>
    %171 = arith.negf %170 : vector<32x32xf32>
    %172 = math.exp %171 : vector<32x32xf32>
    %cst_59 = arith.constant 1.000000e+00 : f32
    %173 = vector.broadcast %cst_59 : f32 to vector<32x32xf32>
    %174 = arith.addf %173, %172 : vector<32x32xf32>
    %175 = arith.divf %173, %174 : vector<32x32xf32>
    %176 = vector.extract_strided_slice %156 {offsets = [0, 64], sizes = [32, 32], strides = [1, 1]} : vector<32x96xf32> to vector<32x32xf32>
    %177 = vector.extract_strided_slice %159 {offsets = [0, 64], sizes = [32, 32], strides = [1, 1]} : vector<32x96xf32> to vector<32x32xf32>
    %178 = arith.mulf %167, %177 : vector<32x32xf32>
    %179 = arith.addf %176, %178 : vector<32x32xf32>
    %180 = math.tanh %179 : vector<32x32xf32>
    %cst_60 = arith.constant 1.000000e+00 : f32
    %181 = vector.broadcast %cst_60 : f32 to vector<32x32xf32>
    %182 = arith.subf %181, %175 : vector<32x32xf32>
    %183 = arith.mulf %182, %180 : vector<32x32xf32>
    %184 = arith.mulf %175, %141 : vector<32x32xf32>
    %185 = arith.addf %183, %184 : vector<32x32xf32>
    %cst_61 = arith.constant dense<0.000000e+00> : vector<32x8xf32>
    %186 = tpu.matmul %185, %7, %cst_61 {dimension_numbers = #tpu.dot_dimension_numbers<[1], [0], [0], [1], [0, 0, 1, 1], [], []>} : vector<32x32xf32>, vector<32x8xf32>, vector<32x8xf32> -> vector<32x8xf32>
    %187 = vector.broadcast %11 : vector<1x8xf32> to vector<32x8xf32>
    %188 = arith.addf %186, %187 : vector<32x8xf32>
    %c0_62 = arith.constant 0 : index
    %c3 = arith.constant 3 : index
    %c0_63 = arith.constant 0 : index
    %189 = vector.load %arg11[%c0_62, %c3, %c0_63] : memref<32x8x8xf32, #tpu.memory_space<vmem>>, vector<32x1x8xf32>
    %190 = vector.shape_cast %189 : vector<32x1x8xf32> to vector<32x8xf32>
    %191 = vector.shape_cast %188 : vector<32x8xf32> to vector<32x1x8xf32>
    tpu.vector_store %arg11[%c0_62, %c3, %c0_63], %191 {strides = array<i32>} : memref<32x8x8xf32, #tpu.memory_space<vmem>>, vector<32x1x8xf32>,
    %192 = vector.extract_strided_slice %14 {offsets = [128, 0], sizes = [32, 32], strides = [1, 1]} : vector<256x32xf32> to vector<32x32xf32>
    %cst_64 = arith.constant dense<0.000000e+00> : vector<32x32xf32>
    %193 = tpu.matmul %3, %192, %cst_64 {dimension_numbers = #tpu.dot_dimension_numbers<[1], [0], [0], [1], [0, 0, 1, 1], [], []>} : vector<32x32xf32>, vector<32x32xf32>, vector<32x32xf32> -> vector<32x32xf32>
    %194 = vector.broadcast %8 : vector<1x32xf32> to vector<32x32xf32>
    %195 = arith.addf %193, %194 : vector<32x32xf32>
    %cst_65 = arith.constant 0.000000e+00 : f32
    %196 = vector.broadcast %cst_65 : f32 to vector<32x32xf32>
    %197 = arith.maximumf %195, %196 : vector<32x32xf32>
    %cst_66 = arith.constant dense<0.000000e+00> : vector<32x96xf32>
    %198 = tpu.matmul %197, %5, %cst_66 {dimension_numbers = #tpu.dot_dimension_numbers<[1], [0], [0], [1], [0, 0, 1, 1], [], []>} : vector<32x32xf32>, vector<32x96xf32>, vector<32x96xf32> -> vector<32x96xf32>
    %199 = vector.broadcast %9 : vector<1x96xf32> to vector<32x96xf32>
    %200 = arith.addf %198, %199 : vector<32x96xf32>
    %cst_67 = arith.constant dense<0.000000e+00> : vector<32x96xf32>
    %201 = tpu.matmul %185, %6, %cst_67 {dimension_numbers = #tpu.dot_dimension_numbers<[1], [0], [0], [1], [0, 0, 1, 1], [], []>} : vector<32x32xf32>, vector<32x96xf32>, vector<32x96xf32> -> vector<32x96xf32>
    %202 = vector.broadcast %10 : vector<1x96xf32> to vector<32x96xf32>
    %203 = arith.addf %201, %202 : vector<32x96xf32>
    %204 = vector.extract_strided_slice %200 {offsets = [0, 0], sizes = [32, 32], strides = [1, 1]} : vector<32x96xf32> to vector<32x32xf32>
    %205 = vector.extract_strided_slice %203 {offsets = [0, 0], sizes = [32, 32], strides = [1, 1]} : vector<32x96xf32> to vector<32x32xf32>
    %206 = arith.addf %204, %205 : vector<32x32xf32>
    %207 = arith.negf %206 : vector<32x32xf32>
    %208 = math.exp %207 : vector<32x32xf32>
    %cst_68 = arith.constant 1.000000e+00 : f32
    %209 = vector.broadcast %cst_68 : f32 to vector<32x32xf32>
    %210 = arith.addf %209, %208 : vector<32x32xf32>
    %211 = arith.divf %209, %210 : vector<32x32xf32>
    %212 = vector.extract_strided_slice %200 {offsets = [0, 32], sizes = [32, 32], strides = [1, 1]} : vector<32x96xf32> to vector<32x32xf32>
    %213 = vector.extract_strided_slice %203 {offsets = [0, 32], sizes = [32, 32], strides = [1, 1]} : vector<32x96xf32> to vector<32x32xf32>
    %214 = arith.addf %212, %213 : vector<32x32xf32>
    %215 = arith.negf %214 : vector<32x32xf32>
    %216 = math.exp %215 : vector<32x32xf32>
    %cst_69 = arith.constant 1.000000e+00 : f32
    %217 = vector.broadcast %cst_69 : f32 to vector<32x32xf32>
    %218 = arith.addf %217, %216 : vector<32x32xf32>
    %219 = arith.divf %217, %218 : vector<32x32xf32>
    %220 = vector.extract_strided_slice %200 {offsets = [0, 64], sizes = [32, 32], strides = [1, 1]} : vector<32x96xf32> to vector<32x32xf32>
    %221 = vector.extract_strided_slice %203 {offsets = [0, 64], sizes = [32, 32], strides = [1, 1]} : vector<32x96xf32> to vector<32x32xf32>
    %222 = arith.mulf %211, %221 : vector<32x32xf32>
    %223 = arith.addf %220, %222 : vector<32x32xf32>
    %224 = math.tanh %223 : vector<32x32xf32>
    %cst_70 = arith.constant 1.000000e+00 : f32
    %225 = vector.broadcast %cst_70 : f32 to vector<32x32xf32>
    %226 = arith.subf %225, %219 : vector<32x32xf32>
    %227 = arith.mulf %226, %224 : vector<32x32xf32>
    %228 = arith.mulf %219, %185 : vector<32x32xf32>
    %229 = arith.addf %227, %228 : vector<32x32xf32>
    %cst_71 = arith.constant dense<0.000000e+00> : vector<32x8xf32>
    %230 = tpu.matmul %229, %7, %cst_71 {dimension_numbers = #tpu.dot_dimension_numbers<[1], [0], [0], [1], [0, 0, 1, 1], [], []>} : vector<32x32xf32>, vector<32x8xf32>, vector<32x8xf32> -> vector<32x8xf32>
    %231 = vector.broadcast %11 : vector<1x8xf32> to vector<32x8xf32>
    %232 = arith.addf %230, %231 : vector<32x8xf32>
    %c0_72 = arith.constant 0 : index
    %c4 = arith.constant 4 : index
    %c0_73 = arith.constant 0 : index
    %233 = vector.load %arg11[%c0_72, %c4, %c0_73] : memref<32x8x8xf32, #tpu.memory_space<vmem>>, vector<32x1x8xf32>
    %234 = vector.shape_cast %233 : vector<32x1x8xf32> to vector<32x8xf32>
    %235 = vector.shape_cast %232 : vector<32x8xf32> to vector<32x1x8xf32>
    tpu.vector_store %arg11[%c0_72, %c4, %c0_73], %235 {strides = array<i32>} : memref<32x8x8xf32, #tpu.memory_space<vmem>>, vector<32x1x8xf32>,
    %236 = vector.extract_strided_slice %14 {offsets = [160, 0], sizes = [32, 32], strides = [1, 1]} : vector<256x32xf32> to vector<32x32xf32>
    %cst_74 = arith.constant dense<0.000000e+00> : vector<32x32xf32>
    %237 = tpu.matmul %3, %236, %cst_74 {dimension_numbers = #tpu.dot_dimension_numbers<[1], [0], [0], [1], [0, 0, 1, 1], [], []>} : vector<32x32xf32>, vector<32x32xf32>, vector<32x32xf32> -> vector<32x32xf32>
    %238 = vector.broadcast %8 : vector<1x32xf32> to vector<32x32xf32>
    %239 = arith.addf %237, %238 : vector<32x32xf32>
    %cst_75 = arith.constant 0.000000e+00 : f32
    %240 = vector.broadcast %cst_75 : f32 to vector<32x32xf32>
    %241 = arith.maximumf %239, %240 : vector<32x32xf32>
    %cst_76 = arith.constant dense<0.000000e+00> : vector<32x96xf32>
    %242 = tpu.matmul %241, %5, %cst_76 {dimension_numbers = #tpu.dot_dimension_numbers<[1], [0], [0], [1], [0, 0, 1, 1], [], []>} : vector<32x32xf32>, vector<32x96xf32>, vector<32x96xf32> -> vector<32x96xf32>
    %243 = vector.broadcast %9 : vector<1x96xf32> to vector<32x96xf32>
    %244 = arith.addf %242, %243 : vector<32x96xf32>
    %cst_77 = arith.constant dense<0.000000e+00> : vector<32x96xf32>
    %245 = tpu.matmul %229, %6, %cst_77 {dimension_numbers = #tpu.dot_dimension_numbers<[1], [0], [0], [1], [0, 0, 1, 1], [], []>} : vector<32x32xf32>, vector<32x96xf32>, vector<32x96xf32> -> vector<32x96xf32>
    %246 = vector.broadcast %10 : vector<1x96xf32> to vector<32x96xf32>
    %247 = arith.addf %245, %246 : vector<32x96xf32>
    %248 = vector.extract_strided_slice %244 {offsets = [0, 0], sizes = [32, 32], strides = [1, 1]} : vector<32x96xf32> to vector<32x32xf32>
    %249 = vector.extract_strided_slice %247 {offsets = [0, 0], sizes = [32, 32], strides = [1, 1]} : vector<32x96xf32> to vector<32x32xf32>
    %250 = arith.addf %248, %249 : vector<32x32xf32>
    %251 = arith.negf %250 : vector<32x32xf32>
    %252 = math.exp %251 : vector<32x32xf32>
    %cst_78 = arith.constant 1.000000e+00 : f32
    %253 = vector.broadcast %cst_78 : f32 to vector<32x32xf32>
    %254 = arith.addf %253, %252 : vector<32x32xf32>
    %255 = arith.divf %253, %254 : vector<32x32xf32>
    %256 = vector.extract_strided_slice %244 {offsets = [0, 32], sizes = [32, 32], strides = [1, 1]} : vector<32x96xf32> to vector<32x32xf32>
    %257 = vector.extract_strided_slice %247 {offsets = [0, 32], sizes = [32, 32], strides = [1, 1]} : vector<32x96xf32> to vector<32x32xf32>
    %258 = arith.addf %256, %257 : vector<32x32xf32>
    %259 = arith.negf %258 : vector<32x32xf32>
    %260 = math.exp %259 : vector<32x32xf32>
    %cst_79 = arith.constant 1.000000e+00 : f32
    %261 = vector.broadcast %cst_79 : f32 to vector<32x32xf32>
    %262 = arith.addf %261, %260 : vector<32x32xf32>
    %263 = arith.divf %261, %262 : vector<32x32xf32>
    %264 = vector.extract_strided_slice %244 {offsets = [0, 64], sizes = [32, 32], strides = [1, 1]} : vector<32x96xf32> to vector<32x32xf32>
    %265 = vector.extract_strided_slice %247 {offsets = [0, 64], sizes = [32, 32], strides = [1, 1]} : vector<32x96xf32> to vector<32x32xf32>
    %266 = arith.mulf %255, %265 : vector<32x32xf32>
    %267 = arith.addf %264, %266 : vector<32x32xf32>
    %268 = math.tanh %267 : vector<32x32xf32>
    %cst_80 = arith.constant 1.000000e+00 : f32
    %269 = vector.broadcast %cst_80 : f32 to vector<32x32xf32>
    %270 = arith.subf %269, %263 : vector<32x32xf32>
    %271 = arith.mulf %270, %268 : vector<32x32xf32>
    %272 = arith.mulf %263, %229 : vector<32x32xf32>
    %273 = arith.addf %271, %272 : vector<32x32xf32>
    %cst_81 = arith.constant dense<0.000000e+00> : vector<32x8xf32>
    %274 = tpu.matmul %273, %7, %cst_81 {dimension_numbers = #tpu.dot_dimension_numbers<[1], [0], [0], [1], [0, 0, 1, 1], [], []>} : vector<32x32xf32>, vector<32x8xf32>, vector<32x8xf32> -> vector<32x8xf32>
    %275 = vector.broadcast %11 : vector<1x8xf32> to vector<32x8xf32>
    %276 = arith.addf %274, %275 : vector<32x8xf32>
    %c0_82 = arith.constant 0 : index
    %c5 = arith.constant 5 : index
    %c0_83 = arith.constant 0 : index
    %277 = vector.load %arg11[%c0_82, %c5, %c0_83] : memref<32x8x8xf32, #tpu.memory_space<vmem>>, vector<32x1x8xf32>
    %278 = vector.shape_cast %277 : vector<32x1x8xf32> to vector<32x8xf32>
    %279 = vector.shape_cast %276 : vector<32x8xf32> to vector<32x1x8xf32>
    tpu.vector_store %arg11[%c0_82, %c5, %c0_83], %279 {strides = array<i32>} : memref<32x8x8xf32, #tpu.memory_space<vmem>>, vector<32x1x8xf32>,
    %280 = vector.extract_strided_slice %14 {offsets = [192, 0], sizes = [32, 32], strides = [1, 1]} : vector<256x32xf32> to vector<32x32xf32>
    %cst_84 = arith.constant dense<0.000000e+00> : vector<32x32xf32>
    %281 = tpu.matmul %3, %280, %cst_84 {dimension_numbers = #tpu.dot_dimension_numbers<[1], [0], [0], [1], [0, 0, 1, 1], [], []>} : vector<32x32xf32>, vector<32x32xf32>, vector<32x32xf32> -> vector<32x32xf32>
    %282 = vector.broadcast %8 : vector<1x32xf32> to vector<32x32xf32>
    %283 = arith.addf %281, %282 : vector<32x32xf32>
    %cst_85 = arith.constant 0.000000e+00 : f32
    %284 = vector.broadcast %cst_85 : f32 to vector<32x32xf32>
    %285 = arith.maximumf %283, %284 : vector<32x32xf32>
    %cst_86 = arith.constant dense<0.000000e+00> : vector<32x96xf32>
    %286 = tpu.matmul %285, %5, %cst_86 {dimension_numbers = #tpu.dot_dimension_numbers<[1], [0], [0], [1], [0, 0, 1, 1], [], []>} : vector<32x32xf32>, vector<32x96xf32>, vector<32x96xf32> -> vector<32x96xf32>
    %287 = vector.broadcast %9 : vector<1x96xf32> to vector<32x96xf32>
    %288 = arith.addf %286, %287 : vector<32x96xf32>
    %cst_87 = arith.constant dense<0.000000e+00> : vector<32x96xf32>
    %289 = tpu.matmul %273, %6, %cst_87 {dimension_numbers = #tpu.dot_dimension_numbers<[1], [0], [0], [1], [0, 0, 1, 1], [], []>} : vector<32x32xf32>, vector<32x96xf32>, vector<32x96xf32> -> vector<32x96xf32>
    %290 = vector.broadcast %10 : vector<1x96xf32> to vector<32x96xf32>
    %291 = arith.addf %289, %290 : vector<32x96xf32>
    %292 = vector.extract_strided_slice %288 {offsets = [0, 0], sizes = [32, 32], strides = [1, 1]} : vector<32x96xf32> to vector<32x32xf32>
    %293 = vector.extract_strided_slice %291 {offsets = [0, 0], sizes = [32, 32], strides = [1, 1]} : vector<32x96xf32> to vector<32x32xf32>
    %294 = arith.addf %292, %293 : vector<32x32xf32>
    %295 = arith.negf %294 : vector<32x32xf32>
    %296 = math.exp %295 : vector<32x32xf32>
    %cst_88 = arith.constant 1.000000e+00 : f32
    %297 = vector.broadcast %cst_88 : f32 to vector<32x32xf32>
    %298 = arith.addf %297, %296 : vector<32x32xf32>
    %299 = arith.divf %297, %298 : vector<32x32xf32>
    %300 = vector.extract_strided_slice %288 {offsets = [0, 32], sizes = [32, 32], strides = [1, 1]} : vector<32x96xf32> to vector<32x32xf32>
    %301 = vector.extract_strided_slice %291 {offsets = [0, 32], sizes = [32, 32], strides = [1, 1]} : vector<32x96xf32> to vector<32x32xf32>
    %302 = arith.addf %300, %301 : vector<32x32xf32>
    %303 = arith.negf %302 : vector<32x32xf32>
    %304 = math.exp %303 : vector<32x32xf32>
    %cst_89 = arith.constant 1.000000e+00 : f32
    %305 = vector.broadcast %cst_89 : f32 to vector<32x32xf32>
    %306 = arith.addf %305, %304 : vector<32x32xf32>
    %307 = arith.divf %305, %306 : vector<32x32xf32>
    %308 = vector.extract_strided_slice %288 {offsets = [0, 64], sizes = [32, 32], strides = [1, 1]} : vector<32x96xf32> to vector<32x32xf32>
    %309 = vector.extract_strided_slice %291 {offsets = [0, 64], sizes = [32, 32], strides = [1, 1]} : vector<32x96xf32> to vector<32x32xf32>
    %310 = arith.mulf %299, %309 : vector<32x32xf32>
    %311 = arith.addf %308, %310 : vector<32x32xf32>
    %312 = math.tanh %311 : vector<32x32xf32>
    %cst_90 = arith.constant 1.000000e+00 : f32
    %313 = vector.broadcast %cst_90 : f32 to vector<32x32xf32>
    %314 = arith.subf %313, %307 : vector<32x32xf32>
    %315 = arith.mulf %314, %312 : vector<32x32xf32>
    %316 = arith.mulf %307, %273 : vector<32x32xf32>
    %317 = arith.addf %315, %316 : vector<32x32xf32>
    %cst_91 = arith.constant dense<0.000000e+00> : vector<32x8xf32>
    %318 = tpu.matmul %317, %7, %cst_91 {dimension_numbers = #tpu.dot_dimension_numbers<[1], [0], [0], [1], [0, 0, 1, 1], [], []>} : vector<32x32xf32>, vector<32x8xf32>, vector<32x8xf32> -> vector<32x8xf32>
    %319 = vector.broadcast %11 : vector<1x8xf32> to vector<32x8xf32>
    %320 = arith.addf %318, %319 : vector<32x8xf32>
    %c0_92 = arith.constant 0 : index
    %c6 = arith.constant 6 : index
    %c0_93 = arith.constant 0 : index
    %321 = vector.load %arg11[%c0_92, %c6, %c0_93] : memref<32x8x8xf32, #tpu.memory_space<vmem>>, vector<32x1x8xf32>
    %322 = vector.shape_cast %321 : vector<32x1x8xf32> to vector<32x8xf32>
    %323 = vector.shape_cast %320 : vector<32x8xf32> to vector<32x1x8xf32>
    tpu.vector_store %arg11[%c0_92, %c6, %c0_93], %323 {strides = array<i32>} : memref<32x8x8xf32, #tpu.memory_space<vmem>>, vector<32x1x8xf32>,
    %324 = vector.extract_strided_slice %14 {offsets = [224, 0], sizes = [32, 32], strides = [1, 1]} : vector<256x32xf32> to vector<32x32xf32>
    %cst_94 = arith.constant dense<0.000000e+00> : vector<32x32xf32>
    %325 = tpu.matmul %3, %324, %cst_94 {dimension_numbers = #tpu.dot_dimension_numbers<[1], [0], [0], [1], [0, 0, 1, 1], [], []>} : vector<32x32xf32>, vector<32x32xf32>, vector<32x32xf32> -> vector<32x32xf32>
    %326 = vector.broadcast %8 : vector<1x32xf32> to vector<32x32xf32>
    %327 = arith.addf %325, %326 : vector<32x32xf32>
    %cst_95 = arith.constant 0.000000e+00 : f32
    %328 = vector.broadcast %cst_95 : f32 to vector<32x32xf32>
    %329 = arith.maximumf %327, %328 : vector<32x32xf32>
    %cst_96 = arith.constant dense<0.000000e+00> : vector<32x96xf32>
    %330 = tpu.matmul %329, %5, %cst_96 {dimension_numbers = #tpu.dot_dimension_numbers<[1], [0], [0], [1], [0, 0, 1, 1], [], []>} : vector<32x32xf32>, vector<32x96xf32>, vector<32x96xf32> -> vector<32x96xf32>
    %331 = vector.broadcast %9 : vector<1x96xf32> to vector<32x96xf32>
    %332 = arith.addf %330, %331 : vector<32x96xf32>
    %cst_97 = arith.constant dense<0.000000e+00> : vector<32x96xf32>
    %333 = tpu.matmul %317, %6, %cst_97 {dimension_numbers = #tpu.dot_dimension_numbers<[1], [0], [0], [1], [0, 0, 1, 1], [], []>} : vector<32x32xf32>, vector<32x96xf32>, vector<32x96xf32> -> vector<32x96xf32>
    %334 = vector.broadcast %10 : vector<1x96xf32> to vector<32x96xf32>
    %335 = arith.addf %333, %334 : vector<32x96xf32>
    %336 = vector.extract_strided_slice %332 {offsets = [0, 0], sizes = [32, 32], strides = [1, 1]} : vector<32x96xf32> to vector<32x32xf32>
    %337 = vector.extract_strided_slice %335 {offsets = [0, 0], sizes = [32, 32], strides = [1, 1]} : vector<32x96xf32> to vector<32x32xf32>
    %338 = arith.addf %336, %337 : vector<32x32xf32>
    %339 = arith.negf %338 : vector<32x32xf32>
    %340 = math.exp %339 : vector<32x32xf32>
    %cst_98 = arith.constant 1.000000e+00 : f32
    %341 = vector.broadcast %cst_98 : f32 to vector<32x32xf32>
    %342 = arith.addf %341, %340 : vector<32x32xf32>
    %343 = arith.divf %341, %342 : vector<32x32xf32>
    %344 = vector.extract_strided_slice %332 {offsets = [0, 32], sizes = [32, 32], strides = [1, 1]} : vector<32x96xf32> to vector<32x32xf32>
    %345 = vector.extract_strided_slice %335 {offsets = [0, 32], sizes = [32, 32], strides = [1, 1]} : vector<32x96xf32> to vector<32x32xf32>
    %346 = arith.addf %344, %345 : vector<32x32xf32>
    %347 = arith.negf %346 : vector<32x32xf32>
    %348 = math.exp %347 : vector<32x32xf32>
    %cst_99 = arith.constant 1.000000e+00 : f32
    %349 = vector.broadcast %cst_99 : f32 to vector<32x32xf32>
    %350 = arith.addf %349, %348 : vector<32x32xf32>
    %351 = arith.divf %349, %350 : vector<32x32xf32>
    %352 = vector.extract_strided_slice %332 {offsets = [0, 64], sizes = [32, 32], strides = [1, 1]} : vector<32x96xf32> to vector<32x32xf32>
    %353 = vector.extract_strided_slice %335 {offsets = [0, 64], sizes = [32, 32], strides = [1, 1]} : vector<32x96xf32> to vector<32x32xf32>
    %354 = arith.mulf %343, %353 : vector<32x32xf32>
    %355 = arith.addf %352, %354 : vector<32x32xf32>
    %356 = math.tanh %355 : vector<32x32xf32>
    %cst_100 = arith.constant 1.000000e+00 : f32
    %357 = vector.broadcast %cst_100 : f32 to vector<32x32xf32>
    %358 = arith.subf %357, %351 : vector<32x32xf32>
    %359 = arith.mulf %358, %356 : vector<32x32xf32>
    %360 = arith.mulf %351, %317 : vector<32x32xf32>
    %361 = arith.addf %359, %360 : vector<32x32xf32>
    %cst_101 = arith.constant dense<0.000000e+00> : vector<32x8xf32>
    %362 = tpu.matmul %361, %7, %cst_101 {dimension_numbers = #tpu.dot_dimension_numbers<[1], [0], [0], [1], [0, 0, 1, 1], [], []>} : vector<32x32xf32>, vector<32x8xf32>, vector<32x8xf32> -> vector<32x8xf32>
    %363 = vector.broadcast %11 : vector<1x8xf32> to vector<32x8xf32>
    %364 = arith.addf %362, %363 : vector<32x8xf32>
    %c0_102 = arith.constant 0 : index
    %c7 = arith.constant 7 : index
    %c0_103 = arith.constant 0 : index
    %365 = vector.load %arg11[%c0_102, %c7, %c0_103] : memref<32x8x8xf32, #tpu.memory_space<vmem>>, vector<32x1x8xf32>
    %366 = vector.shape_cast %365 : vector<32x1x8xf32> to vector<32x8xf32>
    %367 = vector.shape_cast %364 : vector<32x8xf32> to vector<32x1x8xf32>
    tpu.vector_store %arg11[%c0_102, %c7, %c0_103], %367 {strides = array<i32>} : memref<32x8x8xf32, #tpu.memory_space<vmem>>, vector<32x1x8xf32>,
    %c0_104 = arith.constant 0 : index
    %c0_105 = arith.constant 0 : index
    %368 = vector.load %arg12[%c0_104, %c0_105] : memref<32x32xf32, #tpu.memory_space<vmem>>, vector<32x32xf32>
    tpu.vector_store %arg12[%c0_104, %c0_105], %361 {strides = array<i32>} : memref<32x32xf32, #tpu.memory_space<vmem>>, vector<32x32xf32>,
    return
  }
  func.func @transform_0(%arg0: i32) -> (i32, i32, i32) {
    %c0_i32 = arith.constant 0 : i32
    %c0_i32_0 = arith.constant 0 : i32
    %c0_i32_1 = arith.constant 0 : i32
    return %arg0, %c0_i32, %c0_i32_0 : i32, i32, i32
  }
  func.func @transform_1(%arg0: i32) -> (i32, i32) {
    %c0_i32 = arith.constant 0 : i32
    %c0_i32_0 = arith.constant 0 : i32
    %c0_i32_1 = arith.constant 0 : i32
    return %c0_i32, %c0_i32_0 : i32, i32
  }
  func.func @transform_2(%arg0: i32) -> (i32, i32) {
    %c0_i32 = arith.constant 0 : i32
    %c0_i32_0 = arith.constant 0 : i32
    %c0_i32_1 = arith.constant 0 : i32
    return %c0_i32, %c0_i32_0 : i32, i32
  }
  func.func @transform_3(%arg0: i32) -> (i32, i32) {
    %c0_i32 = arith.constant 0 : i32
    %c0_i32_0 = arith.constant 0 : i32
    %c0_i32_1 = arith.constant 0 : i32
    return %c0_i32, %c0_i32_0 : i32, i32
  }
  func.func @transform_4(%arg0: i32) -> (i32, i32) {
    %c0_i32 = arith.constant 0 : i32
    %c0_i32_0 = arith.constant 0 : i32
    %c0_i32_1 = arith.constant 0 : i32
    return %c0_i32, %c0_i32_0 : i32, i32
  }
  func.func @transform_5(%arg0: i32) -> (i32, i32) {
    %c0_i32 = arith.constant 0 : i32
    %c0_i32_0 = arith.constant 0 : i32
    %c0_i32_1 = arith.constant 0 : i32
    return %c0_i32, %c0_i32_0 : i32, i32
  }
  func.func @transform_6(%arg0: i32) -> (i32, i32) {
    %c0_i32 = arith.constant 0 : i32
    %c0_i32_0 = arith.constant 0 : i32
    %c0_i32_1 = arith.constant 0 : i32
    return %c0_i32, %c0_i32_0 : i32, i32
  }
  func.func @transform_7(%arg0: i32) -> (i32, i32) {
    %c0_i32 = arith.constant 0 : i32
    %c0_i32_0 = arith.constant 0 : i32
    %c0_i32_1 = arith.constant 0 : i32
    return %c0_i32, %c0_i32_0 : i32, i32
  }
  func.func @transform_8(%arg0: i32) -> (i32, i32) {
    %c0_i32 = arith.constant 0 : i32
    %c0_i32_0 = arith.constant 0 : i32
    %c0_i32_1 = arith.constant 0 : i32
    return %c0_i32, %c0_i32_0 : i32, i32
  }
  func.func @transform_9(%arg0: i32) -> (i32, i32) {
    %c0_i32 = arith.constant 0 : i32
    %c0_i32_0 = arith.constant 0 : i32
    %c0_i32_1 = arith.constant 0 : i32
    return %c0_i32, %c0_i32_0 : i32, i32
  }
  func.func @transform_10(%arg0: i32) -> (i32, i32, i32) {
    %c0_i32 = arith.constant 0 : i32
    %c0_i32_0 = arith.constant 0 : i32
    %c0_i32_1 = arith.constant 0 : i32
    return %c0_i32, %arg0, %c0_i32_0 : i32, i32, i32
  }
}

</mosaic_0001>

<bundles_post_ra>
// kernel: tgcn_forward.1
= control target key start
LH: loop header
LB: loop body
LE: loop exit
PB: predicated region body
PF: predicated region fallthrough
CT: control target
= control target key end

     0   :  { %vm194_vm0 = vcmask 1043456   ;;  %vm97_vm1 = vcmask 31744   ;;  %vm39_vm2 = vcmask 261120   ;;  %v7913_v24 = vmov 0.0   ;;  %s7914_s27 = smov 64   ;;  %s7915_s30 = smov 32   ;;  %s10339_s2 = inlined_call_operand.vmem [shape: f32[4,32], index: 2, kind: input, shape index: {}]   ;;  %s10340_s0 = inlined_call_operand.vmem [shape: f32[8,32,4], index: 0, kind: input, shape index: {}]   ;;  %s10341_s1 = inlined_call_operand.vmem [shape: f32[32,32], index: 1, kind: input, shape index: {}]   ;;  %s10342_s4 = inlined_call_operand.vmem [shape: f32[32,96], index: 4, kind: input, shape index: {}]   ;;  %s10343_s6 = inlined_call_operand.vmem [shape: f32[32,96], index: 6, kind: input, shape index: {}]   ;;  %s10344_s3 = inlined_call_operand.vmem [shape: f32[1,32], index: 3, kind: input, shape index: {}]   ;;  %s10345_s7 = inlined_call_operand.vmem [shape: f32[1,96], index: 7, kind: input, shape index: {}]   ;;  %s10346_s5 = inlined_call_operand.vmem [shape: f32[1,96], index: 5, kind: input, shape index: {}]   ;;  %s10347_s8 = inlined_call_operand.vmem [shape: f32[32,8], index: 8, kind: input, shape index: {}]   ;;  %s10348_s9 = inlined_call_operand.vmem [shape: f32[1,8], index: 9, kind: input, shape index: {}]   ;;  %s10349_s10 = inlined_call_operand.vmem [shape: f32[32,8,8], index: 10, kind: output, shape index: {}]  }
   0x1   :  { %v48_v0 = vld [vmem:[%s10339_s2] sm:$0xf]  ;;  %v66_v2 = vld [vmem:[%s10340_s0 + $0x8] sm:$0xff]  ;;  %v67_v3 = vld [vmem:[%s10340_s0 + $0x10] sm:$0xff]  ;;  %40 = vst.msk [vmem:[#allocation2] sm:$0xff] %vm39_vm2, %v7913_v24  ;;  %s7916_s19 = smov 96  }
   0x2   :  { %v65_v1 = vld [vmem:[%s10340_s0] sm:$0xff]  ;;  %6939 = vmatprep.subr.msk.mxu0 %vm194_vm0, %v48_v0  ;;  %v68_v4 = vld [vmem:[%s10340_s0 + $0x18] sm:$0xff]  ;;  %v50_v10 = vld [vmem:[%s10342_s4 + $0x8] sm:$0xff]  ;;  %41 = vst.msk [vmem:[#allocation2 + $0x8] sm:$0xff] %vm39_vm2, %v7913_v24  ;;  %vm1200_vm3 = vcmask 57344  }
   0x3   :  { %6941 = vmatprep.mubr.msk.f32.mxu0 %vm97_vm1, %v65_v1  ;;  %6940 = vmatpush3.msk.msra.mxu0 %vm194_vm0, %v48_v0  ;;  %v7995_v5 = vld [vmem:[%s10341_s1] sm:$0xff]  ;;  %v8010_v15 = vld [vmem:[%s10341_s1 + $0x8] sm:$0xff]  ;;  %v8015_v16 = vld [vmem:[%s10341_s1 + $0x10] sm:$0xff]  ;;  %42 = vst.msk [vmem:[#allocation2 + $0x10] sm:$0xff] %vm39_vm2, %v7913_v24 }
   0x4   :  { %6942 = vmatmul.mubr.msk.f32.vlgmr.msra.gmra.mrb[0].mxu0 %vm97_vm1, %v66_v2  ;;  %6997 = vmatprep.mubr.msk.f32.mxu1 %vm39_vm2, %v7995_v5  ;;  %v49_v9 = vld [vmem:[%s10342_s4] sm:$0xff]  ;;  %v8025_v17 = vld [vmem:[%s10341_s1 + $0x18] sm:$0xff]  ;;  %v51_v18 = vld [vmem:[%s10342_s4 + $0x10] sm:$0xff]  ;;  %43 = vst.msk [vmem:[#allocation2 + $0x18] sm:$0xff] %vm39_vm2, %v7913_v24 }
   0x5   :  { %6944 = vmatprep.mubr.msk.f32.mxu0 %vm97_vm1, %v67_v3  ;;  %v8005_v14 = vpack.c.bf16 %v50_v10, %v49_v9  ;;  %v52_v19 = vld [vmem:[%s10342_s4 + $0x18] sm:$0xff]  ;;  %v53_v21 = vld [vmem:[%s10343_s6] sm:$0xff]  ;;  %v54_v22 = vld [vmem:[%s10343_s6 + $0x8] sm:$0xff] }
   0x6   :  { %v8036_v20 = vpack.c.bf16 %v52_v19, %v51_v18  ;;  %v8046_v23 = vpack.c.bf16 %v54_v22, %v53_v21  ;;  %v8056_v25 = vld [vmem:[%s10344_s3] ss:$0 sm:$0xff]  ;;  %v55_v30 = vld [vmem:[%s10343_s6 + $0x10] sm:$0xff]  ;;  %v56_v31 = vld [vmem:[%s10343_s6 + $0x18] sm:$0xff] }
   0x7   :  { %v8067_v37 = vpack.c.bf16 %v56_v31, %v55_v30  ;;  %v8096_v49 = vld [vmem:[%s10345_s7] ss:$0 sm:$0xff] }
   0x8   :  { %6945 = vmatmul.mubr.msk.f32.gmra.mrb[2].mxu0 %vm97_vm1, %v68_v4  ;;  %v8074_v41 = vld [vmem:[#allocation2] sm:$0xff] }
   0x9   :  { %v8081_v42 = vld [vmem:[#allocation2 + $0x8] sm:$0xff]  ;;  %v8109_v58 = vld [vmem:[%s10346_s5] ss:$0 sm:$0xff] }
   0xa   :  { %v8083_v43 = vld [vmem:[#allocation2 + $0x10] sm:$0xff] }
   0xb   :  { %v8089_v44 = vld [vmem:[#allocation2 + $0x18] sm:$0xff] }
  0xd7   :  { %v6943_v6 = vpop.f32.mrb[0].mxu0 }
  0xd8   :  { %v264_v7 = vpop.f32.mrb[1].mxu0 }
  0xd9   :  { %v7437_v8 = vpack.c.bf16 %v6943_v6, %v264_v7 }
  0xdb   :  { %v6946_v11 = vpop.f32.mrb[2].mxu0  ;;  %7438 = vmatprep.subr.bf16.mxu1 %v7437_v8 }
  0xdc   :  { %v274_v12 = vpop.f32.mrb[3].mxu0  ;;  %7440 = vmatpush3.bf16.msra.mxu1 %v7437_v8 }
  0xdd   :  { %v7441_v13 = vpack.c.bf16 %v6946_v11, %v274_v12 }
  0xdf   :  { %7442 = vmatprep.subr.bf16.mxu1 %v7441_v13 }
  0xe0   :  { %7444 = vmatpush3.bf16.msra.mxu1 %v7441_v13 }
  0xe1   :  { %7446 = vmatprep.subr.bf16.mxu1 %v8005_v14 }
  0xe3   :  { %6998 = vmatmul.mubr.msk.f32.vlgmr.msra.gmra.mrb[0].mxu1 %vm39_vm2, %v8010_v15 }
  0xe4   :  { %7000 = vmatprep.mubr.msk.f32.mxu1 %vm39_vm2, %v8015_v16  ;;  %7448 = vmatpush3.bf16.msra.mxu1 %v8005_v14 }
  0xe5   :  { %7450 = vmatprep.subr.bf16.mxu1 %v8036_v20 }
  0xe7   :  { %7001 = vmatmul.mubr.msk.f32.gmra.mrb[2].mxu1 %vm39_vm2, %v8025_v17 }
  0xe8   :  { %7452 = vmatpush3.bf16.msra.mxu1 %v8036_v20 }
  0xe9   :  { %7454 = vmatprep.subr.bf16.mxu1 %v8046_v23 }
 0x1b6   :  { %v6999_v26 = vpop.f32.mrb[0].mxu1 }
 0x1b7   :  { %v518_v27 = vadd.f32 %v6999_v26, %v8056_v25  ;;  %v512_v28 = vpop.f32.mrb[1].mxu1 }
 0x1b8   :  { %v513_v29 = vadd.f32 %v8056_v25, %v512_v28 }
 0x1b9   :  { %v532_v34 = vmax.f32 %v518_v27, 0.0 }
 0x1ba   :  { %v531_v32 = vmax.f32 %v513_v29, 0.0  ;;  %v7002_v33 = vpop.f32.mrb[2].mxu1 }
 0x1bb   :  { %v528_v35 = vadd.f32 %v7002_v33, %v8056_v25  ;;  %v522_v36 = vpop.f32.mrb[3].mxu1 }
 0x1bc   :  { %v523_v38 = vadd.f32 %v8056_v25, %v522_v36  ;;  %7011 = vmatprep.mubr.msk.f32.mxu1 %vm39_vm2, %v531_v32  ;;  %v70_v36 = vld [vmem:[%s10340_s0 + $0x28] sm:$0xff] }
 0x1bd   :  { %7012 = vmatmul.mubr.msk.f32.vlgmr.msra.gmra.mrb[4].mxu1 %vm39_vm2, %v532_v34  ;;  %v534_v40 = vmax.f32 %v528_v35, 0.0  ;;  %v69_v35 = vld [vmem:[%s10340_s0 + $0x20] sm:$0xff] }
 0x1be   :  { %v533_v39 = vmax.f32 %v523_v38, 0.0  ;;  %7456 = vmatpush3.bf16.msra.mxu1 %v8046_v23  ;;  %v71_v38 = vld [vmem:[%s10340_s0 + $0x30] sm:$0xff]  ;;  %6947 = vmatprep.mubr.msk.f32.mxu0 %vm97_vm1, %v69_v35 }
 0x1bf   :  { %7458 = vmatprep.subr.bf16.mxu1 %v8067_v37  ;;  %6948 = vmatmul.mubr.msk.f32.gmra.mrb[4].mxu0 %vm97_vm1, %v70_v36 }
 0x1c0   :  { %7014 = vmatprep.mubr.msk.f32.mxu1 %vm39_vm2, %v533_v39  ;;  %6950 = vmatprep.mubr.msk.f32.mxu0 %vm97_vm1, %v71_v38  ;;  %v72_v39 = vld [vmem:[%s10340_s0 + $0x38] sm:$0xff] }
 0x1c1   :  { %7015 = vmatmul.mubr.msk.f32.gmra.mrb[6].mxu1 %vm39_vm2, %v534_v40 }
 0x1c2   :  { %7460 = vmatpush3.bf16.msra.mxu1 %v8067_v37  ;;  %7025 = vmatprep.mubr.msk.f32.mxu1 %vm39_vm2, %v8074_v41 }
 0x1c3   :  { %6951 = vmatmul.mubr.msk.f32.gmra.mrb[6].mxu0 %vm97_vm1, %v72_v39  ;;  %v7917_v39 = vmov 1966171168  }
 0x1c5   :  { %7026 = vmatmul.mubr.msk.f32.vlgmr.msra.gmra.mrb[8].mxu1 %vm39_vm2, %v8081_v42 }
 0x1c6   :  { %7028 = vmatprep.mubr.msk.f32.mxu1 %vm39_vm2, %v8083_v43 }
 0x1c9   :  { %7029 = vmatmul.mubr.msk.f32.gmra.mrb[10].mxu1 %vm39_vm2, %v8089_v44 }
 0x290   :  { %v7013_v45 = vpop.f32.mrb[4].mxu1 }
 0x291   :  { %v619_v46 = vpop.f32.mrb[5].mxu1  ;;  %v625_v61 = vadd.f32 %v7013_v45, %v8109_v58 }
 0x292   :  { %v620_v59 = vadd.f32 %v8109_v58, %v619_v46 }
 0x294   :  { %v7016_v47 = vpop.f32.mrb[6].mxu1 }
 0x295   :  { %v629_v48 = vpop.f32.mrb[7].mxu1  ;;  %v635_v2 = vadd.f32 %v7016_v47, %v8109_v58 }
 0x296   :  { %v630_v62 = vadd.f32 %v8109_v58, %v629_v48 }
 0x298   :  { %v7027_v50 = vpop.f32.mrb[8].mxu1 }
 0x299   :  { %v722_v51 = vpop.f32.mrb[9].mxu1  ;;  %v728_v55 = vadd.f32 %v7027_v50, %v8096_v49 }
 0x29a   :  { %v723_v52 = vadd.f32 %v8096_v49, %v722_v51 }
 0x29b   :  { %v742_v63 = vadd.f32 %v728_v55, %v625_v61 }
 0x29c   :  { %v7030_v53 = vpop.f32.mrb[10].mxu1  ;;  %773 = vrot.lane.b32.xlu0 %v723_v52, %s7914_s27  ;;  %v741_v60 = vadd.f32 %v723_v52, %v620_v59  ;;  %v58_v52 = vld [vmem:[%s10347_s8 + $0x8] sm:$0xff] }
 0x29d   :  { %v732_v54 = vpop.f32.mrb[11].mxu1  ;;  %v738_v57 = vadd.f32 %v7030_v53, %v8096_v49  ;;  %v6502_v3 = vmul.f32 -1.442695, %v742_v63 }
 0x29e   :  { %v733_v56 = vadd.f32 %v8096_v49, %v732_v54  ;;  %v6501_v0 = vmul.f32 -1.442695, %v741_v60 }
 0x29f   :  { %v744_v4 = vadd.f32 %v738_v57, %v635_v2 }
 0x2a0   :  { %777 = vrot.lane.b32.xlu1 %v733_v56, %s7914_s27  ;;  %775 = vrot.lane.b32.xlu0 %v728_v55, %s7914_s27  ;;  %v743_v1 = vadd.f32 %v733_v56, %v630_v62  ;;  %7702 = vpow2.f32 %v6501_v0  ;;  %v6949_v56 = vpop.f32.mrb[4].mxu0 }
 0x2a1   :  { %7704 = vpow2.f32 %v6502_v3  ;;  %v6504_v7 = vmul.f32 -1.442695, %v744_v4 }
 0x2a2   :  { %v6503_v6 = vmul.f32 -1.442695, %v743_v1 }
 0x2a4   :  { %779 = vrot.lane.b32.xlu1 %v738_v57, %s7914_s27  ;;  %7706 = vpow2.f32 %v6503_v6  ;;  %v59_v57 = vld [vmem:[%s10347_s8 + $0x10] sm:$0xff] }
 0x2a5   :  { %7708 = vpow2.f32 %v6504_v7 }
 0x2aa   :  { %v7703_v8 = vpop.eup %7702 }
 0x2ab   :  { %v7705_v9 = vpop.eup %7704  ;;  %v757_v10 = vadd.f32 1.0, %v7703_v8 }
 0x2ac   :  { %v758_v12 = vadd.f32 1.0, %v7705_v9 }
 0x2ad   :  { %7710 = vrcp.f32 %v757_v10 }
 0x2ae   :  { %v7707_v11 = vpop.eup %7706  ;;  %7712 = vrcp.f32 %v758_v12 }
 0x2af   :  { %v759_v13 = vadd.f32 1.0, %v7707_v11  ;;  %v7709_v18 = vpop.eup %7708 }
 0x2b0   :  { %v760_v19 = vadd.f32 1.0, %v7709_v18 }
 0x2b1   :  { %7714 = vrcp.f32 %v759_v13 }
 0x2b2   :  { %7716 = vrcp.f32 %v760_v19 }
 0x2b7   :  { %v8115_v21 = vpop.eup %7710 }
 0x2b8   :  { %v8118_v26 = vpop.eup %7712  ;;  %v813_v10 = vsub.f32 1.0, %v8115_v21 }
 0x2b9   :  { %v814_v4 = vsub.f32 1.0, %v8118_v26 }
 0x2bb   :  { %v8121_v27 = vpop.eup %7714 }
 0x2bc   :  { %v8127_v32 = vpop.eup %7716 }
 0x30e   :  { %v774_v22 = vpop.permute.xlu0 %773 }
 0x30f   :  { %v785_v24 = vmul.f32 %v8115_v21, %v774_v22  ;;  %v815_v22 = vsub.f32 1.0, %v8121_v27 }
 0x311   :  { %793 = vrot.lane.b32.xlu0 %v785_v24, %s7914_s27 }
 0x312   :  { %v778_v28 = vpop.permute.xlu1 %777  ;;  %v776_v29 = vpop.permute.xlu0 %775 }
 0x313   :  { %v787_v30 = vmul.f32 %v8121_v27, %v778_v28  ;;  %v786_v31 = vmul.f32 %v8118_v26, %v776_v29 }
 0x315   :  { %795 = vrot.lane.b32.xlu1 %v786_v31, %s7914_s27  ;;  %797 = vrot.lane.b32.xlu0 %v787_v30, %s7914_s27 }
 0x316   :  { %v780_v33 = vpop.permute.xlu1 %779 }
 0x317   :  { %v788_v34 = vmul.f32 %v8127_v32, %v780_v33 }
 0x319   :  { %799 = vrot.lane.b32.xlu1 %v788_v34, %s7914_s27 }
 0x31d   :  { %837 = vrot.lane.b32.xlu1 %v8074_v41, %s7915_s30 }
 0x321   :  { %839 = vrot.lane.b32.xlu1 %v8081_v42, %s7915_s30 }
 0x325   :  { %841 = vrot.lane.b32.xlu1 %v8083_v43, %s7915_s30 }
 0x329   :  { %843 = vrot.lane.b32.xlu1 %v8089_v44, %s7915_s30  ;;  %v57_v44 = vld [vmem:[%s10347_s8] sm:$0xff] }
 0x32a   :  { %v8159_v53 = vpack.c.bf16 %v58_v52, %v57_v44 }
 0x32c   :  { %7462 = vmatprep.subr.bf16.mxu1 %v8159_v53 }
 0x32d   :  { %7464 = vmatpush3.bf16.msra.mxu1 %v8159_v53 }
 0x383   :  { %v794_v40 = vpop.permute.xlu0 %793 }
 0x384   :  { %v805_v45 = vadd.f32 %v794_v40, %v620_v59  ;;  %v60_v59 = vld [vmem:[%s10347_s8 + $0x18] sm:$0xff]  ;;  %v974_v40 = vunpack.c.l.s4 %v7917_v39 }
 0x387   :  { %v796_v41 = vpop.permute.xlu1 %795  ;;  %v798_v46 = vpop.permute.xlu0 %797 }
 0x388   :  { %v806_v42 = vadd.f32 %v796_v41, %v625_v61  ;;  %v807_v47 = vadd.f32 %v798_v46, %v630_v62  ;;  %v8171_v61 = vpack.c.bf16 %v60_v59, %v59_v57  ;;  %v284_v62 = vpop.f32.mrb[5].mxu0  ;;  %v976_v41 = vlaneseq  ;;  %v8231_v46 = vld [vmem:[%s10348_s9] ss:$0 sm:$0xff] }
 0x389   :  { %v7469_v63 = vpack.c.bf16 %v6949_v56, %v284_v62  ;;  %v6952_v0 = vpop.f32.mrb[6].mxu0 }
 0x38a   :  { %7718 = vtanh.f32 %v806_v42  ;;  %7466 = vmatprep.subr.bf16.mxu1 %v8171_v61  ;;  %v294_v1 = vpop.f32.mrb[7].mxu0  ;;  %v975_v42 = vunpack.c.0.s8 %v974_v40 }
 0x38b   :  { %7720 = vtanh.f32 %v805_v45  ;;  %v800_v48 = vpop.permute.xlu1 %799  ;;  %7468 = vmatpush3.bf16.msra.mxu1 %v8171_v61  ;;  %v7473_v3 = vpack.c.bf16 %v6952_v0, %v294_v1  ;;  %v977_v45 = vshrl.u32 %v976_v41, 7 }
 0x38c   :  { %7722 = vtanh.f32 %v807_v47  ;;  %v808_v50 = vadd.f32 %v800_v48, %v635_v2  ;;  %7470 = vmatprep.subr.bf16.mxu1 %v7469_v63 }
 0x38d   :  { %v8233_v47 = vsub.s32 %v975_v42, %v977_v45 }
 0x38e   :  { %7724 = vtanh.f32 %v808_v50 }
 0x38f   :  { %v838_v60 = vpop.permute.xlu1 %837 }
 0x390   :  { %v849_v13 = vmul.f32 %v8115_v21, %v838_v60  ;;  %v816_v21 = vsub.f32 1.0, %v8127_v32 }
 0x393   :  { %v840_v2 = vpop.permute.xlu1 %839 }
 0x394   :  { %v7719_v51 = vpop.eup %7718  ;;  %v850_v7 = vmul.f32 %v8118_v26, %v840_v2 }
 0x395   :  { %823 = vrot.lane.b32.xlu0 %v7719_v51, %s7916_s19  ;;  %v7721_v43 = vpop.eup %7720 }
 0x396   :  { %v7723_v54 = vpop.eup %7722 }
 0x397   :  { %v842_v11 = vpop.permute.xlu1 %841 }
 0x398   :  { %v7725_v55 = vpop.eup %7724  ;;  %v851_v26 = vmul.f32 %v8121_v27, %v842_v11 }
 0x399   :  { %821 = vrot.lane.b32.xlu0 %v7721_v43, %s7916_s19 }
 0x39b   :  { %v844_v29 = vpop.permute.xlu1 %843 }
 0x39c   :  { %v852_v33 = vmul.f32 %v8127_v32, %v844_v29 }
 0x39d   :  { %825 = vrot.lane.b32.xlu0 %v7723_v54, %s7916_s19 }
 0x3a1   :  { %827 = vrot.lane.b32.xlu0 %v7725_v55, %s7916_s19 }
 0x407   :  { %v824_v6 = vpop.permute.xlu0 %823 }
 0x408   :  { %v834_v8 = vmul.f32 %v824_v6, %v814_v4 }
 0x40a   :  { %v8177_v9 = vadd.f32 %v850_v7, %v834_v8 }
 0x40b   :  { %v822_v12 = vpop.permute.xlu0 %821 }
 0x40c   :  { %v833_v18 = vmul.f32 %v822_v12, %v813_v10  ;;  %869 = vrot.lane.b32.xlu1 %v8177_v9, %s7916_s19 }
 0x40e   :  { %v8183_v19 = vadd.f32 %v849_v13, %v833_v18 }
 0x40f   :  { %v826_v24 = vpop.permute.xlu0 %825 }
 0x410   :  { %v835_v28 = vmul.f32 %v826_v24, %v815_v22  ;;  %867 = vrot.lane.b32.xlu0 %v8183_v19, %s7916_s19 }
 0x412   :  { %v8189_v30 = vadd.f32 %v851_v26, %v835_v28 }
 0x413   :  { %v828_v31 = vpop.permute.xlu0 %827 }
 0x414   :  { %v836_v34 = vmul.f32 %v828_v31, %v816_v21  ;;  %871 = vrot.lane.b32.xlu0 %v8189_v30, %s7916_s19 }
 0x416   :  { %v8195_v35 = vadd.f32 %v852_v33, %v836_v34 }
 0x418   :  { %873 = vrot.lane.b32.xlu1 %v8195_v35, %s7916_s19 }
 0x47e   :  { %v8201_v36 = vpop.permute.xlu1 %869 }
 0x482   :  { %v8199_v27 = vpop.permute.xlu0 %867 }
 0x483   :  { %7039 = vmatprep.mubr.msk.f32.mxu1 %vm39_vm2, %v8199_v27 }
 0x484   :  { %7040 = vmatmul.mubr.msk.f32.vlgmr.msra.gmra.mrb[12].mxu1 %vm39_vm2, %v8201_v36 }
 0x485   :  { %7472 = vmatpush3.bf16.msra.mxu1 %v7469_v63 }
 0x486   :  { %v8207_v32 = vpop.permute.xlu0 %871  ;;  %7474 = vmatprep.subr.bf16.mxu1 %v7473_v3 }
 0x487   :  { %7042 = vmatprep.mubr.msk.f32.mxu1 %vm39_vm2, %v8207_v32 }
 0x489   :  { %7476 = vmatpush3.bf16.msra.mxu1 %v7473_v3 }
 0x48a   :  { %v8211_v38 = vpop.permute.xlu1 %873  ;;  %7478 = vmatprep.subr.bf16.mxu1 %v8005_v14 }
 0x48b   :  { %7043 = vmatmul.mubr.msk.f32.gmra.mrb[14].mxu1 %vm39_vm2, %v8211_v38 }
 0x48c   :  { %7053 = vmatprep.mubr.msk.f32.mxu1 %vm39_vm2, %v7995_v5 }
 0x48f   :  { %7054 = vmatmul.mubr.msk.f32.vlgmr.msra.gmra.mrb[16].mxu1 %vm39_vm2, %v8010_v15 }
 0x490   :  { %7056 = vmatprep.mubr.msk.f32.mxu1 %vm39_vm2, %v8015_v16  ;;  %7480 = vmatpush3.bf16.msra.mxu1 %v8005_v14 }
 0x491   :  { %7482 = vmatprep.subr.bf16.mxu1 %v8036_v20 }
 0x493   :  { %7057 = vmatmul.mubr.msk.f32.gmra.mrb[18].mxu1 %vm39_vm2, %v8025_v17 }
 0x494   :  { %7484 = vmatpush3.bf16.msra.mxu1 %v8036_v20 }
 0x495   :  { %7486 = vmatprep.subr.bf16.mxu1 %v8046_v23 }
 0x557   :  { %v7041_v48 = vpop.f32.mrb[12].mxu1 }
 0x558   :  { %v955_v50 = vadd.f32 %v7041_v48, %v8231_v46  ;;  %v949_v51 = vpop.f32.mrb[13].mxu1 }
 0x559   :  { %v950_v43 = vadd.f32 %v8231_v46, %v949_v51 }
 0x55a   :  { %v1021_v44 = vcombine.high %v955_v50, %v955_v50  ;;  %v1028_v52 = vrot.slane %v955_v50, %v8233_v47 }
 0x55b   :  { %v972_v54 = vcombine.high %v950_v43, %v950_v43  ;;  %v979_v55 = vrot.slane %v950_v43, %v8233_v47 }
 0x55c   :  { %v1035_v56 = vrot.slane %v1021_v44, %v8233_v47  ;;  %v1036_v57 = vcombine.high %v1028_v52, %v1028_v52  ;;  %v1044_v59 = vrot.slane %v1028_v52, %v8233_v47 }
 0x55d   :  { %v986_v60 = vrot.slane %v972_v54, %v8233_v47  ;;  %v987_v62 = vcombine.high %v979_v55, %v979_v55  ;;  %v995_v63 = vrot.slane %v979_v55, %v8233_v47 }
 0x55e   :  { %v1037_v0 = vcombine.high %v1035_v56, %v1035_v56  ;;  %v1051_v1 = vrot.slane %v1035_v56, %v8233_v47  ;;  %v1058_v2 = vrot.slane %v1036_v57, %v8233_v47  ;;  %v1066_v3 = vcombine.high %v1044_v59, %v1044_v59  ;;  %1209 = vst.msk [vmem:[%s10349_s10 + $0x40] sm:$0x1] %vm1200_vm3, %v1044_v59  ;;  %v7044_v4 = vpop.f32.mrb[14].mxu1 }
 0x55f   :  { %v988_v6 = vcombine.high %v986_v60, %v986_v60  ;;  %v1002_v7 = vrot.slane %v986_v60, %v8233_v47  ;;  %v1009_v8 = vrot.slane %v987_v62, %v8233_v47  ;;  %v1017_v10 = vcombine.high %v995_v63, %v995_v63  ;;  %1201 = vst.msk [vmem:[%s10349_s10] sm:$0x1] %vm1200_vm3, %v995_v63  ;;  %v959_v11 = vpop.f32.mrb[15].mxu1 }
 0x560   :  { %v1065_v12 = vrot.slane %v1037_v0, %v8233_v47  ;;  %v1067_v13 = vcombine.high %v1051_v1, %v1051_v1  ;;  %v1068_v18 = vcombine.high %v1058_v2, %v1058_v2  ;;  %1210 = vst.msk [vmem:[%s10349_s10 + $0x48] sm:$0x1] %vm1200_vm3, %v1058_v2  ;;  %1211 = vst.msk [vmem:[%s10349_s10 + $0x50] sm:$0x1] %vm1200_vm3, %v1066_v3 }
 0x561   :  { %1213 = vst.msk [vmem:[%s10349_s10 + $0x60] sm:$0x1] %vm1200_vm3, %v1051_v1  ;;  %v965_v22 = vadd.f32 %v7044_v4, %v8231_v46  ;;  %v1016_v24 = vrot.slane %v988_v6, %v8233_v47  ;;  %v1018_v26 = vcombine.high %v1002_v7, %v1002_v7  ;;  %v1019_v28 = vcombine.high %v1009_v8, %v1009_v8 }
 0x562   :  { %1202 = vst.msk [vmem:[%s10349_s10 + $0x8] sm:$0x1] %vm1200_vm3, %v1009_v8  ;;  %1203 = vst.msk [vmem:[%s10349_s10 + $0x10] sm:$0x1] %vm1200_vm3, %v1017_v10  ;;  %v960_v29 = vadd.f32 %v8231_v46, %v959_v11  ;;  %v1069_v21 = vcombine.high %v1065_v12, %v1065_v12  ;;  %v7055_v34 = vpop.f32.mrb[16].mxu1 }
 0x563   :  { %1205 = vst.msk [vmem:[%s10349_s10 + $0x20] sm:$0x1] %vm1200_vm3, %v1002_v7  ;;  %1212 = vst.msk [vmem:[%s10349_s10 + $0x58] sm:$0x1] %vm1200_vm3, %v1068_v18  ;;  %v1119_v31 = vcombine.high %v965_v22, %v965_v22  ;;  %v1126_v33 = vrot.slane %v965_v22, %v8233_v47  ;;  %v1020_v39 = vcombine.high %v1016_v24, %v1016_v24  ;;  %v1299_v45 = vpop.f32.mrb[17].mxu1 }
 0x564   :  { %1214 = vst.msk [vmem:[%s10349_s10 + $0x68] sm:$0x1] %vm1200_vm3, %v1065_v12  ;;  %1215 = vst.msk [vmem:[%s10349_s10 + $0x70] sm:$0x1] %vm1200_vm3, %v1067_v13  ;;  %v1070_v40 = vcombine.high %v960_v29, %v960_v29  ;;  %v1077_v41 = vrot.slane %v960_v29, %v8233_v47  ;;  %v1305_v42 = vadd.f32 %v7055_v34, %v8056_v25  ;;  %v78_v34 = vld [vmem:[%s10340_s0 + $0x68] sm:$0xff] }
 0x565   :  { %1204 = vst.msk [vmem:[%s10349_s10 + $0x18] sm:$0x1] %vm1200_vm3, %v1019_v28  ;;  %1206 = vst.msk [vmem:[%s10349_s10 + $0x28] sm:$0x1] %vm1200_vm3, %v1016_v24  ;;  %v1133_v48 = vrot.slane %v1119_v31, %v8233_v47  ;;  %v1134_v50 = vcombine.high %v1126_v33, %v1126_v33  ;;  %v1142_v51 = vrot.slane %v1126_v33, %v8233_v47  ;;  %v77_v33 = vld [vmem:[%s10340_s0 + $0x60] sm:$0xff] }
 0x566   :  { %1207 = vst.msk [vmem:[%s10349_s10 + $0x30] sm:$0x1] %vm1200_vm3, %v1018_v26  ;;  %1216 = vst.msk [vmem:[%s10349_s10 + $0x78] sm:$0x1] %vm1200_vm3, %v1069_v21  ;;  %v1300_v43 = vadd.f32 %v8056_v25, %v1299_v45  ;;  %v1084_v44 = vrot.slane %v1070_v40, %v8233_v47  ;;  %v1085_v52 = vcombine.high %v1077_v41, %v1077_v41  ;;  %v1319_v55 = vmax.f32 %v1305_v42, 0.0  ;;  %v7058_v62 = vpop.f32.mrb[18].mxu1 }
 0x567   :  { %1208 = vst.msk [vmem:[%s10349_s10 + $0x38] sm:$0x1] %vm1200_vm3, %v1020_v39  ;;  %v1093_v54 = vrot.slane %v1077_v41, %v8233_v47  ;;  %v1135_v56 = vcombine.high %v1133_v48, %v1133_v48  ;;  %v1149_v57 = vrot.slane %v1133_v48, %v8233_v47  ;;  %v1156_v59 = vrot.slane %v1134_v50, %v8233_v47  ;;  %v1309_v3 = vpop.f32.mrb[19].mxu1 }
 0x568   :  { %v1164_v60 = vcombine.high %v1142_v51, %v1142_v51  ;;  %1225 = vst.msk [vmem:[%s10349_s10 + $0xc0] sm:$0x1] %vm1200_vm3, %v1142_v51  ;;  %v1086_v63 = vcombine.high %v1084_v44, %v1084_v44  ;;  %v1100_v0 = vrot.slane %v1084_v44, %v8233_v47  ;;  %v1107_v1 = vrot.slane %v1085_v52, %v8233_v47 }
 0x569   :  { %v1115_v2 = vcombine.high %v1093_v54, %v1093_v54  ;;  %1217 = vst.msk [vmem:[%s10349_s10 + $0x80] sm:$0x1] %vm1200_vm3, %v1093_v54  ;;  %v1163_v4 = vrot.slane %v1135_v56, %v8233_v47  ;;  %v1165_v6 = vcombine.high %v1149_v57, %v1149_v57  ;;  %v1166_v7 = vcombine.high %v1156_v59, %v1156_v59 }
 0x56a   :  { %1226 = vst.msk [vmem:[%s10349_s10 + $0xc8] sm:$0x1] %vm1200_vm3, %v1156_v59  ;;  %1227 = vst.msk [vmem:[%s10349_s10 + $0xd0] sm:$0x1] %vm1200_vm3, %v1164_v60  ;;  %v1318_v8 = vmax.f32 %v1300_v43, 0.0  ;;  %v1114_v10 = vrot.slane %v1086_v63, %v8233_v47  ;;  %v1116_v11 = vcombine.high %v1100_v0, %v1100_v0  ;;  %v1117_v12 = vcombine.high %v1107_v1, %v1107_v1 }
 0x56b   :  { %1229 = vst.msk [vmem:[%s10349_s10 + $0xe0] sm:$0x1] %vm1200_vm3, %v1149_v57  ;;  %1218 = vst.msk [vmem:[%s10349_s10 + $0x88] sm:$0x1] %vm1200_vm3, %v1107_v1  ;;  %v1315_v13 = vadd.f32 %v7058_v62, %v8056_v25  ;;  %v1167_v18 = vcombine.high %v1163_v4, %v1163_v4  ;;  %v1310_v22 = vadd.f32 %v8056_v25, %v1309_v3 }
 0x56c   :  { %1219 = vst.msk [vmem:[%s10349_s10 + $0x90] sm:$0x1] %vm1200_vm3, %v1115_v2  ;;  %1221 = vst.msk [vmem:[%s10349_s10 + $0xa0] sm:$0x1] %vm1200_vm3, %v1100_v0  ;;  %7067 = vmatprep.mubr.msk.f32.mxu1 %vm39_vm2, %v1318_v8  ;;  %v1118_v24 = vcombine.high %v1114_v10, %v1114_v10  ;;  %v79_v8 = vld [vmem:[%s10340_s0 + $0x70] sm:$0xff] }
 0x56d   :  { %1228 = vst.msk [vmem:[%s10349_s10 + $0xd8] sm:$0x1] %vm1200_vm3, %v1166_v7  ;;  %1230 = vst.msk [vmem:[%s10349_s10 + $0xe8] sm:$0x1] %vm1200_vm3, %v1163_v4  ;;  %7068 = vmatmul.mubr.msk.f32.vlgmr.msra.gmra.mrb[20].mxu1 %vm39_vm2, %v1319_v55  ;;  %v1320_v25 = vmax.f32 %v1310_v22, 0.0  ;;  %v1321_v26 = vmax.f32 %v1315_v13, 0.0 }
 0x56e   :  { %1231 = vst.msk [vmem:[%s10349_s10 + $0xf0] sm:$0x1] %vm1200_vm3, %v1165_v6  ;;  %1220 = vst.msk [vmem:[%s10349_s10 + $0x98] sm:$0x1] %vm1200_vm3, %v1117_v12  ;;  %7488 = vmatpush3.bf16.msra.mxu1 %v8046_v23  ;;  %v82_v12 = vld [vmem:[%s10340_s0 + $0x88] sm:$0xff]  ;;  %v83_v13 = vld [vmem:[%s10340_s0 + $0x90] sm:$0xff] }
 0x56f   :  { %1222 = vst.msk [vmem:[%s10349_s10 + $0xa8] sm:$0x1] %vm1200_vm3, %v1114_v10  ;;  %1223 = vst.msk [vmem:[%s10349_s10 + $0xb0] sm:$0x1] %vm1200_vm3, %v1116_v11  ;;  %7490 = vmatprep.subr.bf16.mxu1 %v8067_v37  ;;  %7070 = vmatprep.mubr.msk.f32.mxu1 %vm39_vm2, %v1320_v25  ;;  %v80_v10 = vld [vmem:[%s10340_s0 + $0x78] sm:$0xff]  ;;  %v81_v11 = vld [vmem:[%s10340_s0 + $0x80] sm:$0xff] }
 0x570   :  { %1232 = vst.msk [vmem:[%s10349_s10 + $0xf8] sm:$0x1] %vm1200_vm3, %v1167_v18  ;;  %1224 = vst.msk [vmem:[%s10349_s10 + $0xb8] sm:$0x1] %vm1200_vm3, %v1118_v24  ;;  %v84_v18 = vld [vmem:[%s10340_s0 + $0x98] sm:$0xff] }
 0x571   :  { %7071 = vmatmul.mubr.msk.f32.gmra.mrb[22].mxu1 %vm39_vm2, %v1321_v26 }
 0x572   :  { %7492 = vmatpush3.bf16.msra.mxu1 %v8067_v37  ;;  %7081 = vmatprep.mubr.msk.f32.mxu1 %vm39_vm2, %v8199_v27  ;;  %v73_v27 = vld [vmem:[%s10340_s0 + $0x40] sm:$0xff] }
 0x573   :  { %7494 = vmatprep.subr.bf16.mxu1 %v8159_v53  ;;  %6953 = vmatprep.mubr.msk.f32.mxu0 %vm97_vm1, %v73_v27 }
 0x575   :  { %7082 = vmatmul.mubr.msk.f32.vlgmr.msra.gmra.mrb[24].mxu1 %vm39_vm2, %v8201_v36  ;;  %v74_v36 = vld [vmem:[%s10340_s0 + $0x48] sm:$0xff] }
 0x576   :  { %7084 = vmatprep.mubr.msk.f32.mxu1 %vm39_vm2, %v8207_v32  ;;  %7496 = vmatpush3.bf16.msra.mxu1 %v8159_v53  ;;  %v75_v32 = vld [vmem:[%s10340_s0 + $0x50] sm:$0xff] }
 0x577   :  { %7498 = vmatprep.subr.bf16.mxu1 %v8171_v61  ;;  %6954 = vmatmul.mubr.msk.f32.gmra.mrb[8].mxu0 %vm97_vm1, %v74_v36 }
 0x578   :  { %6956 = vmatprep.mubr.msk.f32.mxu0 %vm97_vm1, %v75_v32  ;;  %v85_v32 = vld [vmem:[%s10340_s0 + $0xa0] sm:$0xff] }
 0x579   :  { %7085 = vmatmul.mubr.msk.f32.gmra.mrb[26].mxu1 %vm39_vm2, %v8211_v38  ;;  %v76_v38 = vld [vmem:[%s10340_s0 + $0x58] sm:$0xff] }
 0x57a   :  { %7500 = vmatpush3.bf16.msra.mxu1 %v8171_v61 }
 0x57b   :  { %7510 = vmatprep.subr.bf16.mxu1 %v8005_v14  ;;  %6957 = vmatmul.mubr.msk.f32.gmra.mrb[10].mxu0 %vm97_vm1, %v76_v38 }
 0x57c   :  { %6959 = vmatprep.mubr.msk.f32.mxu0 %vm97_vm1, %v77_v33 }
 0x57f   :  { %6960 = vmatmul.mubr.msk.f32.gmra.mrb[12].mxu0 %vm97_vm1, %v78_v34 }
 0x580   :  { %6962 = vmatprep.mubr.msk.f32.mxu0 %vm97_vm1, %v79_v8 }
 0x583   :  { %6963 = vmatmul.mubr.msk.f32.gmra.mrb[14].mxu0 %vm97_vm1, %v80_v10 }
 0x584   :  { %6965 = vmatprep.mubr.msk.f32.mxu0 %vm97_vm1, %v81_v11 }
 0x587   :  { %6966 = vmatmul.mubr.msk.f32.gmra.mrb[16].mxu0 %vm97_vm1, %v82_v12 }
 0x588   :  { %6968 = vmatprep.mubr.msk.f32.mxu0 %vm97_vm1, %v83_v13 }
 0x58b   :  { %6969 = vmatmul.mubr.msk.f32.gmra.mrb[18].mxu0 %vm97_vm1, %v84_v18 }
 0x58c   :  { %6971 = vmatprep.mubr.msk.f32.mxu0 %vm97_vm1, %v85_v32 }
 0x640   :  { %v7069_v28 = vpop.f32.mrb[20].mxu1 }
 0x641   :  { %v1400_v29 = vpop.f32.mrb[21].mxu1  ;;  %v8448_v43 = vadd.f32 %v7069_v28, %v8109_v58 }
 0x642   :  { %v8451_v44 = vadd.f32 %v8109_v58, %v1400_v29  ;;  %v86_v29 = vld [vmem:[%s10340_s0 + $0xa8] sm:$0xff] }
 0x643   :  { %6972 = vmatmul.mubr.msk.f32.gmra.mrb[20].mxu0 %vm97_vm1, %v86_v29 }
 0x644   :  { %v7072_v21 = vpop.f32.mrb[22].mxu1 }
 0x645   :  { %v1410_v31 = vpop.f32.mrb[23].mxu1  ;;  %v8456_v55 = vadd.f32 %v7072_v21, %v8109_v58 }
 0x646   :  { %v8459_v56 = vadd.f32 %v8109_v58, %v1410_v31 }
 0x648   :  { %v7083_v39 = vpop.f32.mrb[24].mxu1 }
 0x649   :  { %v1491_v40 = vadd.f32 %v7083_v39, %v8096_v49  ;;  %v1485_v41 = vpop.f32.mrb[25].mxu1  ;;  %v87_v39 = vld [vmem:[%s10340_s0 + $0xb0] sm:$0xff] }
 0x64a   :  { %v1486_v42 = vadd.f32 %v8096_v49, %v1485_v41  ;;  %6974 = vmatprep.mubr.msk.f32.mxu0 %vm97_vm1, %v87_v39  ;;  %v89_v41 = vld [vmem:[%s10340_s0 + $0xc0] sm:$0xff] }
 0x64b   :  { %1538 = vrot.lane.b32.xlu1 %v1491_v40, %s7914_s27  ;;  %v1505_v52 = vadd.f32 %v1491_v40, %v8448_v43  ;;  %v88_v40 = vld [vmem:[%s10340_s0 + $0xb8] sm:$0xff] }
 0x64c   :  { %v7086_v45 = vpop.f32.mrb[26].mxu1  ;;  %1536 = vrot.lane.b32.xlu0 %v1486_v42, %s7914_s27  ;;  %v1504_v54 = vadd.f32 %v1486_v42, %v8451_v44  ;;  %v6955_v42 = vpop.f32.mrb[8].mxu0  ;;  %6975 = vmatmul.mubr.msk.f32.gmra.mrb[22].mxu0 %vm97_vm1, %v88_v40 }
 0x64d   :  { %v1501_v48 = vadd.f32 %v7086_v45, %v8096_v49  ;;  %v1495_v50 = vpop.f32.mrb[27].mxu1  ;;  %v304_v45 = vpop.f32.mrb[9].mxu0  ;;  %6977 = vmatprep.mubr.msk.f32.mxu0 %vm97_vm1, %v89_v41 }
 0x64e   :  { %v1496_v51 = vadd.f32 %v8096_v49, %v1495_v50  ;;  %v6523_v49 = vmul.f32 -1.442695, %v1505_v52  ;;  %v6522_v59 = vmul.f32 -1.442695, %v1504_v54  ;;  %v7501_v50 = vpack.c.bf16 %v6955_v42, %v304_v45  ;;  %v91_v52 = vld [vmem:[%s10340_s0 + $0xd0] sm:$0xff] }
 0x64f   :  { %1542 = vrot.lane.b32.xlu1 %v1501_v48, %s7914_s27  ;;  %v1507_v57 = vadd.f32 %v1501_v48, %v8456_v55  ;;  %v90_v48 = vld [vmem:[%s10340_s0 + $0xc8] sm:$0xff] }
 0x650   :  { %1540 = vrot.lane.b32.xlu0 %v1496_v51, %s7914_s27  ;;  %v1506_v60 = vadd.f32 %v1496_v51, %v8459_v56  ;;  %7726 = vpow2.f32 %v6523_v49  ;;  %v6958_v51 = vpop.f32.mrb[10].mxu0  ;;  %7502 = vmatprep.subr.bf16.mxu0 %v7501_v50 }
 0x651   :  { %v6525_v62 = vmul.f32 -1.442695, %v1507_v57  ;;  %7728 = vpow2.f32 %v6522_v59  ;;  %v314_v54 = vpop.f32.mrb[11].mxu0  ;;  %6978 = vmatmul.mubr.msk.f32.gmra.mrb[24].mxu0 %vm97_vm1, %v90_v48  ;;  %v92_v57 = vld [vmem:[%s10340_s0 + $0xd8] sm:$0xff]  ;;  %v93_v59 = vld [vmem:[%s10340_s0 + $0xe0] sm:$0xff] }
 0x652   :  { %v6524_v63 = vmul.f32 -1.442695, %v1506_v60  ;;  %v7505_v49 = vpack.c.bf16 %v6958_v51, %v314_v54  ;;  %6980 = vmatprep.mubr.msk.f32.mxu0 %vm97_vm1, %v91_v52  ;;  %7504 = vmatpush3.bf16.msra.mxu0 %v7501_v50  ;;  %v94_v60 = vld [vmem:[%s10340_s0 + $0xe8] sm:$0xff] }
 0x653   :  { %7730 = vpow2.f32 %v6525_v62  ;;  %v95_v62 = vld [vmem:[%s10340_s0 + $0xf0] sm:$0xff] }
 0x654   :  { %7732 = vpow2.f32 %v6524_v63  ;;  %7506 = vmatprep.subr.bf16.mxu0 %v7505_v49  ;;  %v96_v63 = vld [vmem:[%s10340_s0 + $0xf8] sm:$0xff] }
 0x655   :  { %6981 = vmatmul.mubr.msk.f32.gmra.mrb[26].mxu0 %vm97_vm1, %v92_v57 }
 0x656   :  { %6983 = vmatprep.mubr.msk.f32.mxu0 %vm97_vm1, %v93_v59  ;;  %7508 = vmatpush3.bf16.msra.mxu0 %v7505_v49 }
 0x657   :  { %7518 = vmatprep.subr.bf16.mxu0 %v8046_v23 }
 0x659   :  { %6984 = vmatmul.mubr.msk.f32.gmra.mrb[28].mxu0 %vm97_vm1, %v94_v60 }
 0x65a   :  { %v7727_v0 = vpop.eup %7726  ;;  %6986 = vmatprep.mubr.msk.f32.mxu0 %vm97_vm1, %v95_v62 }
 0x65b   :  { %v7729_v1 = vpop.eup %7728  ;;  %v1521_v2 = vadd.f32 1.0, %v7727_v0 }
 0x65c   :  { %v1520_v4 = vadd.f32 1.0, %v7729_v1 }
 0x65d   :  { %v7731_v3 = vpop.eup %7730  ;;  %7734 = vrcp.f32 %v1521_v2  ;;  %6987 = vmatmul.mubr.msk.f32.gmra.mrb[30].mxu0 %vm97_vm1, %v96_v63 }
 0x65e   :  { %v7733_v6 = vpop.eup %7732  ;;  %v1523_v58 = vadd.f32 1.0, %v7731_v3  ;;  %7736 = vrcp.f32 %v1520_v4  ;;  %7109 = vmatprep.mubr.msk.f32.mxu0 %vm39_vm2, %v7995_v5 }
 0x65f   :  { %v1522_v7 = vadd.f32 1.0, %v7733_v6  ;;  %v6961_v6 = vpop.f32.mrb[12].mxu0 }
 0x660   :  { %7738 = vrcp.f32 %v1523_v58 }
 0x661   :  { %7740 = vrcp.f32 %v1522_v7  ;;  %7110 = vmatmul.mubr.msk.f32.vlgmr.msra.gmra.mrb[32].mxu0 %vm39_vm2, %v8010_v15 }
 0x662   :  { %7112 = vmatprep.mubr.msk.f32.mxu0 %vm39_vm2, %v8015_v16  ;;  %7520 = vmatpush3.bf16.msra.mxu0 %v8046_v23 }
 0x663   :  { %7522 = vmatprep.subr.bf16.mxu0 %v8067_v37 }
 0x665   :  { %7113 = vmatmul.mubr.msk.f32.gmra.mrb[34].mxu0 %vm39_vm2, %v8025_v17  ;;  %v324_v17 = vpop.f32.mrb[13].mxu0 }
 0x666   :  { %7524 = vmatpush3.bf16.msra.mxu0 %v8067_v37  ;;  %v8567_v58 = vpack.c.bf16 %v6961_v6, %v324_v17 }
 0x667   :  { %v8486_v22 = vpop.eup %7734 }
 0x668   :  { %v8488_v25 = vpop.eup %7736  ;;  %7534 = vmatprep.subr.bf16.mxu0 %v8567_v58  ;;  %v1577_v59 = vsub.f32 1.0, %v8486_v22 }
 0x669   :  { %v1576_v63 = vsub.f32 1.0, %v8488_v25 }
 0x66a   :  { %v8497_v38 = vpop.eup %7738 }
 0x66b   :  { %v8504_v21 = vpop.eup %7740 }
 0x6bd   :  { %v1539_v24 = vpop.permute.xlu1 %1538 }
 0x6be   :  { %v1549_v26 = vmul.f32 %v8486_v22, %v1539_v24  ;;  %v1537_v27 = vpop.permute.xlu0 %1536 }
 0x6bf   :  { %v1548_v36 = vmul.f32 %v8488_v25, %v1537_v27 }
 0x6c0   :  { %1558 = vrot.lane.b32.xlu1 %v1549_v26, %s7914_s27 }
 0x6c1   :  { %v1543_v28 = vpop.permute.xlu1 %1542  ;;  %1556 = vrot.lane.b32.xlu0 %v1548_v36, %s7914_s27 }
 0x6c2   :  { %v1551_v31 = vmul.f32 %v8497_v38, %v1543_v28  ;;  %v1541_v33 = vpop.permute.xlu0 %1540 }
 0x6c3   :  { %v1550_v34 = vmul.f32 %v8504_v21, %v1541_v33 }
 0x6c4   :  { %1562 = vrot.lane.b32.xlu1 %v1551_v31, %s7914_s27 }
 0x6c5   :  { %1560 = vrot.lane.b32.xlu0 %v1550_v34, %s7914_s27 }
 0x732   :  { %v1559_v0 = vpop.permute.xlu1 %1558 }
 0x733   :  { %v1569_v1 = vadd.f32 %v1559_v0, %v8448_v43  ;;  %v1557_v2 = vpop.permute.xlu0 %1556 }
 0x734   :  { %v1568_v5 = vadd.f32 %v1557_v2, %v8451_v44 }
 0x735   :  { %7742 = vtanh.f32 %v1569_v1  ;;  %v1601_v1 = vmul.f32 %v8486_v22, %v8177_v9 }
 0x736   :  { %7744 = vtanh.f32 %v1568_v5  ;;  %v1563_v15 = vpop.permute.xlu1 %1562 }
 0x737   :  { %v1571_v16 = vadd.f32 %v1563_v15, %v8456_v55  ;;  %v1561_v3 = vpop.permute.xlu0 %1560  ;;  %v6964_v55 = vpop.f32.mrb[14].mxu0  ;;  %v1600_v15 = vmul.f32 %v8488_v25, %v8183_v19  ;;  %v1602_v19 = vmul.f32 %v8504_v21, %v8189_v30 }
 0x738   :  { %v1570_v4 = vadd.f32 %v1561_v3, %v8459_v56  ;;  %v334_v56 = vpop.f32.mrb[15].mxu0 }
 0x739   :  { %7746 = vtanh.f32 %v1571_v16  ;;  %v8574_v10 = vpack.c.bf16 %v6964_v55, %v334_v56  ;;  %v6967_v11 = vpop.f32.mrb[16].mxu0 }
 0x73a   :  { %7748 = vtanh.f32 %v1570_v4  ;;  %v344_v12 = vpop.f32.mrb[17].mxu0  ;;  %v1579_v4 = vsub.f32 1.0, %v8497_v38 }
 0x73b   :  { %v8576_v13 = vpack.c.bf16 %v6967_v11, %v344_v12  ;;  %v6970_v18 = vpop.f32.mrb[18].mxu0 }
 0x73c   :  { %v354_v24 = vpop.f32.mrb[19].mxu0 }
 0x73d   :  { %v8578_v26 = vpack.c.bf16 %v6970_v18, %v354_v24  ;;  %v6973_v27 = vpop.f32.mrb[20].mxu0 }
 0x73e   :  { %v364_v36 = vpop.f32.mrb[21].mxu0 }
 0x73f   :  { %v7743_v7 = vpop.eup %7742  ;;  %v8580_v32 = vpack.c.bf16 %v6973_v27, %v364_v36  ;;  %v6976_v28 = vpop.f32.mrb[22].mxu0  ;;  %v8647_v36 = vld [vmem:[%s10341_s1] sm:$0xff] }
 0x740   :  { %v7745_v8 = vpop.eup %7744  ;;  %1586 = vrot.lane.b32.xlu1 %v7743_v7, %s7916_s19  ;;  %v374_v29 = vpop.f32.mrb[23].mxu0  ;;  %v1578_v7 = vsub.f32 1.0, %v8504_v21 }
 0x741   :  { %1584 = vrot.lane.b32.xlu0 %v7745_v8, %s7916_s19  ;;  %v8582_v31 = vpack.c.bf16 %v6976_v28, %v374_v29  ;;  %v6979_v33 = vpop.f32.mrb[24].mxu0  ;;  %v1603_v8 = vmul.f32 %v8497_v38, %v8195_v35  ;;  %v8623_v38 = vld [vmem:[%s10344_s3] ss:$0 sm:$0xff]  ;;  %v8666_v29 = vld [vmem:[%s10341_s1 + $0x10] sm:$0xff] }
 0x742   :  { %v384_v34 = vpop.f32.mrb[25].mxu0 }
 0x743   :  { %v7747_v43 = vpop.eup %7746  ;;  %v8584_v39 = vpack.c.bf16 %v6979_v33, %v384_v34  ;;  %v6982_v40 = vpop.f32.mrb[26].mxu0  ;;  %v8677_v33 = vld [vmem:[%s10341_s1 + $0x18] sm:$0xff] }
 0x744   :  { %v7749_v44 = vpop.eup %7748  ;;  %1590 = vrot.lane.b32.xlu1 %v7747_v43, %s7916_s19  ;;  %v394_v41 = vpop.f32.mrb[27].mxu0 }
 0x745   :  { %1588 = vrot.lane.b32.xlu0 %v7749_v44, %s7916_s19  ;;  %v8586_v42 = vpack.c.bf16 %v6982_v40, %v394_v41  ;;  %v6985_v45 = vpop.f32.mrb[28].mxu0 }
 0x746   :  { %v404_v48 = vpop.f32.mrb[29].mxu0 }
 0x747   :  { %v8588_v50 = vpack.c.bf16 %v6985_v45, %v404_v48  ;;  %v6988_v51 = vpop.f32.mrb[30].mxu0  ;;  %v8689_v45 = vld [vmem:[%s10345_s7] ss:$0 sm:$0xff] }
 0x748   :  { %v414_v52 = vpop.f32.mrb[31].mxu0 }
 0x749   :  { %v8590_v54 = vpack.c.bf16 %v6988_v51, %v414_v52  ;;  %v7111_v49 = vpop.f32.mrb[32].mxu0 }
 0x74a   :  { %v2043_v57 = vpop.f32.mrb[33].mxu0  ;;  %v2049_v55 = vadd.f32 %v8623_v38, %v7111_v49 }
 0x74b   :  { %v7114_v60 = vpop.f32.mrb[34].mxu0  ;;  %v2044_v30 = vadd.f32 %v8623_v38, %v2043_v57 }
 0x74c   :  { %v2053_v0 = vpop.f32.mrb[35].mxu0  ;;  %v2063_v24 = vmax.f32 %v2049_v55, 0.0  ;;  %v2059_v27 = vadd.f32 %v8623_v38, %v7114_v60 }
 0x74d   :  { %v2062_v56 = vmax.f32 %v2044_v30, 0.0  ;;  %v2054_v11 = vadd.f32 %v8623_v38, %v2053_v0 }
 0x74e   :  { %v2065_v28 = vmax.f32 %v2059_v27, 0.0 }
 0x7b2   :  { %v1587_v62 = vpop.permute.xlu1 %1586 }
 0x7b3   :  { %v1597_v2 = vmul.f32 %v1587_v62, %v1577_v59  ;;  %v1585_v5 = vpop.permute.xlu0 %1584 }
 0x7b4   :  { %v1596_v16 = vmul.f32 %v1585_v5, %v1576_v63 }
 0x7b5   :  { %v8598_v3 = vadd.f32 %v1601_v1, %v1597_v2 }
 0x7b6   :  { %v8601_v6 = vadd.f32 %v1600_v15, %v1596_v16  ;;  %v1591_v17 = vpop.permute.xlu1 %1590 }
 0x7b7   :  { %v1599_v43 = vmul.f32 %v1591_v17, %v1579_v4  ;;  %1614 = vrot.lane.b32.xlu1 %v8598_v3, %s7916_s19  ;;  %v1589_v9 = vpop.permute.xlu0 %1588 }
 0x7b8   :  { %v1598_v22 = vmul.f32 %v1589_v9, %v1578_v7  ;;  %1612 = vrot.lane.b32.xlu0 %v8601_v6, %s7916_s19 }
 0x7b9   :  { %v8612_v25 = vadd.f32 %v1603_v8, %v1599_v43 }
 0x7ba   :  { %v8614_v44 = vadd.f32 %v1602_v19, %v1598_v22 }
 0x7bb   :  { %1618 = vrot.lane.b32.xlu1 %v8612_v25, %s7916_s19 }
 0x7bc   :  { %1616 = vrot.lane.b32.xlu0 %v8614_v44, %s7916_s19 }
 0x829   :  { %v1615_v35 = vpop.permute.xlu1 %1614 }
 0x82a   :  { %v1613_v21 = vpop.permute.xlu0 %1612 }
 0x82b   :  { %7095 = vmatprep.mubr.msk.f32.mxu1 %vm39_vm2, %v1613_v21  ;;  %7137 = vmatprep.mubr.msk.f32.mxu0 %vm39_vm2, %v1613_v21 }
 0x82c   :  { %7096 = vmatmul.mubr.msk.f32.vlgmr.msra.gmra.mrb[28].mxu1 %vm39_vm2, %v1615_v35  ;;  %7138 = vmatmul.mubr.msk.f32.vlgmr.msra.gmra.mrb[36].mxu0 %vm39_vm2, %v1615_v35 }
 0x82d   :  { %7512 = vmatpush3.bf16.msra.mxu1 %v8005_v14  ;;  %7536 = vmatpush3.bf16.msra.mxu0 %v8567_v58  ;;  %v1619_v18 = vpop.permute.xlu1 %1618  ;;  %v2064_v58 = vmax.f32 %v2054_v11, 0.0 }
 0x82e   :  { %v1617_v12 = vpop.permute.xlu0 %1616  ;;  %7514 = vmatprep.subr.bf16.mxu1 %v8036_v20  ;;  %7538 = vmatprep.subr.bf16.mxu0 %v8574_v10 }
 0x82f   :  { %7098 = vmatprep.mubr.msk.f32.mxu1 %vm39_vm2, %v1617_v12  ;;  %7140 = vmatprep.mubr.msk.f32.mxu0 %vm39_vm2, %v1617_v12 }
 0x830   :  { %7099 = vmatmul.mubr.msk.f32.gmra.mrb[30].mxu1 %vm39_vm2, %v1619_v18  ;;  %7141 = vmatmul.mubr.msk.f32.gmra.mrb[38].mxu0 %vm39_vm2, %v1619_v18 }
 0x831   :  { %7516 = vmatpush3.bf16.msra.mxu1 %v8036_v20  ;;  %7123 = vmatprep.mubr.msk.f32.mxu1 %vm39_vm2, %v2062_v56 }
 0x832   :  { %7540 = vmatpush3.bf16.msra.mxu0 %v8574_v10  ;;  %7165 = vmatprep.mubr.msk.f32.mxu0 %vm39_vm2, %v8647_v36  ;;  %v8658_v10 = vld [vmem:[%s10341_s1 + $0x8] sm:$0xff] }
 0x833   :  { %7550 = vmatprep.subr.bf16.mxu0 %v8046_v23  ;;  %7526 = vmatprep.subr.bf16.mxu1 %v8159_v53 }
 0x834   :  { %7124 = vmatmul.mubr.msk.f32.vlgmr.msra.gmra.mrb[32].mxu1 %vm39_vm2, %v2063_v24 }
 0x835   :  { %7126 = vmatprep.mubr.msk.f32.mxu1 %vm39_vm2, %v2064_v58  ;;  %7166 = vmatmul.mubr.msk.f32.vlgmr.msra.gmra.mrb[40].mxu0 %vm39_vm2, %v8658_v10 }
 0x836   :  { %7552 = vmatpush3.bf16.msra.mxu0 %v8046_v23  ;;  %7168 = vmatprep.mubr.msk.f32.mxu0 %vm39_vm2, %v8666_v29 }
 0x837   :  { %7554 = vmatprep.subr.bf16.mxu0 %v8067_v37  ;;  %7528 = vmatpush3.bf16.msra.mxu1 %v8159_v53 }
 0x838   :  { %7127 = vmatmul.mubr.msk.f32.gmra.mrb[34].mxu1 %vm39_vm2, %v2065_v28  ;;  %7530 = vmatprep.subr.bf16.mxu1 %v8171_v61 }
 0x839   :  { %7169 = vmatmul.mubr.msk.f32.gmra.mrb[42].mxu0 %vm39_vm2, %v8677_v33 }
 0x83a   :  { %7556 = vmatpush3.bf16.msra.mxu0 %v8067_v37 }
 0x83b   :  { %7566 = vmatprep.subr.bf16.mxu0 %v8576_v13  ;;  %7532 = vmatpush3.bf16.msra.mxu1 %v8171_v61 }
 0x83c   :  { %7542 = vmatprep.subr.bf16.mxu1 %v8005_v14 }
 0x8ff   :  { %v7097_v34 = vpop.f32.mrb[28].mxu1  ;;  %v7139_v40 = vpop.f32.mrb[36].mxu0 }
 0x900   :  { %v1700_v41 = vadd.f32 %v7097_v34, %v8231_v46  ;;  %v8692_v48 = vadd.f32 %v8689_v45, %v7139_v40  ;;  %v1694_v51 = vpop.f32.mrb[29].mxu1  ;;  %v2229_v52 = vpop.f32.mrb[37].mxu0 }
 0x901   :  { %v1695_v49 = vadd.f32 %v8231_v46, %v1694_v51  ;;  %v8696_v57 = vadd.f32 %v8689_v45, %v2229_v52 }
 0x902   :  { %v1766_v59 = vcombine.high %v1700_v41, %v1700_v41  ;;  %v1773_v60 = vrot.slane %v1700_v41, %v8233_v47  ;;  %2282 = vrot.lane.b32.xlu1 %v8692_v48, %s7914_s27 }
 0x903   :  { %v1717_v62 = vcombine.high %v1695_v49, %v1695_v49  ;;  %v1724_v63 = vrot.slane %v1695_v49, %v8233_v47  ;;  %v7100_v0 = vpop.f32.mrb[30].mxu1  ;;  %v7142_v1 = vpop.f32.mrb[38].mxu0  ;;  %2280 = vrot.lane.b32.xlu0 %v8696_v57, %s7914_s27 }
 0x904   :  { %v1780_v2 = vrot.slane %v1766_v59, %v8233_v47  ;;  %v1781_v5 = vcombine.high %v1773_v60, %v1773_v60  ;;  %v1789_v15 = vrot.slane %v1773_v60, %v8233_v47  ;;  %v1710_v16 = vadd.f32 %v7100_v0, %v8231_v46  ;;  %v1704_v4 = vpop.f32.mrb[31].mxu1  ;;  %v2239_v17 = vpop.f32.mrb[39].mxu0 }
 0x905   :  { %v1731_v7 = vrot.slane %v1717_v62, %v8233_v47  ;;  %v1732_v8 = vcombine.high %v1724_v63, %v1724_v63  ;;  %v1740_v43 = vrot.slane %v1724_v63, %v8233_v47  ;;  %v8710_v9 = vadd.f32 %v8689_v45, %v7142_v1 }
 0x906   :  { %v1782_v19 = vcombine.high %v1780_v2, %v1780_v2  ;;  %v1796_v22 = vrot.slane %v1780_v2, %v8233_v47  ;;  %v1803_v35 = vrot.slane %v1781_v5, %v8233_v47  ;;  %v1811_v30 = vcombine.high %v1789_v15, %v1789_v15  ;;  %1953 = vst.msk [vmem:[%s10349_s10 + $0x41] sm:$0x1] %vm1200_vm3, %v1789_v15 }
 0x907   :  { %v1733_v21 = vcombine.high %v1731_v7, %v1731_v7  ;;  %v1747_v55 = vrot.slane %v1731_v7, %v8233_v47  ;;  %v1754_v56 = vrot.slane %v1732_v8, %v8233_v47  ;;  %v1762_v11 = vcombine.high %v1740_v43, %v1740_v43  ;;  %1945 = vst.msk [vmem:[%s10349_s10 + $0x1] sm:$0x1] %vm1200_vm3, %v1740_v43  ;;  %v8726_v12 = vpop.f32.mrb[32].mxu1 }
 0x908   :  { %2286 = vrot.lane.b32.xlu1 %v8710_v9, %s7914_s27  ;;  %v1810_v18 = vrot.slane %v1782_v19, %v8233_v47  ;;  %v1812_v24 = vcombine.high %v1796_v22, %v1796_v22  ;;  %v1813_v27 = vcombine.high %v1803_v35, %v1803_v35  ;;  %1954 = vst.msk [vmem:[%s10349_s10 + $0x49] sm:$0x1] %vm1200_vm3, %v1803_v35  ;;  %1955 = vst.msk [vmem:[%s10349_s10 + $0x51] sm:$0x1] %vm1200_vm3, %v1811_v30  ;;  %v8741_v28 = vpop.f32.mrb[33].mxu1 }
 0x909   :  { %1957 = vst.msk [vmem:[%s10349_s10 + $0x61] sm:$0x1] %vm1200_vm3, %v1796_v22  ;;  %v1864_v58 = vcombine.high %v1710_v16, %v1710_v16  ;;  %v1761_v34 = vrot.slane %v1733_v21, %v8233_v47  ;;  %v1763_v40 = vcombine.high %v1747_v55, %v1747_v55  ;;  %v1764_v41 = vcombine.high %v1754_v56, %v1754_v56 }
 0x90a   :  { %1946 = vst.msk [vmem:[%s10349_s10 + $0x9] sm:$0x1] %vm1200_vm3, %v1754_v56  ;;  %1947 = vst.msk [vmem:[%s10349_s10 + $0x11] sm:$0x1] %vm1200_vm3, %v1762_v11  ;;  %v1871_v51 = vrot.slane %v1710_v16, %v8233_v47  ;;  %v1814_v52 = vcombine.high %v1810_v18, %v1810_v18  ;;  %v1705_v59 = vadd.f32 %v8231_v46, %v1704_v4 }
 0x90b   :  { %1949 = vst.msk [vmem:[%s10349_s10 + $0x21] sm:$0x1] %vm1200_vm3, %v1747_v55  ;;  %1956 = vst.msk [vmem:[%s10349_s10 + $0x59] sm:$0x1] %vm1200_vm3, %v1813_v27  ;;  %v1878_v49 = vrot.slane %v1864_v58, %v8233_v47  ;;  %v2240_v60 = vadd.f32 %v8689_v45, %v2239_v17  ;;  %v1765_v62 = vcombine.high %v1761_v34, %v1761_v34  ;;  %v7128_v0 = vpop.f32.mrb[34].mxu1 }
 0x90c   :  { %1958 = vst.msk [vmem:[%s10349_s10 + $0x69] sm:$0x1] %vm1200_vm3, %v1810_v18  ;;  %1959 = vst.msk [vmem:[%s10349_s10 + $0x71] sm:$0x1] %vm1200_vm3, %v1812_v24  ;;  %v1879_v63 = vcombine.high %v1871_v51, %v1871_v51  ;;  %v1887_v46 = vrot.slane %v1871_v51, %v8233_v47  ;;  %v1815_v5 = vcombine.high %v1705_v59, %v1705_v59  ;;  %v2154_v16 = vpop.f32.mrb[35].mxu1 }
 0x90d   :  { %1948 = vst.msk [vmem:[%s10349_s10 + $0x19] sm:$0x1] %vm1200_vm3, %v1764_v41  ;;  %1950 = vst.msk [vmem:[%s10349_s10 + $0x29] sm:$0x1] %vm1200_vm3, %v1761_v34  ;;  %v1880_v1 = vcombine.high %v1878_v49, %v1878_v49  ;;  %v1894_v2 = vrot.slane %v1878_v49, %v8233_v47  ;;  %v1822_v15 = vrot.slane %v1705_v59, %v8233_v47  ;;  %2284 = vrot.lane.b32.xlu0 %v2240_v60, %s7914_s27  ;;  %v8870_v34 = vld [vmem:[%s10346_s5] ss:$0 sm:$0xff] }
 0x90e   :  { %1951 = vst.msk [vmem:[%s10349_s10 + $0x31] sm:$0x1] %vm1200_vm3, %v1763_v40  ;;  %1960 = vst.msk [vmem:[%s10349_s10 + $0x79] sm:$0x1] %vm1200_vm3, %v1814_v52  ;;  %v1901_v4 = vrot.slane %v1879_v63, %v8233_v47  ;;  %v1909_v17 = vcombine.high %v1887_v46, %v1887_v46  ;;  %v1829_v43 = vrot.slane %v1815_v5, %v8233_v47 }
 0x90f   :  { %1952 = vst.msk [vmem:[%s10349_s10 + $0x39] sm:$0x1] %vm1200_vm3, %v1765_v62  ;;  %1969 = vst.msk [vmem:[%s10349_s10 + $0xc1] sm:$0x1] %vm1200_vm3, %v1887_v46  ;;  %v1908_v7 = vrot.slane %v1880_v1, %v8233_v47  ;;  %v1910_v8 = vcombine.high %v1894_v2, %v1894_v2  ;;  %v1830_v19 = vcombine.high %v1822_v15, %v1822_v15 }
 0x910   :  { %1973 = vst.msk [vmem:[%s10349_s10 + $0xe1] sm:$0x1] %vm1200_vm3, %v1894_v2  ;;  %v1911_v22 = vcombine.high %v1901_v4, %v1901_v4  ;;  %1970 = vst.msk [vmem:[%s10349_s10 + $0xc9] sm:$0x1] %vm1200_vm3, %v1901_v4  ;;  %v1838_v35 = vrot.slane %v1822_v15, %v8233_v47  ;;  %v1831_v21 = vcombine.high %v1829_v43, %v1829_v43 }
 0x911   :  { %1971 = vst.msk [vmem:[%s10349_s10 + $0xd1] sm:$0x1] %vm1200_vm3, %v1909_v17  ;;  %v1912_v30 = vcombine.high %v1908_v7, %v1908_v7  ;;  %1974 = vst.msk [vmem:[%s10349_s10 + $0xe9] sm:$0x1] %vm1200_vm3, %v1908_v7  ;;  %v1845_v55 = vrot.slane %v1829_v43, %v8233_v47  ;;  %v1852_v56 = vrot.slane %v1830_v19, %v8233_v47 }
 0x912   :  { %1975 = vst.msk [vmem:[%s10349_s10 + $0xf1] sm:$0x1] %vm1200_vm3, %v1910_v8  ;;  %1972 = vst.msk [vmem:[%s10349_s10 + $0xd9] sm:$0x1] %vm1200_vm3, %v1911_v22  ;;  %v1860_v11 = vcombine.high %v1838_v35, %v1838_v35  ;;  %v1859_v18 = vrot.slane %v1831_v21, %v8233_v47  ;;  %v2150_v40 = vadd.f32 %v8870_v34, %v8726_v12 }
 0x913   :  { %1961 = vst.msk [vmem:[%s10349_s10 + $0x81] sm:$0x1] %vm1200_vm3, %v1838_v35  ;;  %1976 = vst.msk [vmem:[%s10349_s10 + $0xf9] sm:$0x1] %vm1200_vm3, %v1912_v30  ;;  %v1861_v24 = vcombine.high %v1845_v55, %v1845_v55  ;;  %v1862_v27 = vcombine.high %v1852_v56, %v1852_v56  ;;  %v2145_v41 = vadd.f32 %v8870_v34, %v8741_v28 }
 0x914   :  { %1962 = vst.msk [vmem:[%s10349_s10 + $0x89] sm:$0x1] %vm1200_vm3, %v1852_v56  ;;  %1965 = vst.msk [vmem:[%s10349_s10 + $0xa1] sm:$0x1] %vm1200_vm3, %v1845_v55  ;;  %v1863_v58 = vcombine.high %v1859_v18, %v1859_v18  ;;  %v2249_v51 = vadd.f32 %v8692_v48, %v2150_v40  ;;  %v2160_v49 = vadd.f32 %v8870_v34, %v7128_v0 }
 0x915   :  { %1963 = vst.msk [vmem:[%s10349_s10 + $0x91] sm:$0x1] %vm1200_vm3, %v1860_v11  ;;  %1964 = vst.msk [vmem:[%s10349_s10 + $0x99] sm:$0x1] %vm1200_vm3, %v1862_v27  ;;  %v2248_v52 = vadd.f32 %v8696_v57, %v2145_v41  ;;  %v2155_v46 = vadd.f32 %v8870_v34, %v2154_v16 }
 0x916   :  { %1966 = vst.msk [vmem:[%s10349_s10 + $0xa9] sm:$0x1] %vm1200_vm3, %v1859_v18  ;;  %1967 = vst.msk [vmem:[%s10349_s10 + $0xb1] sm:$0x1] %vm1200_vm3, %v1861_v24  ;;  %v6543_v59 = vmul.f32 -1.442695, %v2249_v51  ;;  %v2251_v63 = vadd.f32 %v8710_v9, %v2160_v49 }
 0x917   :  { %1968 = vst.msk [vmem:[%s10349_s10 + $0xb9] sm:$0x1] %vm1200_vm3, %v1863_v58  ;;  %v6542_v62 = vmul.f32 -1.442695, %v2248_v52  ;;  %v2250_v2 = vadd.f32 %v2240_v60, %v2155_v46 }
 0x918   :  { %7750 = vpow2.f32 %v6543_v59  ;;  %v6545_v1 = vmul.f32 -1.442695, %v2251_v63 }
 0x919   :  { %7752 = vpow2.f32 %v6542_v62  ;;  %v6544_v12 = vmul.f32 -1.442695, %v2250_v2 }
 0x91a   :  { %7754 = vpow2.f32 %v6545_v1 }
 0x91b   :  { %7756 = vpow2.f32 %v6544_v12 }
 0x922   :  { %v7751_v5 = vpop.eup %7750 }
 0x923   :  { %v7753_v28 = vpop.eup %7752  ;;  %v2265_v48 = vadd.f32 1.0, %v7751_v5 }
 0x924   :  { %v2264_v15 = vadd.f32 1.0, %v7753_v28  ;;  %v7755_v57 = vpop.eup %7754 }
 0x925   :  { %7758 = vrcp.f32 %v2265_v48  ;;  %v2267_v0 = vadd.f32 1.0, %v7755_v57  ;;  %v7757_v4 = vpop.eup %7756 }
 0x926   :  { %7760 = vrcp.f32 %v2264_v15  ;;  %v2266_v9 = vadd.f32 1.0, %v7757_v4 }
 0x927   :  { %7762 = vrcp.f32 %v2267_v0 }
 0x928   :  { %7764 = vrcp.f32 %v2266_v9 }
 0x92f   :  { %v7759_v17 = vpop.eup %7758 }
 0x930   :  { %v7761_v7 = vpop.eup %7760  ;;  %v2321_v2 = vsub.f32 1.0, %v7759_v17 }
 0x931   :  { %v7763_v19 = vpop.eup %7762  ;;  %v2320_v12 = vsub.f32 1.0, %v7761_v7  ;;  %v2344_v48 = vmul.f32 %v7761_v7, %v8601_v6 }
 0x932   :  { %v7765_v30 = vpop.eup %7764  ;;  %v2323_v9 = vsub.f32 1.0, %v7763_v19 }
 0x933   :  { %v2322_v6 = vsub.f32 1.0, %v7765_v30 }
 0x974   :  { %v2283_v16 = vpop.permute.xlu1 %2282 }
 0x975   :  { %v2293_v8 = vmul.f32 %v7759_v17, %v2283_v16  ;;  %v2281_v60 = vpop.permute.xlu0 %2280 }
 0x976   :  { %v2292_v43 = vmul.f32 %v7761_v7, %v2281_v60  ;;  %v2347_v60 = vmul.f32 %v7763_v19, %v8612_v25  ;;  %v2346_v7 = vmul.f32 %v7765_v30, %v8614_v44 }
 0x977   :  { %2302 = vrot.lane.b32.xlu1 %v2293_v8, %s7914_s27 }
 0x978   :  { %2300 = vrot.lane.b32.xlu0 %v2292_v43, %s7914_s27 }
 0x97a   :  { %v2287_v22 = vpop.permute.xlu1 %2286 }
 0x97b   :  { %v2295_v35 = vmul.f32 %v7763_v19, %v2287_v22 }
 0x97d   :  { %2306 = vrot.lane.b32.xlu1 %v2295_v35, %s7914_s27 }
 0x97f   :  { %v2285_v21 = vpop.permute.xlu0 %2284 }
 0x980   :  { %v2294_v55 = vmul.f32 %v7765_v30, %v2285_v21 }
 0x982   :  { %2304 = vrot.lane.b32.xlu0 %v2294_v55, %s7914_s27 }
 0x9e9   :  { %v2303_v56 = vpop.permute.xlu1 %2302 }
 0x9ea   :  { %v2313_v11 = vadd.f32 %v2303_v56, %v2150_v40  ;;  %v2301_v18 = vpop.permute.xlu0 %2300 }
 0x9eb   :  { %v2312_v24 = vadd.f32 %v2301_v18, %v2145_v41  ;;  %v7167_v41 = vpop.f32.mrb[40].mxu0 }
 0x9ec   :  { %7766 = vtanh.f32 %v2313_v11  ;;  %v2787_v1 = vpop.f32.mrb[41].mxu0  ;;  %v2793_v30 = vadd.f32 %v8623_v38, %v7167_v41 }
 0x9ed   :  { %7768 = vtanh.f32 %v2312_v24  ;;  %v7170_v0 = vpop.f32.mrb[42].mxu0  ;;  %v2788_v44 = vadd.f32 %v8623_v38, %v2787_v1 }
 0x9ee   :  { %v2797_v16 = vpop.f32.mrb[43].mxu0  ;;  %v2807_v11 = vmax.f32 %v2793_v30, 0.0 }
 0x9ef   :  { %v2307_v27 = vpop.permute.xlu1 %2306  ;;  %v2806_v21 = vmax.f32 %v2788_v44, 0.0  ;;  %v2798_v55 = vadd.f32 %v8623_v38, %v2797_v16 }
 0x9f0   :  { %v2315_v58 = vadd.f32 %v2307_v27, %v2160_v49 }
 0x9f1   :  { %v2808_v18 = vmax.f32 %v2798_v55, 0.0 }
 0x9f2   :  { %7770 = vtanh.f32 %v2315_v58 }
 0x9f4   :  { %v2305_v51 = vpop.permute.xlu0 %2304 }
 0x9f5   :  { %v2314_v52 = vadd.f32 %v2305_v51, %v2155_v46  ;;  %v2345_v46 = vmul.f32 %v7759_v17, %v8598_v3  ;;  %v8952_v51 = vld [vmem:[%s10348_s9] ss:$0 sm:$0xff] }
 0x9f6   :  { %v7767_v59 = vpop.eup %7766 }
 0x9f7   :  { %7772 = vtanh.f32 %v2314_v52  ;;  %v7769_v62 = vpop.eup %7768  ;;  %2330 = vrot.lane.b32.xlu1 %v7767_v59, %s7916_s19 }
 0x9f8   :  { %2328 = vrot.lane.b32.xlu0 %v7769_v62, %s7916_s19 }
 0x9fc   :  { %v7771_v63 = vpop.eup %7770 }
 0x9fd   :  { %2334 = vrot.lane.b32.xlu1 %v7771_v63, %s7916_s19 }
 0xa01   :  { %v7773_v40 = vpop.eup %7772 }
 0xa02   :  { %2332 = vrot.lane.b32.xlu0 %v7773_v40, %s7916_s19 }
 0xa69   :  { %v2331_v49 = vpop.permute.xlu1 %2330 }
 0xa6a   :  { %v2341_v5 = vmul.f32 %v2331_v49, %v2321_v2  ;;  %v2329_v28 = vpop.permute.xlu0 %2328 }
 0xa6b   :  { %v2340_v15 = vmul.f32 %v2329_v28, %v2320_v12 }
 0xa6c   :  { %v8891_v57 = vadd.f32 %v2345_v46, %v2341_v5 }
 0xa6d   :  { %v8893_v4 = vadd.f32 %v2344_v48, %v2340_v15 }
 0xa6e   :  { %2358 = vrot.lane.b32.xlu1 %v8891_v57, %s7916_s19 }
 0xa6f   :  { %v2335_v8 = vpop.permute.xlu1 %2334  ;;  %2356 = vrot.lane.b32.xlu0 %v8893_v4, %s7916_s19 }
 0xa70   :  { %v2343_v43 = vmul.f32 %v2335_v8, %v2323_v9 }
 0xa72   :  { %v8900_v3 = vadd.f32 %v2347_v60, %v2343_v43 }
 0xa74   :  { %v2333_v17 = vpop.permute.xlu0 %2332  ;;  %2362 = vrot.lane.b32.xlu1 %v8900_v3, %s7916_s19 }
 0xa75   :  { %v2342_v22 = vmul.f32 %v2333_v17, %v2322_v6 }
 0xa77   :  { %v8905_v35 = vadd.f32 %v2346_v7, %v2342_v22 }
 0xa79   :  { %2360 = vrot.lane.b32.xlu0 %v8905_v35, %s7916_s19 }
 0xae0   :  { %v2359_v19 = vpop.permute.xlu1 %2358 }
 0xae1   :  { %v2357_v25 = vpop.permute.xlu0 %2356 }
 0xae2   :  { %7151 = vmatprep.mubr.msk.f32.mxu1 %vm39_vm2, %v2357_v25  ;;  %7193 = vmatprep.mubr.msk.f32.mxu0 %vm39_vm2, %v2357_v25 }
 0xae3   :  { %7152 = vmatmul.mubr.msk.f32.vlgmr.msra.gmra.mrb[36].mxu1 %vm39_vm2, %v2359_v19  ;;  %7194 = vmatmul.mubr.msk.f32.vlgmr.msra.gmra.mrb[44].mxu0 %vm39_vm2, %v2359_v19 }
 0xae4   :  { %7568 = vmatpush3.bf16.msra.mxu0 %v8576_v13  ;;  %7544 = vmatpush3.bf16.msra.mxu1 %v8005_v14 }
 0xae5   :  { %7570 = vmatprep.subr.bf16.mxu0 %v8578_v26  ;;  %7546 = vmatprep.subr.bf16.mxu1 %v8036_v20 }
 0xae6   :  { %v2363_v56 = vpop.permute.xlu1 %2362 }
 0xae8   :  { %7572 = vmatpush3.bf16.msra.mxu0 %v8578_v26  ;;  %7548 = vmatpush3.bf16.msra.mxu1 %v8036_v20  ;;  %v2803_v26 = vadd.f32 %v8623_v38, %v7170_v0 }
 0xae9   :  { %7582 = vmatprep.subr.bf16.mxu0 %v8046_v23  ;;  %7558 = vmatprep.subr.bf16.mxu1 %v8159_v53 }
 0xaea   :  { %v2809_v24 = vmax.f32 %v2803_v26, 0.0 }
 0xaeb   :  { %v2361_v13 = vpop.permute.xlu0 %2360 }
 0xaec   :  { %7154 = vmatprep.mubr.msk.f32.mxu1 %vm39_vm2, %v2361_v13  ;;  %7196 = vmatprep.mubr.msk.f32.mxu0 %vm39_vm2, %v2361_v13 }
 0xaed   :  { %7155 = vmatmul.mubr.msk.f32.gmra.mrb[38].mxu1 %vm39_vm2, %v2363_v56  ;;  %7197 = vmatmul.mubr.msk.f32.gmra.mrb[46].mxu0 %vm39_vm2, %v2363_v56 }
 0xaee   :  { %7179 = vmatprep.mubr.msk.f32.mxu1 %vm39_vm2, %v2806_v21  ;;  %7221 = vmatprep.mubr.msk.f32.mxu0 %vm39_vm2, %v8647_v36 }
 0xaf1   :  { %7180 = vmatmul.mubr.msk.f32.vlgmr.msra.gmra.mrb[40].mxu1 %vm39_vm2, %v2807_v11  ;;  %7222 = vmatmul.mubr.msk.f32.vlgmr.msra.gmra.mrb[48].mxu0 %vm39_vm2, %v8658_v10 }
 0xaf2   :  { %7584 = vmatpush3.bf16.msra.mxu0 %v8046_v23  ;;  %7182 = vmatprep.mubr.msk.f32.mxu1 %vm39_vm2, %v2808_v18 }
 0xaf3   :  { %7586 = vmatprep.subr.bf16.mxu0 %v8067_v37  ;;  %7224 = vmatprep.mubr.msk.f32.mxu0 %vm39_vm2, %v8666_v29 }
 0xaf4   :  { %7560 = vmatpush3.bf16.msra.mxu1 %v8159_v53 }
 0xaf5   :  { %7183 = vmatmul.mubr.msk.f32.gmra.mrb[42].mxu1 %vm39_vm2, %v2809_v24  ;;  %7225 = vmatmul.mubr.msk.f32.gmra.mrb[50].mxu0 %vm39_vm2, %v8677_v33 }
 0xaf6   :  { %7588 = vmatpush3.bf16.msra.mxu0 %v8067_v37  ;;  %7562 = vmatprep.subr.bf16.mxu1 %v8171_v61 }
 0xaf7   :  { %7598 = vmatprep.subr.bf16.mxu0 %v8580_v32 }
 0xaf8   :  { %7564 = vmatpush3.bf16.msra.mxu1 %v8171_v61 }
 0xaf9   :  { %7574 = vmatprep.subr.bf16.mxu1 %v8005_v14 }
 0xbb6   :  { %v7153_v27 = vpop.f32.mrb[36].mxu1  ;;  %v7195_v58 = vpop.f32.mrb[44].mxu0 }
 0xbb7   :  { %v2444_v52 = vadd.f32 %v8952_v51, %v7153_v27  ;;  %v8956_v59 = vadd.f32 %v8689_v45, %v7195_v58  ;;  %v2438_v62 = vpop.f32.mrb[37].mxu1  ;;  %v2973_v63 = vpop.f32.mrb[45].mxu0 }
 0xbb8   :  { %v2439_v40 = vadd.f32 %v8952_v51, %v2438_v62  ;;  %v8960_v41 = vadd.f32 %v8689_v45, %v2973_v63 }
 0xbb9   :  { %v2510_v1 = vcombine.high %v2444_v52, %v2444_v52  ;;  %v2517_v2 = vrot.slane %v2444_v52, %v8233_v47  ;;  %3026 = vrot.lane.b32.xlu1 %v8956_v59, %s7914_s27 }
 0xbba   :  { %v2461_v49 = vcombine.high %v2439_v40, %v2439_v40  ;;  %v2468_v12 = vrot.slane %v2439_v40, %v8233_v47  ;;  %3024 = vrot.lane.b32.xlu0 %v8960_v41, %s7914_s27 }
 0xbbb   :  { %v2524_v46 = vrot.slane %v2510_v1, %v8233_v47  ;;  %v2525_v5 = vcombine.high %v2517_v2, %v2517_v2  ;;  %v2533_v28 = vrot.slane %v2517_v2, %v8233_v47 }
 0xbbc   :  { %v2475_v48 = vrot.slane %v2461_v49, %v8233_v47  ;;  %v2476_v15 = vcombine.high %v2468_v12, %v2468_v12  ;;  %v2484_v0 = vrot.slane %v2468_v12, %v8233_v47 }
 0xbbd   :  { %v2526_v9 = vcombine.high %v2524_v46, %v2524_v46  ;;  %v2540_v16 = vrot.slane %v2524_v46, %v8233_v47  ;;  %v2547_v8 = vrot.slane %v2525_v5, %v8233_v47  ;;  %v2555_v60 = vcombine.high %v2533_v28, %v2533_v28  ;;  %2697 = vst.msk [vmem:[%s10349_s10 + $0x42] sm:$0x1] %vm1200_vm3, %v2533_v28 }
 0xbbe   :  { %v2477_v43 = vcombine.high %v2475_v48, %v2475_v48  ;;  %v2491_v6 = vrot.slane %v2475_v48, %v8233_v47  ;;  %v2498_v17 = vrot.slane %v2476_v15, %v8233_v47  ;;  %v2506_v7 = vcombine.high %v2484_v0, %v2484_v0  ;;  %2689 = vst.msk [vmem:[%s10349_s10 + $0x2] sm:$0x1] %vm1200_vm3, %v2484_v0 }
 0xbbf   :  { %v2554_v22 = vrot.slane %v2526_v9, %v8233_v47  ;;  %v2556_v25 = vcombine.high %v2540_v16, %v2540_v16  ;;  %v2557_v19 = vcombine.high %v2547_v8, %v2547_v8  ;;  %2698 = vst.msk [vmem:[%s10349_s10 + $0x4a] sm:$0x1] %vm1200_vm3, %v2547_v8  ;;  %2699 = vst.msk [vmem:[%s10349_s10 + $0x52] sm:$0x1] %vm1200_vm3, %v2555_v60 }
 0xbc0   :  { %2701 = vst.msk [vmem:[%s10349_s10 + $0x62] sm:$0x1] %vm1200_vm3, %v2540_v16  ;;  %v7156_v44 = vpop.f32.mrb[38].mxu1  ;;  %v7198_v30 = vpop.f32.mrb[46].mxu0  ;;  %v2505_v21 = vrot.slane %v2477_v43, %v8233_v47  ;;  %v2507_v55 = vcombine.high %v2491_v6, %v2491_v6  ;;  %v2508_v13 = vcombine.high %v2498_v17, %v2498_v17  ;;  %2690 = vst.msk [vmem:[%s10349_s10 + $0xa] sm:$0x1] %vm1200_vm3, %v2498_v17 }
 0xbc1   :  { %2691 = vst.msk [vmem:[%s10349_s10 + $0x12] sm:$0x1] %vm1200_vm3, %v2506_v7  ;;  %2693 = vst.msk [vmem:[%s10349_s10 + $0x22] sm:$0x1] %vm1200_vm3, %v2491_v6  ;;  %v2454_v56 = vadd.f32 %v8952_v51, %v7156_v44  ;;  %v2448_v11 = vpop.f32.mrb[39].mxu1  ;;  %v2983_v26 = vpop.f32.mrb[47].mxu0  ;;  %v2558_v18 = vcombine.high %v2554_v22, %v2554_v22  ;;  %v9024_v24 = vadd.f32 %v8689_v45, %v7198_v30 }
 0xbc2   :  { %2700 = vst.msk [vmem:[%s10349_s10 + $0x5a] sm:$0x1] %vm1200_vm3, %v2557_v19  ;;  %2702 = vst.msk [vmem:[%s10349_s10 + $0x6a] sm:$0x1] %vm1200_vm3, %v2554_v22  ;;  %v2449_v27 = vadd.f32 %v8952_v51, %v2448_v11  ;;  %v9028_v58 = vadd.f32 %v8689_v45, %v2983_v26  ;;  %v2509_v52 = vcombine.high %v2505_v21, %v2505_v21 }
 0xbc3   :  { %2703 = vst.msk [vmem:[%s10349_s10 + $0x72] sm:$0x1] %vm1200_vm3, %v2556_v25  ;;  %2692 = vst.msk [vmem:[%s10349_s10 + $0x1a] sm:$0x1] %vm1200_vm3, %v2508_v13  ;;  %v2608_v62 = vcombine.high %v2454_v56, %v2454_v56  ;;  %v2615_v63 = vrot.slane %v2454_v56, %v8233_v47  ;;  %3030 = vrot.lane.b32.xlu1 %v9024_v24, %s7914_s27 }
 0xbc4   :  { %2694 = vst.msk [vmem:[%s10349_s10 + $0x2a] sm:$0x1] %vm1200_vm3, %v2505_v21  ;;  %2695 = vst.msk [vmem:[%s10349_s10 + $0x32] sm:$0x1] %vm1200_vm3, %v2507_v55  ;;  %v2559_v40 = vcombine.high %v2449_v27, %v2449_v27  ;;  %v2566_v1 = vrot.slane %v2449_v27, %v8233_v47  ;;  %3028 = vrot.lane.b32.xlu0 %v9028_v58, %s7914_s27  ;;  %v7181_v2 = vpop.f32.mrb[40].mxu1 }
 0xbc5   :  { %2704 = vst.msk [vmem:[%s10349_s10 + $0x7a] sm:$0x1] %vm1200_vm3, %v2558_v18  ;;  %2696 = vst.msk [vmem:[%s10349_s10 + $0x3a] sm:$0x1] %vm1200_vm3, %v2509_v52  ;;  %v2622_v49 = vrot.slane %v2608_v62, %v8233_v47  ;;  %v2623_v12 = vcombine.high %v2615_v63, %v2615_v63  ;;  %v2631_v46 = vrot.slane %v2615_v63, %v8233_v47  ;;  %v2888_v5 = vpop.f32.mrb[41].mxu1 }
 0xbc6   :  { %v2573_v28 = vrot.slane %v2559_v40, %v8233_v47  ;;  %v2574_v48 = vcombine.high %v2566_v1, %v2566_v1  ;;  %v2582_v15 = vrot.slane %v2566_v1, %v8233_v47  ;;  %v2894_v11 = vadd.f32 %v8870_v34, %v7181_v2 }
 0xbc7   :  { %v2624_v0 = vcombine.high %v2622_v49, %v2622_v49  ;;  %v2638_v9 = vrot.slane %v2622_v49, %v8233_v47  ;;  %v2645_v16 = vrot.slane %v2623_v12, %v8233_v47  ;;  %v2653_v8 = vcombine.high %v2631_v46, %v2631_v46  ;;  %2713 = vst.msk [vmem:[%s10349_s10 + $0xc2] sm:$0x1] %vm1200_vm3, %v2631_v46 }
 0xbc8   :  { %v2575_v60 = vcombine.high %v2573_v28, %v2573_v28  ;;  %v2589_v43 = vrot.slane %v2573_v28, %v8233_v47  ;;  %v2596_v6 = vrot.slane %v2574_v48, %v8233_v47  ;;  %v2604_v17 = vcombine.high %v2582_v15, %v2582_v15  ;;  %2705 = vst.msk [vmem:[%s10349_s10 + $0x82] sm:$0x1] %vm1200_vm3, %v2582_v15  ;;  %v7184_v7 = vpop.f32.mrb[42].mxu1 }
 0xbc9   :  { %v2652_v22 = vrot.slane %v2624_v0, %v8233_v47  ;;  %v2654_v25 = vcombine.high %v2638_v9, %v2638_v9  ;;  %v2655_v19 = vcombine.high %v2645_v16, %v2645_v16  ;;  %2714 = vst.msk [vmem:[%s10349_s10 + $0xca] sm:$0x1] %vm1200_vm3, %v2645_v16  ;;  %2715 = vst.msk [vmem:[%s10349_s10 + $0xd2] sm:$0x1] %vm1200_vm3, %v2653_v8  ;;  %v2898_v44 = vpop.f32.mrb[43].mxu1 }
 0xbca   :  { %2717 = vst.msk [vmem:[%s10349_s10 + $0xe2] sm:$0x1] %vm1200_vm3, %v2638_v9  ;;  %v2603_v30 = vrot.slane %v2575_v60, %v8233_v47  ;;  %v2605_v21 = vcombine.high %v2589_v43, %v2589_v43  ;;  %v2606_v55 = vcombine.high %v2596_v6, %v2596_v6  ;;  %2706 = vst.msk [vmem:[%s10349_s10 + $0x8a] sm:$0x1] %vm1200_vm3, %v2596_v6 }
 0xbcb   :  { %2707 = vst.msk [vmem:[%s10349_s10 + $0x92] sm:$0x1] %vm1200_vm3, %v2604_v17  ;;  %2709 = vst.msk [vmem:[%s10349_s10 + $0xa2] sm:$0x1] %vm1200_vm3, %v2589_v43  ;;  %v2656_v13 = vcombine.high %v2652_v22, %v2652_v22  ;;  %v2889_v26 = vadd.f32 %v8870_v34, %v2888_v5  ;;  %v2993_v18 = vadd.f32 %v8956_v59, %v2894_v11 }
 0xbcc   :  { %2716 = vst.msk [vmem:[%s10349_s10 + $0xda] sm:$0x1] %vm1200_vm3, %v2655_v19  ;;  %2718 = vst.msk [vmem:[%s10349_s10 + $0xea] sm:$0x1] %vm1200_vm3, %v2652_v22  ;;  %v2607_v56 = vcombine.high %v2603_v30, %v2603_v30  ;;  %v2904_v63 = vadd.f32 %v8870_v34, %v7184_v7  ;;  %v2899_v40 = vadd.f32 %v8870_v34, %v2898_v44 }
 0xbcd   :  { %2719 = vst.msk [vmem:[%s10349_s10 + $0xf2] sm:$0x1] %vm1200_vm3, %v2654_v25  ;;  %2708 = vst.msk [vmem:[%s10349_s10 + $0x9a] sm:$0x1] %vm1200_vm3, %v2606_v55  ;;  %v2992_v27 = vadd.f32 %v8960_v41, %v2889_v26  ;;  %v6563_v52 = vmul.f32 -1.442695, %v2993_v18 }
 0xbce   :  { %2710 = vst.msk [vmem:[%s10349_s10 + $0xaa] sm:$0x1] %vm1200_vm3, %v2603_v30  ;;  %2711 = vst.msk [vmem:[%s10349_s10 + $0xb2] sm:$0x1] %vm1200_vm3, %v2605_v21  ;;  %v2995_v1 = vadd.f32 %v9024_v24, %v2904_v63  ;;  %v2994_v49 = vadd.f32 %v9028_v58, %v2899_v40 }
 0xbcf   :  { %2720 = vst.msk [vmem:[%s10349_s10 + $0xfa] sm:$0x1] %vm1200_vm3, %v2656_v13  ;;  %2712 = vst.msk [vmem:[%s10349_s10 + $0xba] sm:$0x1] %vm1200_vm3, %v2607_v56  ;;  %v6562_v62 = vmul.f32 -1.442695, %v2992_v27  ;;  %7774 = vpow2.f32 %v6563_v52 }
 0xbd0   :  { %v6565_v12 = vmul.f32 -1.442695, %v2995_v1  ;;  %v6564_v2 = vmul.f32 -1.442695, %v2994_v49 }
 0xbd1   :  { %7776 = vpow2.f32 %v6562_v62 }
 0xbd2   :  { %7778 = vpow2.f32 %v6565_v12 }
 0xbd3   :  { %7780 = vpow2.f32 %v6564_v2 }
 0xbd9   :  { %v7775_v46 = vpop.eup %7774 }
 0xbda   :  { %v3009_v5 = vadd.f32 1.0, %v7775_v46 }
 0xbdb   :  { %v7777_v59 = vpop.eup %7776 }
 0xbdc   :  { %v3008_v41 = vadd.f32 1.0, %v7777_v59  ;;  %7782 = vrcp.f32 %v3009_v5  ;;  %v7779_v28 = vpop.eup %7778 }
 0xbdd   :  { %v7781_v48 = vpop.eup %7780  ;;  %v3011_v15 = vadd.f32 1.0, %v7779_v28 }
 0xbde   :  { %7784 = vrcp.f32 %v3008_v41  ;;  %v3010_v0 = vadd.f32 1.0, %v7781_v48 }
 0xbdf   :  { %7786 = vrcp.f32 %v3011_v15 }
 0xbe0   :  { %7788 = vrcp.f32 %v3010_v0 }
 0xbe6   :  { %v7783_v9 = vpop.eup %7782 }
 0xbe8   :  { %v7785_v16 = vpop.eup %7784 }
 0xbe9   :  { %v7787_v43 = vpop.eup %7786  ;;  %v3064_v12 = vsub.f32 1.0, %v7785_v16  ;;  %v3088_v59 = vmul.f32 %v7785_v16, %v8893_v4 }
 0xbea   :  { %v7789_v6 = vpop.eup %7788  ;;  %v3067_v0 = vsub.f32 1.0, %v7787_v43 }
 0xc2b   :  { %v3027_v24 = vpop.permute.xlu1 %3026 }
 0xc2c   :  { %v3037_v58 = vmul.f32 %v7783_v9, %v3027_v24  ;;  %v3025_v8 = vpop.permute.xlu0 %3024  ;;  %v3091_v24 = vmul.f32 %v7787_v43, %v8900_v3 }
 0xc2d   :  { %v3036_v60 = vmul.f32 %v7785_v16, %v3025_v8  ;;  %v3090_v16 = vmul.f32 %v7789_v6, %v8905_v35 }
 0xc2e   :  { %3046 = vrot.lane.b32.xlu1 %v3037_v58, %s7914_s27 }
 0xc2f   :  { %3044 = vrot.lane.b32.xlu0 %v3036_v60, %s7914_s27 }
 0xc35   :  { %v3031_v17 = vpop.permute.xlu1 %3030 }
 0xc36   :  { %v3029_v7 = vpop.permute.xlu0 %3028  ;;  %v3039_v22 = vmul.f32 %v7787_v43, %v3031_v17 }
 0xc37   :  { %v3038_v25 = vmul.f32 %v7789_v6, %v3029_v7 }
 0xc38   :  { %3050 = vrot.lane.b32.xlu1 %v3039_v22, %s7914_s27 }
 0xc39   :  { %3048 = vrot.lane.b32.xlu0 %v3038_v25, %s7914_s27 }
 0xca0   :  { %v3047_v19 = vpop.permute.xlu1 %3046 }
 0xca1   :  { %v3057_v44 = vadd.f32 %v3047_v19, %v2894_v11  ;;  %v3045_v30 = vpop.permute.xlu0 %3044  ;;  %v7223_v11 = vpop.f32.mrb[48].mxu0 }
 0xca2   :  { %v3056_v21 = vadd.f32 %v3045_v30, %v2889_v26  ;;  %v3065_v26 = vsub.f32 1.0, %v7783_v9  ;;  %v3531_v46 = vpop.f32.mrb[49].mxu0  ;;  %v3537_v35 = vadd.f32 %v8623_v38, %v7223_v11 }
 0xca3   :  { %7790 = vtanh.f32 %v3057_v44  ;;  %v7226_v48 = vpop.f32.mrb[50].mxu0  ;;  %v3532_v3 = vadd.f32 %v8623_v38, %v3531_v46 }
 0xca4   :  { %7792 = vtanh.f32 %v3056_v21  ;;  %v3541_v15 = vpop.f32.mrb[51].mxu0  ;;  %v3551_v19 = vmax.f32 %v3537_v35, 0.0 }
 0xca5   :  { %v3550_v43 = vmax.f32 %v3532_v3, 0.0  ;;  %v9283_v3 = vld [vmem:[%s10345_s7] ss:$0 sm:$0xff] }
 0xcaa   :  { %v3051_v55 = vpop.permute.xlu1 %3050 }
 0xcab   :  { %v3049_v13 = vpop.permute.xlu0 %3048  ;;  %v3059_v56 = vadd.f32 %v3051_v55, %v2904_v63  ;;  %v3089_v63 = vmul.f32 %v7783_v9, %v8891_v57  ;;  %v3066_v9 = vsub.f32 1.0, %v7789_v6 }
 0xcac   :  { %v3058_v18 = vadd.f32 %v3049_v13, %v2899_v40 }
 0xcad   :  { %v7791_v27 = vpop.eup %7790  ;;  %7794 = vtanh.f32 %v3059_v56 }
 0xcae   :  { %v7793_v52 = vpop.eup %7792  ;;  %7796 = vtanh.f32 %v3058_v18  ;;  %3074 = vrot.lane.b32.xlu1 %v7791_v27, %s7916_s19 }
 0xcaf   :  { %3072 = vrot.lane.b32.xlu0 %v7793_v52, %s7916_s19 }
 0xcb7   :  { %v7795_v62 = vpop.eup %7794 }
 0xcb8   :  { %v7797_v1 = vpop.eup %7796  ;;  %3078 = vrot.lane.b32.xlu1 %v7795_v62, %s7916_s19 }
 0xcb9   :  { %3076 = vrot.lane.b32.xlu0 %v7797_v1, %s7916_s19 }
 0xd20   :  { %v3075_v49 = vpop.permute.xlu1 %3074 }
 0xd21   :  { %v3085_v40 = vmul.f32 %v3075_v49, %v3065_v26  ;;  %v3073_v2 = vpop.permute.xlu0 %3072 }
 0xd22   :  { %v3084_v5 = vmul.f32 %v3073_v2, %v3064_v12 }
 0xd23   :  { %v9148_v41 = vadd.f32 %v3089_v63, %v3085_v40 }
 0xd24   :  { %v9150_v28 = vadd.f32 %v3088_v59, %v3084_v5 }
 0xd25   :  { %3102 = vrot.lane.b32.xlu1 %v9148_v41, %s7916_s19 }
 0xd26   :  { %3100 = vrot.lane.b32.xlu0 %v9150_v28, %s7916_s19 }
 0xd2a   :  { %v3079_v57 = vpop.permute.xlu1 %3078 }
 0xd2b   :  { %v3087_v58 = vmul.f32 %v3079_v57, %v3067_v0  ;;  %v3077_v4 = vpop.permute.xlu0 %3076 }
 0xd2c   :  { %v3086_v8 = vmul.f32 %v3077_v4, %v3066_v9 }
 0xd2d   :  { %v9158_v60 = vadd.f32 %v3091_v24, %v3087_v58 }
 0xd2e   :  { %v9160_v17 = vadd.f32 %v3090_v16, %v3086_v8 }
 0xd2f   :  { %3106 = vrot.lane.b32.xlu1 %v9158_v60, %s7916_s19 }
 0xd30   :  { %3104 = vrot.lane.b32.xlu0 %v9160_v17, %s7916_s19 }
 0xd97   :  { %v3103_v22 = vpop.permute.xlu1 %3102 }
 0xd98   :  { %v3101_v7 = vpop.permute.xlu0 %3100 }
 0xd99   :  { %7207 = vmatprep.mubr.msk.f32.mxu1 %vm39_vm2, %v3101_v7  ;;  %7249 = vmatprep.mubr.msk.f32.mxu0 %vm39_vm2, %v3101_v7 }
 0xd9a   :  { %7208 = vmatmul.mubr.msk.f32.vlgmr.msra.gmra.mrb[44].mxu1 %vm39_vm2, %v3103_v22  ;;  %7250 = vmatmul.mubr.msk.f32.vlgmr.msra.gmra.mrb[52].mxu0 %vm39_vm2, %v3103_v22 }
 0xd9b   :  { %7600 = vmatpush3.bf16.msra.mxu0 %v8580_v32  ;;  %7576 = vmatpush3.bf16.msra.mxu1 %v8005_v14  ;;  %v3542_v32 = vadd.f32 %v8623_v38, %v3541_v15 }
 0xd9c   :  { %7602 = vmatprep.subr.bf16.mxu0 %v8582_v31  ;;  %7578 = vmatprep.subr.bf16.mxu1 %v8036_v20 }
 0xd9d   :  { %v3552_v30 = vmax.f32 %v3542_v32, 0.0 }
 0xd9f   :  { %7604 = vmatpush3.bf16.msra.mxu0 %v8582_v31  ;;  %7580 = vmatpush3.bf16.msra.mxu1 %v8036_v20  ;;  %v9188_v31 = vld [vmem:[%s10344_s3] ss:$0 sm:$0xff] }
 0xda0   :  { %7614 = vmatprep.subr.bf16.mxu0 %v8046_v23  ;;  %7590 = vmatprep.subr.bf16.mxu1 %v8159_v53  ;;  %v3547_v44 = vadd.f32 %v9188_v31, %v7226_v48 }
 0xda1   :  { %v3107_v25 = vpop.permute.xlu1 %3106 }
 0xda2   :  { %v3105_v6 = vpop.permute.xlu0 %3104  ;;  %v3553_v38 = vmax.f32 %v3547_v44, 0.0 }
 0xda3   :  { %7210 = vmatprep.mubr.msk.f32.mxu1 %vm39_vm2, %v3105_v6  ;;  %7252 = vmatprep.mubr.msk.f32.mxu0 %vm39_vm2, %v3105_v6 }
 0xda4   :  { %7211 = vmatmul.mubr.msk.f32.gmra.mrb[46].mxu1 %vm39_vm2, %v3107_v25  ;;  %7253 = vmatmul.mubr.msk.f32.gmra.mrb[54].mxu0 %vm39_vm2, %v3107_v25 }
 0xda5   :  { %7235 = vmatprep.mubr.msk.f32.mxu1 %vm39_vm2, %v3550_v43  ;;  %7277 = vmatprep.mubr.msk.f32.mxu0 %vm39_vm2, %v8647_v36 }
 0xda8   :  { %7236 = vmatmul.mubr.msk.f32.vlgmr.msra.gmra.mrb[48].mxu1 %vm39_vm2, %v3551_v19  ;;  %7278 = vmatmul.mubr.msk.f32.vlgmr.msra.gmra.mrb[56].mxu0 %vm39_vm2, %v8658_v10 }
 0xda9   :  { %7616 = vmatpush3.bf16.msra.mxu0 %v8046_v23  ;;  %7238 = vmatprep.mubr.msk.f32.mxu1 %vm39_vm2, %v3552_v30 }
 0xdaa   :  { %7618 = vmatprep.subr.bf16.mxu0 %v8067_v37  ;;  %7280 = vmatprep.mubr.msk.f32.mxu0 %vm39_vm2, %v8666_v29 }
 0xdab   :  { %7592 = vmatpush3.bf16.msra.mxu1 %v8159_v53 }
 0xdac   :  { %7239 = vmatmul.mubr.msk.f32.gmra.mrb[50].mxu1 %vm39_vm2, %v3553_v38  ;;  %7281 = vmatmul.mubr.msk.f32.gmra.mrb[58].mxu0 %vm39_vm2, %v8677_v33 }
 0xdad   :  { %7620 = vmatpush3.bf16.msra.mxu0 %v8067_v37  ;;  %7594 = vmatprep.subr.bf16.mxu1 %v8171_v61 }
 0xdae   :  { %7630 = vmatprep.subr.bf16.mxu0 %v8584_v39 }
 0xdaf   :  { %7596 = vmatpush3.bf16.msra.mxu1 %v8171_v61 }
 0xdb0   :  { %7606 = vmatprep.subr.bf16.mxu1 %v8005_v14 }
 0xe6d   :  { %v7209_v36 = vpop.f32.mrb[44].mxu1  ;;  %v7251_v10 = vpop.f32.mrb[52].mxu0 }
 0xe6e   :  { %v3188_v29 = vadd.f32 %v8952_v51, %v7209_v36  ;;  %v9213_v21 = vadd.f32 %v8689_v45, %v7251_v10  ;;  %v3182_v55 = vpop.f32.mrb[45].mxu1  ;;  %v3717_v13 = vpop.f32.mrb[53].mxu0 }
 0xe6f   :  { %v3183_v33 = vadd.f32 %v8952_v51, %v3182_v55  ;;  %v9217_v56 = vadd.f32 %v8689_v45, %v3717_v13 }
 0xe70   :  { %v3254_v18 = vcombine.high %v3188_v29, %v3188_v29  ;;  %v3261_v27 = vrot.slane %v3188_v29, %v8233_v47  ;;  %3770 = vrot.lane.b32.xlu1 %v9213_v21, %s7914_s27 }
 0xe71   :  { %v3205_v52 = vcombine.high %v3183_v33, %v3183_v33  ;;  %v3212_v62 = vrot.slane %v3183_v33, %v8233_v47  ;;  %3768 = vrot.lane.b32.xlu0 %v9217_v56, %s7914_s27 }
 0xe72   :  { %v3268_v1 = vrot.slane %v3254_v18, %v8233_v47  ;;  %v3269_v11 = vcombine.high %v3261_v27, %v3261_v27  ;;  %v3277_v26 = vrot.slane %v3261_v27, %v8233_v47 }
 0xe73   :  { %v3219_v45 = vrot.slane %v3205_v52, %v8233_v47  ;;  %v3220_v49 = vcombine.high %v3212_v62, %v3212_v62  ;;  %v3228_v12 = vrot.slane %v3212_v62, %v8233_v47 }
 0xe74   :  { %v3270_v63 = vcombine.high %v3268_v1, %v3268_v1  ;;  %v3284_v40 = vrot.slane %v3268_v1, %v8233_v47  ;;  %v3291_v2 = vrot.slane %v3269_v11, %v8233_v47  ;;  %v3299_v46 = vcombine.high %v3277_v26, %v3277_v26  ;;  %3441 = vst.msk [vmem:[%s10349_s10 + $0x43] sm:$0x1] %vm1200_vm3, %v3277_v26 }
 0xe75   :  { %v3221_v59 = vcombine.high %v3219_v45, %v3219_v45  ;;  %v3235_v5 = vrot.slane %v3219_v45, %v8233_v47  ;;  %v3242_v48 = vrot.slane %v3220_v49, %v8233_v47  ;;  %v3250_v15 = vcombine.high %v3228_v12, %v3228_v12  ;;  %3433 = vst.msk [vmem:[%s10349_s10 + $0x3] sm:$0x1] %vm1200_vm3, %v3228_v12 }
 0xe76   :  { %v3298_v0 = vrot.slane %v3270_v63, %v8233_v47  ;;  %v3300_v57 = vcombine.high %v3284_v40, %v3284_v40  ;;  %v3301_v9 = vcombine.high %v3291_v2, %v3291_v2  ;;  %3442 = vst.msk [vmem:[%s10349_s10 + $0x4b] sm:$0x1] %vm1200_vm3, %v3291_v2  ;;  %3443 = vst.msk [vmem:[%s10349_s10 + $0x53] sm:$0x1] %vm1200_vm3, %v3299_v46 }
 0xe77   :  { %3445 = vst.msk [vmem:[%s10349_s10 + $0x63] sm:$0x1] %vm1200_vm3, %v3284_v40  ;;  %v3249_v24 = vrot.slane %v3221_v59, %v8233_v47  ;;  %v3251_v58 = vcombine.high %v3235_v5, %v3235_v5  ;;  %v3252_v4 = vcombine.high %v3242_v48, %v3242_v48  ;;  %3434 = vst.msk [vmem:[%s10349_s10 + $0xb] sm:$0x1] %vm1200_vm3, %v3242_v48  ;;  %v7212_v16 = vpop.f32.mrb[46].mxu1  ;;  %v7254_v8 = vpop.f32.mrb[54].mxu0 }
 0xe78   :  { %3435 = vst.msk [vmem:[%s10349_s10 + $0x13] sm:$0x1] %vm1200_vm3, %v3250_v15  ;;  %3437 = vst.msk [vmem:[%s10349_s10 + $0x23] sm:$0x1] %vm1200_vm3, %v3235_v5  ;;  %v3302_v7 = vcombine.high %v3298_v0, %v3298_v0  ;;  %v3198_v22 = vadd.f32 %v8952_v51, %v7212_v16  ;;  %v9286_v35 = vadd.f32 %v9283_v3, %v7254_v8  ;;  %v3192_v43 = vpop.f32.mrb[47].mxu1  ;;  %v3727_v32 = vpop.f32.mrb[55].mxu0 }
 0xe79   :  { %3444 = vst.msk [vmem:[%s10349_s10 + $0x5b] sm:$0x1] %vm1200_vm3, %v3301_v9  ;;  %3446 = vst.msk [vmem:[%s10349_s10 + $0x6b] sm:$0x1] %vm1200_vm3, %v3298_v0  ;;  %v3253_v6 = vcombine.high %v3249_v24, %v3249_v24  ;;  %v3193_v25 = vadd.f32 %v8952_v51, %v3192_v43  ;;  %v3728_v19 = vadd.f32 %v9283_v3, %v3727_v32 }
 0xe7a   :  { %3447 = vst.msk [vmem:[%s10349_s10 + $0x73] sm:$0x1] %vm1200_vm3, %v3300_v57  ;;  %3436 = vst.msk [vmem:[%s10349_s10 + $0x1b] sm:$0x1] %vm1200_vm3, %v3252_v4  ;;  %v3352_v44 = vcombine.high %v3198_v22, %v3198_v22  ;;  %v3359_v30 = vrot.slane %v3198_v22, %v8233_v47  ;;  %3774 = vrot.lane.b32.xlu1 %v9286_v35, %s7914_s27 }
 0xe7b   :  { %3438 = vst.msk [vmem:[%s10349_s10 + $0x2b] sm:$0x1] %vm1200_vm3, %v3249_v24  ;;  %3439 = vst.msk [vmem:[%s10349_s10 + $0x33] sm:$0x1] %vm1200_vm3, %v3251_v58  ;;  %v3303_v38 = vcombine.high %v3193_v25, %v3193_v25  ;;  %v3310_v36 = vrot.slane %v3193_v25, %v8233_v47  ;;  %3772 = vrot.lane.b32.xlu0 %v3728_v19, %s7914_s27  ;;  %v7237_v10 = vpop.f32.mrb[48].mxu1 }
 0xe7c   :  { %3448 = vst.msk [vmem:[%s10349_s10 + $0x7b] sm:$0x1] %vm1200_vm3, %v3302_v7  ;;  %3440 = vst.msk [vmem:[%s10349_s10 + $0x3b] sm:$0x1] %vm1200_vm3, %v3253_v6  ;;  %v3366_v29 = vrot.slane %v3352_v44, %v8233_v47  ;;  %v3367_v55 = vcombine.high %v3359_v30, %v3359_v30  ;;  %v3375_v13 = vrot.slane %v3359_v30, %v8233_v47  ;;  %v3632_v33 = vpop.f32.mrb[49].mxu1 }
 0xe7d   :  { %v3317_v18 = vrot.slane %v3303_v38, %v8233_v47  ;;  %v3318_v27 = vcombine.high %v3310_v36, %v3310_v36  ;;  %v3326_v52 = vrot.slane %v3310_v36, %v8233_v47  ;;  %v3638_v24 = vadd.f32 %v8870_v34, %v7237_v10 }
 0xe7e   :  { %v3368_v62 = vcombine.high %v3366_v29, %v3366_v29  ;;  %v3382_v1 = vrot.slane %v3366_v29, %v8233_v47  ;;  %v3389_v11 = vrot.slane %v3367_v55, %v8233_v47  ;;  %v3397_v26 = vcombine.high %v3375_v13, %v3375_v13  ;;  %3457 = vst.msk [vmem:[%s10349_s10 + $0xc3] sm:$0x1] %vm1200_vm3, %v3375_v13 }
 0xe7f   :  { %v3319_v45 = vcombine.high %v3317_v18, %v3317_v18  ;;  %v3333_v49 = vrot.slane %v3317_v18, %v8233_v47  ;;  %v3340_v12 = vrot.slane %v3318_v27, %v8233_v47  ;;  %v3348_v63 = vcombine.high %v3326_v52, %v3326_v52  ;;  %3449 = vst.msk [vmem:[%s10349_s10 + $0x83] sm:$0x1] %vm1200_vm3, %v3326_v52  ;;  %v7240_v40 = vpop.f32.mrb[50].mxu1 }
 0xe80   :  { %v3396_v2 = vrot.slane %v3368_v62, %v8233_v47  ;;  %v3398_v46 = vcombine.high %v3382_v1, %v3382_v1  ;;  %v3399_v59 = vcombine.high %v3389_v11, %v3389_v11  ;;  %3458 = vst.msk [vmem:[%s10349_s10 + $0xcb] sm:$0x1] %vm1200_vm3, %v3389_v11  ;;  %3459 = vst.msk [vmem:[%s10349_s10 + $0xd3] sm:$0x1] %vm1200_vm3, %v3397_v26  ;;  %v3642_v5 = vpop.f32.mrb[51].mxu1 }
 0xe81   :  { %3461 = vst.msk [vmem:[%s10349_s10 + $0xe3] sm:$0x1] %vm1200_vm3, %v3382_v1  ;;  %v3347_v48 = vrot.slane %v3319_v45, %v8233_v47  ;;  %v3349_v15 = vcombine.high %v3333_v49, %v3333_v49  ;;  %v3350_v0 = vcombine.high %v3340_v12, %v3340_v12  ;;  %3450 = vst.msk [vmem:[%s10349_s10 + $0x8b] sm:$0x1] %vm1200_vm3, %v3340_v12 }
 0xe82   :  { %3451 = vst.msk [vmem:[%s10349_s10 + $0x93] sm:$0x1] %vm1200_vm3, %v3348_v63  ;;  %3453 = vst.msk [vmem:[%s10349_s10 + $0xa3] sm:$0x1] %vm1200_vm3, %v3333_v49  ;;  %v3400_v57 = vcombine.high %v3396_v2, %v3396_v2  ;;  %v3633_v58 = vadd.f32 %v8870_v34, %v3632_v33  ;;  %v3737_v4 = vadd.f32 %v9213_v21, %v3638_v24 }
 0xe83   :  { %3460 = vst.msk [vmem:[%s10349_s10 + $0xdb] sm:$0x1] %vm1200_vm3, %v3399_v59  ;;  %3462 = vst.msk [vmem:[%s10349_s10 + $0xeb] sm:$0x1] %vm1200_vm3, %v3396_v2  ;;  %v3351_v9 = vcombine.high %v3347_v48, %v3347_v48  ;;  %v3648_v22 = vadd.f32 %v8870_v34, %v7240_v40  ;;  %v3643_v43 = vadd.f32 %v8870_v34, %v3642_v5 }
 0xe84   :  { %3463 = vst.msk [vmem:[%s10349_s10 + $0xf3] sm:$0x1] %vm1200_vm3, %v3398_v46  ;;  %3452 = vst.msk [vmem:[%s10349_s10 + $0x9b] sm:$0x1] %vm1200_vm3, %v3350_v0  ;;  %v3736_v16 = vadd.f32 %v9217_v56, %v3633_v58  ;;  %v6583_v8 = vmul.f32 -1.442695, %v3737_v4 }
 0xe85   :  { %3454 = vst.msk [vmem:[%s10349_s10 + $0xab] sm:$0x1] %vm1200_vm3, %v3347_v48  ;;  %3455 = vst.msk [vmem:[%s10349_s10 + $0xb3] sm:$0x1] %vm1200_vm3, %v3349_v15  ;;  %v3739_v32 = vadd.f32 %v9286_v35, %v3648_v22  ;;  %v3738_v6 = vadd.f32 %v3728_v19, %v3643_v43 }
 0xe86   :  { %3464 = vst.msk [vmem:[%s10349_s10 + $0xfb] sm:$0x1] %vm1200_vm3, %v3400_v57  ;;  %3456 = vst.msk [vmem:[%s10349_s10 + $0xbb] sm:$0x1] %vm1200_vm3, %v3351_v9  ;;  %v6582_v7 = vmul.f32 -1.442695, %v3736_v16  ;;  %7798 = vpow2.f32 %v6583_v8 }
 0xe87   :  { %v6585_v25 = vmul.f32 -1.442695, %v3739_v32  ;;  %v6584_v44 = vmul.f32 -1.442695, %v3738_v6  ;;  %v7279_v57 = vpop.f32.mrb[56].mxu0 }
 0xe88   :  { %7800 = vpow2.f32 %v6582_v7  ;;  %v4275_v7 = vpop.f32.mrb[57].mxu0 }
 0xe89   :  { %7802 = vpow2.f32 %v6585_v25  ;;  %v7282_v25 = vpop.f32.mrb[58].mxu0 }
 0xe8a   :  { %7804 = vpow2.f32 %v6584_v44  ;;  %v4285_v44 = vpop.f32.mrb[59].mxu0 }
 0xe90   :  { %v7799_v30 = vpop.eup %7798 }
 0xe91   :  { %v3753_v21 = vadd.f32 1.0, %v7799_v30 }
 0xe92   :  { %v7801_v38 = vpop.eup %7800 }
 0xe93   :  { %v3752_v36 = vadd.f32 1.0, %v7801_v38  ;;  %7806 = vrcp.f32 %v3753_v21  ;;  %v7803_v56 = vpop.eup %7802 }
 0xe94   :  { %v7805_v10 = vpop.eup %7804  ;;  %v3755_v29 = vadd.f32 1.0, %v7803_v56 }
 0xe95   :  { %7808 = vrcp.f32 %v3752_v36  ;;  %v3754_v55 = vadd.f32 1.0, %v7805_v10 }
 0xe96   :  { %7810 = vrcp.f32 %v3755_v29 }
 0xe97   :  { %7812 = vrcp.f32 %v3754_v55 }
 0xe9d   :  { %v7807_v34 = vpop.eup %7806 }
 0xe9e   :  { %v3809_v9 = vsub.f32 1.0, %v7807_v34  ;;  %v3833_v4 = vmul.f32 %v7807_v34, %v9148_v41 }
 0xe9f   :  { %v7809_v33 = vpop.eup %7808 }
 0xea0   :  { %v7811_v27 = vpop.eup %7810 }
 0xea1   :  { %v7813_v62 = vpop.eup %7812  ;;  %v3811_v30 = vsub.f32 1.0, %v7811_v27  ;;  %v3835_v21 = vmul.f32 %v7811_v27, %v9158_v60  ;;  %v4276_v60 = vadd.f32 %v9188_v31, %v4275_v7 }
 0xea2   :  { %v3810_v38 = vsub.f32 1.0, %v7813_v62  ;;  %v3834_v56 = vmul.f32 %v7813_v62, %v9160_v17  ;;  %v4281_v17 = vadd.f32 %v9188_v31, %v7279_v57 }
 0xee2   :  { %v3771_v13 = vpop.permute.xlu1 %3770 }
 0xee3   :  { %v3781_v35 = vmul.f32 %v7807_v34, %v3771_v13  ;;  %v3769_v19 = vpop.permute.xlu0 %3768 }
 0xee4   :  { %v3780_v18 = vmul.f32 %v7809_v33, %v3769_v19 }
 0xee5   :  { %3790 = vrot.lane.b32.xlu1 %v3781_v35, %s7914_s27 }
 0xee6   :  { %3788 = vrot.lane.b32.xlu0 %v3780_v18, %s7914_s27  ;;  %v4295_v18 = vmax.f32 %v4281_v17, 0.0 }
 0xeec   :  { %v3775_v52 = vpop.permute.xlu1 %3774 }
 0xeed   :  { %v3783_v1 = vmul.f32 %v7811_v27, %v3775_v52  ;;  %v3773_v11 = vpop.permute.xlu0 %3772  ;;  %v9448_v52 = vld [vmem:[%s10341_s1] sm:$0xff] }
 0xeee   :  { %v3782_v26 = vmul.f32 %v7813_v62, %v3773_v11  ;;  %v9466_v11 = vld [vmem:[%s10341_s1 + $0x10] sm:$0xff] }
 0xeef   :  { %3794 = vrot.lane.b32.xlu1 %v3783_v1, %s7914_s27  ;;  %v9456_v1 = vld [vmem:[%s10341_s1 + $0x8] sm:$0xff] }
 0xef0   :  { %3792 = vrot.lane.b32.xlu0 %v3782_v26, %s7914_s27  ;;  %v9475_v26 = vld [vmem:[%s10341_s1 + $0x18] sm:$0xff] }
 0xf57   :  { %v3791_v45 = vpop.permute.xlu1 %3790 }
 0xf58   :  { %v3801_v49 = vadd.f32 %v3791_v45, %v3638_v24  ;;  %v3789_v12 = vpop.permute.xlu0 %3788 }
 0xf59   :  { %v3800_v63 = vadd.f32 %v3789_v12, %v3633_v58  ;;  %v3808_v58 = vsub.f32 1.0, %v7809_v33 }
 0xf5a   :  { %7814 = vtanh.f32 %v3801_v49 }
 0xf5b   :  { %7816 = vtanh.f32 %v3800_v63 }
 0xf61   :  { %v3795_v40 = vpop.permute.xlu1 %3794 }
 0xf62   :  { %v3803_v2 = vadd.f32 %v3795_v40, %v3648_v22  ;;  %v3793_v46 = vpop.permute.xlu0 %3792  ;;  %v3832_v22 = vmul.f32 %v7809_v33, %v9150_v28  ;;  %v4294_v33 = vmax.f32 %v4276_v60, 0.0  ;;  %v9555_v60 = vld [vmem:[%s10348_s9] ss:$0 sm:$0xff] }
 0xf63   :  { %v3802_v59 = vadd.f32 %v3793_v46, %v3643_v43 }
 0xf64   :  { %v7815_v5 = vpop.eup %7814  ;;  %7818 = vtanh.f32 %v3803_v2 }
 0xf65   :  { %v7817_v48 = vpop.eup %7816  ;;  %7820 = vtanh.f32 %v3802_v59  ;;  %3818 = vrot.lane.b32.xlu1 %v7815_v5, %s7916_s19 }
 0xf66   :  { %3816 = vrot.lane.b32.xlu0 %v7817_v48, %s7916_s19 }
 0xf6e   :  { %v7819_v15 = vpop.eup %7818 }
 0xf6f   :  { %v7821_v0 = vpop.eup %7820  ;;  %3822 = vrot.lane.b32.xlu1 %v7819_v15, %s7916_s19 }
 0xf70   :  { %3820 = vrot.lane.b32.xlu0 %v7821_v0, %s7916_s19 }
 0xfd7   :  { %v3819_v24 = vpop.permute.xlu1 %3818 }
 0xfd8   :  { %v3829_v16 = vmul.f32 %v3819_v24, %v3809_v9  ;;  %v3817_v8 = vpop.permute.xlu0 %3816 }
 0xfd9   :  { %v3828_v43 = vmul.f32 %v3817_v8, %v3808_v58 }
 0xfda   :  { %v9406_v32 = vadd.f32 %v3833_v4, %v3829_v16 }
 0xfdb   :  { %v9408_v6 = vadd.f32 %v3832_v22, %v3828_v43 }
 0xfdc   :  { %3846 = vrot.lane.b32.xlu1 %v9406_v32, %s7916_s19 }
 0xfdd   :  { %3844 = vrot.lane.b32.xlu0 %v9408_v6, %s7916_s19 }
 0xfe1   :  { %v3823_v41 = vpop.permute.xlu1 %3822 }
 0xfe2   :  { %v3831_v36 = vmul.f32 %v3823_v41, %v3811_v30  ;;  %v3821_v28 = vpop.permute.xlu0 %3820 }
 0xfe3   :  { %v3830_v10 = vmul.f32 %v3821_v28, %v3810_v38 }
 0xfe4   :  { %v9416_v29 = vadd.f32 %v3835_v21, %v3831_v36 }
 0xfe5   :  { %v9418_v55 = vadd.f32 %v3834_v56, %v3830_v10 }
 0xfe6   :  { %3850 = vrot.lane.b32.xlu1 %v9416_v29, %s7916_s19 }
 0xfe7   :  { %3848 = vrot.lane.b32.xlu0 %v9418_v55, %s7916_s19 }
0x104e   :  { %v3847_v13 = vpop.permute.xlu1 %3846 }
0x104f   :  { %v3845_v34 = vpop.permute.xlu0 %3844 }
0x1050   :  { %7263 = vmatprep.mubr.msk.f32.mxu1 %vm39_vm2, %v3845_v34  ;;  %7305 = vmatprep.mubr.msk.f32.mxu0 %vm39_vm2, %v3845_v34 }
0x1051   :  { %7264 = vmatmul.mubr.msk.f32.vlgmr.msra.gmra.mrb[52].mxu1 %vm39_vm2, %v3847_v13  ;;  %7306 = vmatmul.mubr.msk.f32.vlgmr.msra.gmra.mrb[60].mxu0 %vm39_vm2, %v3847_v13 }
0x1052   :  { %7632 = vmatpush3.bf16.msra.mxu0 %v8584_v39  ;;  %7608 = vmatpush3.bf16.msra.mxu1 %v8005_v14  ;;  %v4286_v39 = vadd.f32 %v9188_v31, %v4285_v44 }
0x1053   :  { %7634 = vmatprep.subr.bf16.mxu0 %v8586_v42  ;;  %7610 = vmatprep.subr.bf16.mxu1 %v8036_v20 }
0x1054   :  { %v4296_v27 = vmax.f32 %v4286_v39, 0.0 }
0x1056   :  { %7636 = vmatpush3.bf16.msra.mxu0 %v8586_v42  ;;  %7612 = vmatpush3.bf16.msra.mxu1 %v8036_v20  ;;  %v4291_v42 = vadd.f32 %v9188_v31, %v7282_v25 }
0x1057   :  { %7646 = vmatprep.subr.bf16.mxu0 %v8046_v23  ;;  %7622 = vmatprep.subr.bf16.mxu1 %v8159_v53 }
0x1058   :  { %v3851_v19 = vpop.permute.xlu1 %3850  ;;  %v4297_v62 = vmax.f32 %v4291_v42, 0.0 }
0x1059   :  { %v3849_v35 = vpop.permute.xlu0 %3848 }
0x105a   :  { %7266 = vmatprep.mubr.msk.f32.mxu1 %vm39_vm2, %v3849_v35  ;;  %7308 = vmatprep.mubr.msk.f32.mxu0 %vm39_vm2, %v3849_v35 }
0x105b   :  { %7267 = vmatmul.mubr.msk.f32.gmra.mrb[54].mxu1 %vm39_vm2, %v3851_v19  ;;  %7309 = vmatmul.mubr.msk.f32.gmra.mrb[62].mxu0 %vm39_vm2, %v3851_v19 }
0x105c   :  { %7291 = vmatprep.mubr.msk.f32.mxu1 %vm39_vm2, %v4294_v33  ;;  %7333 = vmatprep.mubr.msk.f32.mxu0 %vm39_vm2, %v9448_v52 }
0x105f   :  { %7292 = vmatmul.mubr.msk.f32.vlgmr.msra.gmra.mrb[56].mxu1 %vm39_vm2, %v4295_v18  ;;  %7334 = vmatmul.mubr.msk.f32.vlgmr.msra.gmra.mrb[64].mxu0 %vm39_vm2, %v9456_v1 }
0x1060   :  { %7648 = vmatpush3.bf16.msra.mxu0 %v8046_v23  ;;  %7294 = vmatprep.mubr.msk.f32.mxu1 %vm39_vm2, %v4296_v27 }
0x1061   :  { %7650 = vmatprep.subr.bf16.mxu0 %v8067_v37  ;;  %7336 = vmatprep.mubr.msk.f32.mxu0 %vm39_vm2, %v9466_v11 }
0x1062   :  { %7624 = vmatpush3.bf16.msra.mxu1 %v8159_v53 }
0x1063   :  { %7295 = vmatmul.mubr.msk.f32.gmra.mrb[58].mxu1 %vm39_vm2, %v4297_v62  ;;  %7337 = vmatmul.mubr.msk.f32.gmra.mrb[66].mxu0 %vm39_vm2, %v9475_v26 }
0x1064   :  { %7652 = vmatpush3.bf16.msra.mxu0 %v8067_v37  ;;  %7626 = vmatprep.subr.bf16.mxu1 %v8171_v61 }
0x1065   :  { %7662 = vmatprep.subr.bf16.mxu0 %v8588_v50 }
0x1066   :  { %7628 = vmatpush3.bf16.msra.mxu1 %v8171_v61 }
0x1067   :  { %7638 = vmatprep.subr.bf16.mxu1 %v8005_v14 }
0x1124   :  { %v7265_v45 = vpop.f32.mrb[52].mxu1  ;;  %v7307_v49 = vpop.f32.mrb[60].mxu0 }
0x1125   :  { %v3932_v12 = vadd.f32 %v8952_v51, %v7265_v45  ;;  %v9486_v63 = vadd.f32 %v9283_v3, %v7307_v49  ;;  %v3926_v40 = vpop.f32.mrb[53].mxu1  ;;  %v4461_v2 = vpop.f32.mrb[61].mxu0 }
0x1126   :  { %v3927_v46 = vadd.f32 %v8952_v51, %v3926_v40  ;;  %v9490_v59 = vadd.f32 %v9283_v3, %v4461_v2 }
0x1127   :  { %v3998_v5 = vcombine.high %v3932_v12, %v3932_v12  ;;  %v4005_v48 = vrot.slane %v3932_v12, %v8233_v47  ;;  %4514 = vrot.lane.b32.xlu1 %v9486_v63, %s7914_s27 }
0x1128   :  { %v3949_v15 = vcombine.high %v3927_v46, %v3927_v46  ;;  %v3956_v0 = vrot.slane %v3927_v46, %v8233_v47  ;;  %4512 = vrot.lane.b32.xlu0 %v9490_v59, %s7914_s27 }
0x1129   :  { %v4012_v57 = vrot.slane %v3998_v5, %v8233_v47  ;;  %v4013_v9 = vcombine.high %v4005_v48, %v4005_v48  ;;  %v4021_v51 = vrot.slane %v4005_v48, %v8233_v47 }
0x112a   :  { %v3963_v24 = vrot.slane %v3949_v15, %v8233_v47  ;;  %v3964_v58 = vcombine.high %v3956_v0, %v3956_v0  ;;  %v3972_v4 = vrot.slane %v3956_v0, %v8233_v47 }
0x112b   :  { %v4014_v16 = vcombine.high %v4012_v57, %v4012_v57  ;;  %v4028_v8 = vrot.slane %v4012_v57, %v8233_v47  ;;  %v4035_v7 = vrot.slane %v4013_v9, %v8233_v47  ;;  %v4043_v22 = vcombine.high %v4021_v51, %v4021_v51  ;;  %4185 = vst.msk [vmem:[%s10349_s10 + $0x44] sm:$0x1] %vm1200_vm3, %v4021_v51 }
0x112c   :  { %v3965_v43 = vcombine.high %v3963_v24, %v3963_v24  ;;  %v3979_v25 = vrot.slane %v3963_v24, %v8233_v47  ;;  %v3986_v44 = vrot.slane %v3964_v58, %v8233_v47  ;;  %v3994_v30 = vcombine.high %v3972_v4, %v3972_v4  ;;  %4177 = vst.msk [vmem:[%s10349_s10 + $0x4] sm:$0x1] %vm1200_vm3, %v3972_v4 }
0x112d   :  { %v4042_v41 = vrot.slane %v4014_v16, %v8233_v47  ;;  %v4044_v38 = vcombine.high %v4028_v8, %v4028_v8  ;;  %v4045_v21 = vcombine.high %v4035_v7, %v4035_v7  ;;  %4186 = vst.msk [vmem:[%s10349_s10 + $0x4c] sm:$0x1] %vm1200_vm3, %v4035_v7  ;;  %4187 = vst.msk [vmem:[%s10349_s10 + $0x54] sm:$0x1] %vm1200_vm3, %v4043_v22 }
0x112e   :  { %4189 = vst.msk [vmem:[%s10349_s10 + $0x64] sm:$0x1] %vm1200_vm3, %v4028_v8  ;;  %v3993_v36 = vrot.slane %v3965_v43, %v8233_v47  ;;  %v3995_v28 = vcombine.high %v3979_v25, %v3979_v25  ;;  %v3996_v56 = vcombine.high %v3986_v44, %v3986_v44  ;;  %4178 = vst.msk [vmem:[%s10349_s10 + $0xc] sm:$0x1] %vm1200_vm3, %v3986_v44  ;;  %v7268_v10 = vpop.f32.mrb[54].mxu1  ;;  %v7310_v34 = vpop.f32.mrb[62].mxu0 }
0x112f   :  { %4179 = vst.msk [vmem:[%s10349_s10 + $0x14] sm:$0x1] %vm1200_vm3, %v3994_v30  ;;  %4181 = vst.msk [vmem:[%s10349_s10 + $0x24] sm:$0x1] %vm1200_vm3, %v3979_v25  ;;  %v4046_v13 = vcombine.high %v4042_v41, %v4042_v41  ;;  %v3942_v17 = vadd.f32 %v9555_v60, %v7268_v10  ;;  %v9559_v33 = vadd.f32 %v9283_v3, %v7310_v34  ;;  %v3936_v39 = vpop.f32.mrb[55].mxu1  ;;  %v4471_v35 = vpop.f32.mrb[63].mxu0 }
0x1130   :  { %4188 = vst.msk [vmem:[%s10349_s10 + $0x5c] sm:$0x1] %vm1200_vm3, %v4045_v21  ;;  %4190 = vst.msk [vmem:[%s10349_s10 + $0x6c] sm:$0x1] %vm1200_vm3, %v4042_v41  ;;  %v3997_v19 = vcombine.high %v3993_v36, %v3993_v36  ;;  %v3937_v18 = vadd.f32 %v9555_v60, %v3936_v39  ;;  %v9575_v42 = vadd.f32 %v9283_v3, %v4471_v35 }
0x1131   :  { %4191 = vst.msk [vmem:[%s10349_s10 + $0x74] sm:$0x1] %vm1200_vm3, %v4044_v38  ;;  %4180 = vst.msk [vmem:[%s10349_s10 + $0x1c] sm:$0x1] %vm1200_vm3, %v3996_v56  ;;  %v4096_v27 = vcombine.high %v3942_v17, %v3942_v17  ;;  %v4103_v62 = vrot.slane %v3942_v17, %v8233_v47  ;;  %4518 = vrot.lane.b32.xlu1 %v9559_v33, %s7914_s27 }
0x1132   :  { %4182 = vst.msk [vmem:[%s10349_s10 + $0x2c] sm:$0x1] %vm1200_vm3, %v3993_v36  ;;  %4183 = vst.msk [vmem:[%s10349_s10 + $0x34] sm:$0x1] %vm1200_vm3, %v3995_v28  ;;  %v4047_v45 = vcombine.high %v3937_v18, %v3937_v18  ;;  %v4054_v49 = vrot.slane %v3937_v18, %v8233_v47  ;;  %4516 = vrot.lane.b32.xlu0 %v9575_v42, %s7914_s27  ;;  %v7293_v12 = vpop.f32.mrb[56].mxu1 }
0x1133   :  { %4192 = vst.msk [vmem:[%s10349_s10 + $0x7c] sm:$0x1] %vm1200_vm3, %v4046_v13  ;;  %4184 = vst.msk [vmem:[%s10349_s10 + $0x3c] sm:$0x1] %vm1200_vm3, %v3997_v19  ;;  %v4110_v40 = vrot.slane %v4096_v27, %v8233_v47  ;;  %v4111_v2 = vcombine.high %v4103_v62, %v4103_v62  ;;  %v4119_v46 = vrot.slane %v4103_v62, %v8233_v47  ;;  %v4376_v5 = vpop.f32.mrb[57].mxu1 }
0x1134   :  { %v4061_v48 = vrot.slane %v4047_v45, %v8233_v47  ;;  %v4062_v15 = vcombine.high %v4054_v49, %v4054_v49  ;;  %v4070_v0 = vrot.slane %v4054_v49, %v8233_v47  ;;  %v9668_v28 = vld [vmem:[%s10346_s5] ss:$0 sm:$0xff] }
0x1135   :  { %v4112_v57 = vcombine.high %v4110_v40, %v4110_v40  ;;  %v4126_v9 = vrot.slane %v4110_v40, %v8233_v47  ;;  %v4133_v51 = vrot.slane %v4111_v2, %v8233_v47  ;;  %v4141_v24 = vcombine.high %v4119_v46, %v4119_v46  ;;  %4201 = vst.msk [vmem:[%s10349_s10 + $0xc4] sm:$0x1] %vm1200_vm3, %v4119_v46 }
0x1136   :  { %v4063_v58 = vcombine.high %v4061_v48, %v4061_v48  ;;  %v4077_v4 = vrot.slane %v4061_v48, %v8233_v47  ;;  %v4084_v16 = vrot.slane %v4062_v15, %v8233_v47  ;;  %v4092_v8 = vcombine.high %v4070_v0, %v4070_v0  ;;  %4193 = vst.msk [vmem:[%s10349_s10 + $0x84] sm:$0x1] %vm1200_vm3, %v4070_v0  ;;  %v7296_v7 = vpop.f32.mrb[58].mxu1 }
0x1137   :  { %v4140_v22 = vrot.slane %v4112_v57, %v8233_v47  ;;  %v4142_v43 = vcombine.high %v4126_v9, %v4126_v9  ;;  %v4143_v25 = vcombine.high %v4133_v51, %v4133_v51  ;;  %4202 = vst.msk [vmem:[%s10349_s10 + $0xcc] sm:$0x1] %vm1200_vm3, %v4133_v51  ;;  %4203 = vst.msk [vmem:[%s10349_s10 + $0xd4] sm:$0x1] %vm1200_vm3, %v4141_v24  ;;  %v4386_v44 = vpop.f32.mrb[59].mxu1 }
0x1138   :  { %4205 = vst.msk [vmem:[%s10349_s10 + $0xe4] sm:$0x1] %vm1200_vm3, %v4126_v9  ;;  %v4091_v30 = vrot.slane %v4063_v58, %v8233_v47  ;;  %v4093_v41 = vcombine.high %v4077_v4, %v4077_v4  ;;  %v4094_v38 = vcombine.high %v4084_v16, %v4084_v16  ;;  %4194 = vst.msk [vmem:[%s10349_s10 + $0x8c] sm:$0x1] %vm1200_vm3, %v4084_v16 }
0x1139   :  { %4195 = vst.msk [vmem:[%s10349_s10 + $0x94] sm:$0x1] %vm1200_vm3, %v4092_v8  ;;  %4197 = vst.msk [vmem:[%s10349_s10 + $0xa4] sm:$0x1] %vm1200_vm3, %v4077_v4  ;;  %v4144_v21 = vcombine.high %v4140_v22, %v4140_v22  ;;  %v4382_v56 = vadd.f32 %v9668_v28, %v7293_v12  ;;  %v4377_v10 = vadd.f32 %v9668_v28, %v4376_v5 }
0x113a   :  { %4204 = vst.msk [vmem:[%s10349_s10 + $0xdc] sm:$0x1] %vm1200_vm3, %v4143_v25  ;;  %4206 = vst.msk [vmem:[%s10349_s10 + $0xec] sm:$0x1] %vm1200_vm3, %v4140_v22  ;;  %v4095_v36 = vcombine.high %v4091_v30, %v4091_v30  ;;  %v4392_v35 = vadd.f32 %v9668_v28, %v7296_v7  ;;  %v4387_v19 = vadd.f32 %v9668_v28, %v4386_v44 }
0x113b   :  { %4207 = vst.msk [vmem:[%s10349_s10 + $0xf4] sm:$0x1] %vm1200_vm3, %v4142_v43  ;;  %4196 = vst.msk [vmem:[%s10349_s10 + $0x9c] sm:$0x1] %vm1200_vm3, %v4094_v38  ;;  %v4481_v34 = vadd.f32 %v9486_v63, %v4382_v56  ;;  %v4480_v13 = vadd.f32 %v9490_v59, %v4377_v10 }
0x113c   :  { %4198 = vst.msk [vmem:[%s10349_s10 + $0xac] sm:$0x1] %vm1200_vm3, %v4091_v30  ;;  %4199 = vst.msk [vmem:[%s10349_s10 + $0xb4] sm:$0x1] %vm1200_vm3, %v4093_v41  ;;  %v4483_v18 = vadd.f32 %v9559_v33, %v4392_v35  ;;  %v4482_v27 = vadd.f32 %v9575_v42, %v4387_v19 }
0x113d   :  { %4208 = vst.msk [vmem:[%s10349_s10 + $0xfc] sm:$0x1] %vm1200_vm3, %v4144_v21  ;;  %4200 = vst.msk [vmem:[%s10349_s10 + $0xbc] sm:$0x1] %vm1200_vm3, %v4095_v36  ;;  %v6603_v17 = vmul.f32 -1.442695, %v4481_v34 }
0x113e   :  { %v6602_v39 = vmul.f32 -1.442695, %v4480_v13  ;;  %v6605_v62 = vmul.f32 -1.442695, %v4483_v18  ;;  %v6604_v45 = vmul.f32 -1.442695, %v4482_v27 }
0x113f   :  { %7822 = vpow2.f32 %v6603_v17 }
0x1140   :  { %7824 = vpow2.f32 %v6602_v39 }
0x1141   :  { %7826 = vpow2.f32 %v6605_v62 }
0x1142   :  { %7828 = vpow2.f32 %v6604_v45 }
0x1149   :  { %v7823_v49 = vpop.eup %7822 }
0x114a   :  { %v7825_v12 = vpop.eup %7824  ;;  %v4497_v63 = vadd.f32 1.0, %v7823_v49 }
0x114b   :  { %v4496_v59 = vadd.f32 1.0, %v7825_v12  ;;  %v7827_v40 = vpop.eup %7826 }
0x114c   :  { %7830 = vrcp.f32 %v4497_v63  ;;  %v7829_v2 = vpop.eup %7828  ;;  %v4499_v46 = vadd.f32 1.0, %v7827_v40 }
0x114d   :  { %7832 = vrcp.f32 %v4496_v59  ;;  %v4498_v5 = vadd.f32 1.0, %v7829_v2 }
0x114e   :  { %7834 = vrcp.f32 %v4499_v46 }
0x114f   :  { %7836 = vrcp.f32 %v4498_v5 }
0x1156   :  { %v7831_v48 = vpop.eup %7830 }
0x1157   :  { %v7833_v33 = vpop.eup %7832  ;;  %v4577_v39 = vmul.f32 %v7831_v48, %v9406_v32 }
0x1158   :  { %v7835_v9 = vpop.eup %7834  ;;  %v4552_v17 = vsub.f32 1.0, %v7833_v33  ;;  %v4576_v27 = vmul.f32 %v7833_v33, %v9408_v6 }
0x1159   :  { %v7837_v24 = vpop.eup %7836  ;;  %v4555_v59 = vsub.f32 1.0, %v7835_v9  ;;  %v4579_v2 = vmul.f32 %v7835_v9, %v9416_v29 }
0x115a   :  { %v4554_v40 = vsub.f32 1.0, %v7837_v24  ;;  %v4578_v5 = vmul.f32 %v7837_v24, %v9418_v55 }
0x1199   :  { %v4515_v15 = vpop.permute.xlu1 %4514 }
0x119a   :  { %v4525_v42 = vmul.f32 %v7831_v48, %v4515_v15  ;;  %v4513_v0 = vpop.permute.xlu0 %4512 }
0x119b   :  { %v4524_v57 = vmul.f32 %v7833_v33, %v4513_v0 }
0x119c   :  { %4534 = vrot.lane.b32.xlu1 %v4525_v42, %s7914_s27 }
0x119d   :  { %4532 = vrot.lane.b32.xlu0 %v4524_v57, %s7914_s27 }
0x11a3   :  { %v4519_v51 = vpop.permute.xlu1 %4518 }
0x11a4   :  { %v4527_v58 = vmul.f32 %v7835_v9, %v4519_v51  ;;  %v4517_v4 = vpop.permute.xlu0 %4516 }
0x11a5   :  { %v4526_v16 = vmul.f32 %v7837_v24, %v4517_v4 }
0x11a6   :  { %4538 = vrot.lane.b32.xlu1 %v4527_v58, %s7914_s27 }
0x11a7   :  { %4536 = vrot.lane.b32.xlu0 %v4526_v16, %s7914_s27 }
0x120e   :  { %v4535_v8 = vpop.permute.xlu1 %4534 }
0x120f   :  { %v4545_v7 = vadd.f32 %v4535_v8, %v4382_v56  ;;  %v4533_v22 = vpop.permute.xlu0 %4532  ;;  %v7335_v56 = vpop.f32.mrb[64].mxu0 }
0x1210   :  { %v4544_v43 = vadd.f32 %v4533_v22, %v4377_v10  ;;  %v4553_v10 = vsub.f32 1.0, %v7831_v48  ;;  %v5019_v18 = vpop.f32.mrb[65].mxu0  ;;  %v5025_v55 = vadd.f32 %v9188_v31, %v7335_v56 }
0x1211   :  { %7838 = vtanh.f32 %v4545_v7  ;;  %v7338_v12 = vpop.f32.mrb[66].mxu0  ;;  %v5020_v29 = vadd.f32 %v9188_v31, %v5019_v18 }
0x1212   :  { %7840 = vtanh.f32 %v4544_v43  ;;  %v5029_v63 = vpop.f32.mrb[67].mxu0  ;;  %v5039_v24 = vmax.f32 %v5025_v55, 0.0 }
0x1213   :  { %v5038_v57 = vmax.f32 %v5020_v29, 0.0 }
0x1218   :  { %v4539_v25 = vpop.permute.xlu1 %4538 }
0x1219   :  { %v4547_v44 = vadd.f32 %v4539_v25, %v4392_v35  ;;  %v4537_v30 = vpop.permute.xlu0 %4536 }
0x121a   :  { %v4546_v41 = vadd.f32 %v4537_v30, %v4387_v19 }
0x121b   :  { %v7839_v38 = vpop.eup %7838  ;;  %7842 = vtanh.f32 %v4547_v44 }
0x121c   :  { %v7841_v21 = vpop.eup %7840  ;;  %7844 = vtanh.f32 %v4546_v41  ;;  %4562 = vrot.lane.b32.xlu1 %v7839_v38, %s7916_s19 }
0x121d   :  { %4560 = vrot.lane.b32.xlu0 %v7841_v21, %s7916_s19 }
0x1225   :  { %v7843_v36 = vpop.eup %7842 }
0x1226   :  { %v7845_v34 = vpop.eup %7844  ;;  %4566 = vrot.lane.b32.xlu1 %v7843_v36, %s7916_s19 }
0x1227   :  { %4564 = vrot.lane.b32.xlu0 %v7845_v34, %s7916_s19 }
0x128e   :  { %v4563_v13 = vpop.permute.xlu1 %4562 }
0x128f   :  { %v4573_v35 = vmul.f32 %v4563_v13, %v4553_v10  ;;  %v4561_v19 = vpop.permute.xlu0 %4560 }
0x1290   :  { %v4572_v62 = vmul.f32 %v4561_v19, %v4552_v17 }
0x1291   :  { %v9688_v45 = vadd.f32 %v4577_v39, %v4573_v35 }
0x1292   :  { %v9690_v49 = vadd.f32 %v4576_v27, %v4572_v62 }
0x1293   :  { %4590 = vrot.lane.b32.xlu1 %v9688_v45, %s7916_s19 }
0x1294   :  { %4588 = vrot.lane.b32.xlu0 %v9690_v49, %s7916_s19 }
0x1298   :  { %v4567_v32 = vpop.permute.xlu1 %4566 }
0x1299   :  { %v4575_v46 = vmul.f32 %v4567_v32, %v4555_v59  ;;  %v4565_v6 = vpop.permute.xlu0 %4564 }
0x129a   :  { %v4574_v48 = vmul.f32 %v4565_v6, %v4554_v40 }
0x129b   :  { %v9698_v15 = vadd.f32 %v4579_v2, %v4575_v46 }
0x129c   :  { %v9700_v33 = vadd.f32 %v4578_v5, %v4574_v48 }
0x129d   :  { %4594 = vrot.lane.b32.xlu1 %v9698_v15, %s7916_s19 }
0x129e   :  { %4592 = vrot.lane.b32.xlu0 %v9700_v33, %s7916_s19 }
0x1305   :  { %v4591_v0 = vpop.permute.xlu1 %4590 }
0x1306   :  { %v4589_v42 = vpop.permute.xlu0 %4588 }
0x1307   :  { %7319 = vmatprep.mubr.msk.f32.mxu1 %vm39_vm2, %v4589_v42  ;;  %7361 = vmatprep.mubr.msk.f32.mxu0 %vm39_vm2, %v4589_v42 }
0x1308   :  { %7320 = vmatmul.mubr.msk.f32.vlgmr.msra.gmra.mrb[60].mxu1 %vm39_vm2, %v4591_v0  ;;  %7362 = vmatmul.mubr.msk.f32.vlgmr.msra.gmra.mrb[68].mxu0 %vm39_vm2, %v4591_v0 }
0x1309   :  { %7664 = vmatpush3.bf16.msra.mxu0 %v8588_v50  ;;  %7640 = vmatpush3.bf16.msra.mxu1 %v8005_v14  ;;  %v5030_v50 = vadd.f32 %v9188_v31, %v5029_v63 }
0x130a   :  { %7666 = vmatprep.subr.bf16.mxu0 %v8590_v54  ;;  %7642 = vmatprep.subr.bf16.mxu1 %v8036_v20 }
0x130b   :  { %v5040_v58 = vmax.f32 %v5030_v50, 0.0 }
0x130d   :  { %7668 = vmatpush3.bf16.msra.mxu0 %v8590_v54  ;;  %7644 = vmatpush3.bf16.msra.mxu1 %v8036_v20  ;;  %v5035_v54 = vadd.f32 %v9188_v31, %v7338_v12 }
0x130e   :  { %7678 = vmatprep.subr.bf16.mxu0 %v8046_v23  ;;  %7654 = vmatprep.subr.bf16.mxu1 %v8159_v53 }
0x130f   :  { %v4595_v51 = vpop.permute.xlu1 %4594  ;;  %v5041_v4 = vmax.f32 %v5035_v54, 0.0 }
0x1310   :  { %v4593_v9 = vpop.permute.xlu0 %4592 }
0x1311   :  { %7322 = vmatprep.mubr.msk.f32.mxu1 %vm39_vm2, %v4593_v9  ;;  %7364 = vmatprep.mubr.msk.f32.mxu0 %vm39_vm2, %v4593_v9 }
0x1312   :  { %7323 = vmatmul.mubr.msk.f32.gmra.mrb[62].mxu1 %vm39_vm2, %v4595_v51  ;;  %7365 = vmatmul.mubr.msk.f32.gmra.mrb[70].mxu0 %vm39_vm2, %v4595_v51 }
0x1313   :  { %7347 = vmatprep.mubr.msk.f32.mxu1 %vm39_vm2, %v5038_v57  ;;  %7389 = vmatprep.mubr.msk.f32.mxu0 %vm39_vm2, %v9448_v52 }
0x1316   :  { %7348 = vmatmul.mubr.msk.f32.vlgmr.msra.gmra.mrb[64].mxu1 %vm39_vm2, %v5039_v24  ;;  %7390 = vmatmul.mubr.msk.f32.vlgmr.msra.gmra.mrb[72].mxu0 %vm39_vm2, %v9456_v1 }
0x1317   :  { %7350 = vmatprep.mubr.msk.f32.mxu1 %vm39_vm2, %v5040_v58  ;;  %7392 = vmatprep.mubr.msk.f32.mxu0 %vm39_vm2, %v9466_v11 }
0x1318   :  { %7680 = vmatpush3.bf16.msra.mxu0 %v8046_v23  ;;  %7656 = vmatpush3.bf16.msra.mxu1 %v8159_v53 }
0x1319   :  { %7682 = vmatprep.subr.bf16.mxu0 %v8067_v37  ;;  %7658 = vmatprep.subr.bf16.mxu1 %v8171_v61 }
0x131a   :  { %7351 = vmatmul.mubr.msk.f32.gmra.mrb[66].mxu1 %vm39_vm2, %v5041_v4  ;;  %7393 = vmatmul.mubr.msk.f32.gmra.mrb[74].mxu0 %vm39_vm2, %v9475_v26 }
0x131c   :  { %7684 = vmatpush3.bf16.msra.mxu0 %v8067_v37  ;;  %7660 = vmatpush3.bf16.msra.mxu1 %v8171_v61 }
0x131d   :  { %7670 = vmatprep.subr.bf16.mxu1 %v8005_v14  ;;  %7686 = vmatprep.subr.bf16.mxu0 %v8159_v53 }
0x13db   :  { %v7321_v23 = vpop.f32.mrb[60].mxu1  ;;  %v7363_v31 = vpop.f32.mrb[68].mxu0 }
0x13dc   :  { %v4676_v52 = vadd.f32 %v9555_v60, %v7321_v23  ;;  %v9748_v1 = vadd.f32 %v9283_v3, %v7363_v31  ;;  %v4670_v11 = vpop.f32.mrb[61].mxu1  ;;  %v5205_v16 = vpop.f32.mrb[69].mxu0 }
0x13dd   :  { %v4671_v8 = vadd.f32 %v9555_v60, %v4670_v11  ;;  %v9752_v26 = vadd.f32 %v9283_v3, %v5205_v16 }
0x13de   :  { %v4742_v37 = vcombine.high %v4676_v52, %v4676_v52  ;;  %v4749_v7 = vrot.slane %v4676_v52, %v8233_v47  ;;  %5258 = vrot.lane.b32.xlu1 %v9748_v1, %s7914_s27 }
0x13df   :  { %v4693_v22 = vcombine.high %v4671_v8, %v4671_v8  ;;  %v4700_v43 = vrot.slane %v4671_v8, %v8233_v47  ;;  %5256 = vrot.lane.b32.xlu0 %v9752_v26, %s7914_s27 }
0x13e0   :  { %v4756_v25 = vrot.slane %v4742_v37, %v8233_v47  ;;  %v4757_v44 = vcombine.high %v4749_v7, %v4749_v7  ;;  %v4765_v30 = vrot.slane %v4749_v7, %v8233_v47 }
0x13e1   :  { %v4707_v41 = vrot.slane %v4693_v22, %v8233_v47  ;;  %v4708_v38 = vcombine.high %v4700_v43, %v4700_v43  ;;  %v4716_v21 = vrot.slane %v4700_v43, %v8233_v47 }
0x13e2   :  { %v4758_v36 = vcombine.high %v4756_v25, %v4756_v25  ;;  %v4772_v34 = vrot.slane %v4756_v25, %v8233_v47  ;;  %v4779_v56 = vrot.slane %v4757_v44, %v8233_v47  ;;  %v4787_v10 = vcombine.high %v4765_v30, %v4765_v30  ;;  %4929 = vst.msk [vmem:[%s10349_s10 + $0x45] sm:$0x1] %vm1200_vm3, %v4765_v30 }
0x13e3   :  { %v4709_v13 = vcombine.high %v4707_v41, %v4707_v41  ;;  %v4723_v17 = vrot.slane %v4707_v41, %v8233_v47  ;;  %v4730_v39 = vrot.slane %v4708_v38, %v8233_v47  ;;  %v4738_v35 = vcombine.high %v4716_v21, %v4716_v21  ;;  %4921 = vst.msk [vmem:[%s10349_s10 + $0x5] sm:$0x1] %vm1200_vm3, %v4716_v21 }
0x13e4   :  { %v4786_v19 = vrot.slane %v4758_v36, %v8233_v47  ;;  %v4788_v18 = vcombine.high %v4772_v34, %v4772_v34  ;;  %v4789_v27 = vcombine.high %v4779_v56, %v4779_v56  ;;  %4930 = vst.msk [vmem:[%s10349_s10 + $0x4d] sm:$0x1] %vm1200_vm3, %v4779_v56  ;;  %4931 = vst.msk [vmem:[%s10349_s10 + $0x55] sm:$0x1] %vm1200_vm3, %v4787_v10 }
0x13e5   :  { %4933 = vst.msk [vmem:[%s10349_s10 + $0x65] sm:$0x1] %vm1200_vm3, %v4772_v34  ;;  %v4737_v62 = vrot.slane %v4709_v13, %v8233_v47  ;;  %v4739_v12 = vcombine.high %v4723_v17, %v4723_v17  ;;  %v4740_v63 = vcombine.high %v4730_v39, %v4730_v39  ;;  %4922 = vst.msk [vmem:[%s10349_s10 + $0xd] sm:$0x1] %vm1200_vm3, %v4730_v39  ;;  %v7324_v59 = vpop.f32.mrb[62].mxu1  ;;  %v7366_v32 = vpop.f32.mrb[70].mxu0 }
0x13e6   :  { %4923 = vst.msk [vmem:[%s10349_s10 + $0x15] sm:$0x1] %vm1200_vm3, %v4738_v35  ;;  %4925 = vst.msk [vmem:[%s10349_s10 + $0x25] sm:$0x1] %vm1200_vm3, %v4723_v17  ;;  %v4790_v40 = vcombine.high %v4786_v19, %v4786_v19  ;;  %v4686_v2 = vadd.f32 %v9555_v60, %v7324_v59  ;;  %v9816_v46 = vadd.f32 %v9283_v3, %v7366_v32  ;;  %v4680_v6 = vpop.f32.mrb[63].mxu1  ;;  %v5215_v5 = vpop.f32.mrb[71].mxu0 }
0x13e7   :  { %4932 = vst.msk [vmem:[%s10349_s10 + $0x5d] sm:$0x1] %vm1200_vm3, %v4789_v27  ;;  %4934 = vst.msk [vmem:[%s10349_s10 + $0x6d] sm:$0x1] %vm1200_vm3, %v4786_v19  ;;  %v4741_v48 = vcombine.high %v4737_v62, %v4737_v62  ;;  %v4681_v42 = vadd.f32 %v9555_v60, %v4680_v6  ;;  %v5216_v0 = vadd.f32 %v9283_v3, %v5215_v5 }
0x13e8   :  { %4935 = vst.msk [vmem:[%s10349_s10 + $0x75] sm:$0x1] %vm1200_vm3, %v4788_v18  ;;  %4924 = vst.msk [vmem:[%s10349_s10 + $0x1d] sm:$0x1] %vm1200_vm3, %v4740_v63  ;;  %v4840_v29 = vcombine.high %v4686_v2, %v4686_v2  ;;  %v4847_v55 = vrot.slane %v4686_v2, %v8233_v47  ;;  %5262 = vrot.lane.b32.xlu1 %v9816_v46, %s7914_s27 }
0x13e9   :  { %4926 = vst.msk [vmem:[%s10349_s10 + $0x2d] sm:$0x1] %vm1200_vm3, %v4737_v62  ;;  %4927 = vst.msk [vmem:[%s10349_s10 + $0x35] sm:$0x1] %vm1200_vm3, %v4739_v12  ;;  %v4791_v57 = vcombine.high %v4681_v42, %v4681_v42  ;;  %v4798_v50 = vrot.slane %v4681_v42, %v8233_v47  ;;  %5260 = vrot.lane.b32.xlu0 %v5216_v0, %s7914_s27  ;;  %v7349_v3 = vpop.f32.mrb[64].mxu1 }
0x13ea   :  { %4936 = vst.msk [vmem:[%s10349_s10 + $0x7d] sm:$0x1] %vm1200_vm3, %v4790_v40  ;;  %4928 = vst.msk [vmem:[%s10349_s10 + $0x3d] sm:$0x1] %vm1200_vm3, %v4741_v48  ;;  %v4854_v9 = vrot.slane %v4840_v29, %v8233_v47  ;;  %v4855_v51 = vcombine.high %v4847_v55, %v4847_v55  ;;  %v4863_v24 = vrot.slane %v4847_v55, %v8233_v47  ;;  %v5120_v54 = vpop.f32.mrb[65].mxu1 }
0x13eb   :  { %v4805_v58 = vrot.slane %v4791_v57, %v8233_v47  ;;  %v4806_v4 = vcombine.high %v4798_v50, %v4798_v50  ;;  %v4814_v23 = vrot.slane %v4798_v50, %v8233_v47  ;;  %v5126_v10 = vadd.f32 %v9668_v28, %v7349_v3 }
0x13ec   :  { %v4856_v31 = vcombine.high %v4854_v9, %v4854_v9  ;;  %v4870_v52 = vrot.slane %v4854_v9, %v8233_v47  ;;  %v4877_v11 = vrot.slane %v4855_v51, %v8233_v47  ;;  %v4885_v16 = vcombine.high %v4863_v24, %v4863_v24  ;;  %4945 = vst.msk [vmem:[%s10349_s10 + $0xc5] sm:$0x1] %vm1200_vm3, %v4863_v24 }
0x13ed   :  { %v4807_v8 = vcombine.high %v4805_v58, %v4805_v58  ;;  %v4821_v37 = vrot.slane %v4805_v58, %v8233_v47  ;;  %v4828_v7 = vrot.slane %v4806_v4, %v8233_v47  ;;  %v4836_v22 = vcombine.high %v4814_v23, %v4814_v23  ;;  %4937 = vst.msk [vmem:[%s10349_s10 + $0x85] sm:$0x1] %vm1200_vm3, %v4814_v23  ;;  %v7352_v43 = vpop.f32.mrb[66].mxu1 }
0x13ee   :  { %v4884_v25 = vrot.slane %v4856_v31, %v8233_v47  ;;  %v4886_v44 = vcombine.high %v4870_v52, %v4870_v52  ;;  %v4887_v30 = vcombine.high %v4877_v11, %v4877_v11  ;;  %4946 = vst.msk [vmem:[%s10349_s10 + $0xcd] sm:$0x1] %vm1200_vm3, %v4877_v11  ;;  %4947 = vst.msk [vmem:[%s10349_s10 + $0xd5] sm:$0x1] %vm1200_vm3, %v4885_v16  ;;  %v5130_v41 = vpop.f32.mrb[67].mxu1 }
0x13ef   :  { %4949 = vst.msk [vmem:[%s10349_s10 + $0xe5] sm:$0x1] %vm1200_vm3, %v4870_v52  ;;  %v4835_v38 = vrot.slane %v4807_v8, %v8233_v47  ;;  %v4837_v21 = vcombine.high %v4821_v37, %v4821_v37  ;;  %v4838_v36 = vcombine.high %v4828_v7, %v4828_v7  ;;  %4938 = vst.msk [vmem:[%s10349_s10 + $0x8d] sm:$0x1] %vm1200_vm3, %v4828_v7 }
0x13f0   :  { %4939 = vst.msk [vmem:[%s10349_s10 + $0x95] sm:$0x1] %vm1200_vm3, %v4836_v22  ;;  %4941 = vst.msk [vmem:[%s10349_s10 + $0xa5] sm:$0x1] %vm1200_vm3, %v4821_v37  ;;  %v4888_v34 = vcombine.high %v4884_v25, %v4884_v25  ;;  %v5121_v13 = vadd.f32 %v9668_v28, %v5120_v54  ;;  %v5225_v17 = vadd.f32 %v9748_v1, %v5126_v10 }
0x13f1   :  { %4948 = vst.msk [vmem:[%s10349_s10 + $0xdd] sm:$0x1] %vm1200_vm3, %v4887_v30  ;;  %4950 = vst.msk [vmem:[%s10349_s10 + $0xed] sm:$0x1] %vm1200_vm3, %v4884_v25  ;;  %v4839_v56 = vcombine.high %v4835_v38, %v4835_v38  ;;  %v5136_v18 = vadd.f32 %v9668_v28, %v7352_v43  ;;  %v5131_v27 = vadd.f32 %v9668_v28, %v5130_v41  ;;  %v7391_v25 = vpop.f32.mrb[72].mxu0 }
0x13f2   :  { %4951 = vst.msk [vmem:[%s10349_s10 + $0xf5] sm:$0x1] %vm1200_vm3, %v4886_v44  ;;  %4940 = vst.msk [vmem:[%s10349_s10 + $0x9d] sm:$0x1] %vm1200_vm3, %v4838_v36  ;;  %v5224_v39 = vadd.f32 %v9752_v26, %v5121_v13  ;;  %v6623_v35 = vmul.f32 -1.442695, %v5225_v17 }
0x13f3   :  { %4942 = vst.msk [vmem:[%s10349_s10 + $0xad] sm:$0x1] %vm1200_vm3, %v4835_v38  ;;  %4943 = vst.msk [vmem:[%s10349_s10 + $0xb5] sm:$0x1] %vm1200_vm3, %v4837_v21  ;;  %v5227_v62 = vadd.f32 %v9816_v46, %v5136_v18  ;;  %v5226_v12 = vadd.f32 %v5216_v0, %v5131_v27 }
0x13f4   :  { %4952 = vst.msk [vmem:[%s10349_s10 + $0xfd] sm:$0x1] %vm1200_vm3, %v4888_v34  ;;  %4944 = vst.msk [vmem:[%s10349_s10 + $0xbd] sm:$0x1] %vm1200_vm3, %v4839_v56  ;;  %v6622_v19 = vmul.f32 -1.442695, %v5224_v39  ;;  %7846 = vpow2.f32 %v6623_v35 }
0x13f5   :  { %v6625_v63 = vmul.f32 -1.442695, %v5227_v62  ;;  %v6624_v59 = vmul.f32 -1.442695, %v5226_v12  ;;  %v5763_v34 = vpop.f32.mrb[73].mxu0 }
0x13f6   :  { %7848 = vpow2.f32 %v6622_v19  ;;  %v7394_v39 = vpop.f32.mrb[74].mxu0 }
0x13f7   :  { %7850 = vpow2.f32 %v6625_v63  ;;  %v5773_v35 = vpop.f32.mrb[75].mxu0 }
0x13f8   :  { %7852 = vpow2.f32 %v6624_v59 }
0x13fe   :  { %v7847_v32 = vpop.eup %7846 }
0x13ff   :  { %v5241_v1 = vadd.f32 1.0, %v7847_v32 }
0x1400   :  { %v7849_v40 = vpop.eup %7848 }
0x1401   :  { %v5240_v2 = vadd.f32 1.0, %v7849_v40  ;;  %7854 = vrcp.f32 %v5241_v1  ;;  %v7851_v26 = vpop.eup %7850 }
0x1402   :  { %v7853_v6 = vpop.eup %7852  ;;  %v5243_v5 = vadd.f32 1.0, %v7851_v26 }
0x1403   :  { %7856 = vrcp.f32 %v5240_v2  ;;  %v5242_v48 = vadd.f32 1.0, %v7853_v6 }
0x1404   :  { %7858 = vrcp.f32 %v5243_v5 }
0x1405   :  { %7860 = vrcp.f32 %v5242_v48 }
0x140b   :  { %v7855_v42 = vpop.eup %7854 }
0x140c   :  { %v5297_v44 = vsub.f32 1.0, %v7855_v42  ;;  %v5321_v38 = vmul.f32 %v7855_v42, %v9688_v45 }
0x140d   :  { %v7857_v55 = vpop.eup %7856 }
0x140e   :  { %v7859_v50 = vpop.eup %7858  ;;  %v5296_v41 = vsub.f32 1.0, %v7857_v55  ;;  %v5320_v56 = vmul.f32 %v7857_v55, %v9690_v49 }
0x140f   :  { %v7861_v9 = vpop.eup %7860  ;;  %v5299_v19 = vsub.f32 1.0, %v7859_v50 }
0x1410   :  { %v5322_v12 = vmul.f32 %v7861_v9, %v9700_v33 }
0x1450   :  { %v5259_v29 = vpop.permute.xlu1 %5258 }
0x1451   :  { %v5269_v46 = vmul.f32 %v7855_v42, %v5259_v29  ;;  %v5257_v0 = vpop.permute.xlu0 %5256 }
0x1452   :  { %v5268_v57 = vmul.f32 %v7857_v55, %v5257_v0 }
0x1453   :  { %5278 = vrot.lane.b32.xlu1 %v5269_v46, %s7914_s27 }
0x1454   :  { %5276 = vrot.lane.b32.xlu0 %v5268_v57, %s7914_s27 }
0x145a   :  { %v5263_v3 = vpop.permute.xlu1 %5262 }
0x145b   :  { %v5271_v51 = vmul.f32 %v7859_v50, %v5263_v3  ;;  %v5261_v24 = vpop.permute.xlu0 %5260 }
0x145c   :  { %v5270_v54 = vmul.f32 %v7861_v9, %v5261_v24 }
0x145d   :  { %5282 = vrot.lane.b32.xlu1 %v5271_v51, %s7914_s27 }
0x145e   :  { %5280 = vrot.lane.b32.xlu0 %v5270_v54, %s7914_s27 }
0x14c5   :  { %v5279_v58 = vpop.permute.xlu1 %5278 }
0x14c6   :  { %v5289_v4 = vadd.f32 %v5279_v58, %v5126_v10  ;;  %v5277_v23 = vpop.permute.xlu0 %5276 }
0x14c7   :  { %v5288_v31 = vadd.f32 %v5277_v23, %v5121_v13 }
0x14c8   :  { %7862 = vtanh.f32 %v5289_v4 }
0x14c9   :  { %7864 = vtanh.f32 %v5288_v31 }
0x14cf   :  { %v5283_v52 = vpop.permute.xlu1 %5282 }
0x14d0   :  { %v5291_v11 = vadd.f32 %v5283_v52, %v5136_v18  ;;  %v5281_v16 = vpop.permute.xlu0 %5280  ;;  %v5298_v18 = vsub.f32 1.0, %v7861_v9  ;;  %v9984_v9 = vld [vmem:[%s10345_s7] ss:$0 sm:$0xff] }
0x14d1   :  { %v5290_v8 = vadd.f32 %v5281_v16, %v5131_v27  ;;  %v5323_v27 = vmul.f32 %v7859_v50, %v9698_v15  ;;  %v7910_v15 = vld [vmem:[%s10344_s3] ss:$0 sm:$0xff] }
0x14d2   :  { %v7863_v37 = vpop.eup %7862  ;;  %7866 = vtanh.f32 %v5291_v11  ;;  %v5764_v33 = vadd.f32 %v7910_v15, %v5763_v34  ;;  %v5769_v2 = vadd.f32 %v7910_v15, %v7391_v25  ;;  %v5779_v42 = vadd.f32 %v7910_v15, %v7394_v39 }
0x14d3   :  { %v7865_v7 = vpop.eup %7864  ;;  %7868 = vtanh.f32 %v5290_v8  ;;  %5306 = vrot.lane.b32.xlu1 %v7863_v37, %s7916_s19 }
0x14d4   :  { %5304 = vrot.lane.b32.xlu0 %v7865_v7, %s7916_s19  ;;  %v5782_v26 = vmax.f32 %v5764_v33, 0.0  ;;  %v5783_v48 = vmax.f32 %v5769_v2, 0.0  ;;  %v5785_v29 = vmax.f32 %v5779_v42, 0.0 }
0x14dc   :  { %v7867_v22 = vpop.eup %7866 }
0x14dd   :  { %v7869_v43 = vpop.eup %7868  ;;  %5310 = vrot.lane.b32.xlu1 %v7867_v22, %s7916_s19 }
0x14de   :  { %5308 = vrot.lane.b32.xlu0 %v7869_v43, %s7916_s19 }
0x1545   :  { %v5307_v30 = vpop.permute.xlu1 %5306 }
0x1546   :  { %v5317_v21 = vmul.f32 %v5307_v30, %v5297_v44  ;;  %v5305_v36 = vpop.permute.xlu0 %5304 }
0x1547   :  { %v5316_v10 = vmul.f32 %v5305_v36, %v5296_v41 }
0x1548   :  { %v9936_v13 = vadd.f32 %v5321_v38, %v5317_v21 }
0x1549   :  { %v9938_v17 = vadd.f32 %v5320_v56, %v5316_v10 }
0x154a   :  { %5334 = vrot.lane.b32.xlu1 %v9936_v13, %s7916_s19 }
0x154b   :  { %5332 = vrot.lane.b32.xlu0 %v9938_v17, %s7916_s19 }
0x154f   :  { %v5311_v45 = vpop.permute.xlu1 %5310 }
0x1550   :  { %v5319_v62 = vmul.f32 %v5311_v45, %v5299_v19  ;;  %v5309_v49 = vpop.permute.xlu0 %5308 }
0x1551   :  { %v5318_v63 = vmul.f32 %v5309_v49, %v5298_v18 }
0x1552   :  { %v9946_v59 = vadd.f32 %v5323_v27, %v5319_v62 }
0x1553   :  { %v9948_v32 = vadd.f32 %v5322_v12, %v5318_v63 }
0x1554   :  { %5338 = vrot.lane.b32.xlu1 %v9946_v59, %s7916_s19 }
0x1555   :  { %5336 = vrot.lane.b32.xlu0 %v9948_v32, %s7916_s19 }
0x15bc   :  { %v5335_v1 = vpop.permute.xlu1 %5334 }
0x15bd   :  { %v5333_v40 = vpop.permute.xlu0 %5332 }
0x15be   :  { %7375 = vmatprep.mubr.msk.f32.mxu1 %vm39_vm2, %v5333_v40  ;;  %7417 = vmatprep.mubr.msk.f32.mxu0 %vm39_vm2, %v5333_v40 }
0x15bf   :  { %7376 = vmatmul.mubr.msk.f32.vlgmr.msra.gmra.mrb[68].mxu1 %vm39_vm2, %v5335_v1  ;;  %7418 = vmatmul.mubr.msk.f32.vlgmr.msra.gmra.mrb[76].mxu0 %vm39_vm2, %v5335_v1 }
0x15c0   :  { %7672 = vmatpush3.bf16.msra.mxu1 %v8005_v14  ;;  %7688 = vmatpush3.bf16.msra.mxu0 %v8159_v53  ;;  %v5774_v14 = vadd.f32 %v7910_v15, %v5773_v35 }
0x15c1   :  { %7674 = vmatprep.subr.bf16.mxu1 %v8036_v20  ;;  %7690 = vmatprep.subr.bf16.mxu0 %v8171_v61 }
0x15c4   :  { %7676 = vmatpush3.bf16.msra.mxu1 %v8036_v20  ;;  %7692 = vmatpush3.bf16.msra.mxu0 %v8171_v61  ;;  %v5784_v20 = vmax.f32 %v5774_v14, 0.0 }
0x15c5   :  { %7693 = vmatprep.subr.bf16.mxu1 %v8159_v53 }
0x15c6   :  { %v5339_v5 = vpop.permute.xlu1 %5338 }
0x15c7   :  { %v5337_v6 = vpop.permute.xlu0 %5336 }
0x15c8   :  { %7378 = vmatprep.mubr.msk.f32.mxu1 %vm39_vm2, %v5337_v6  ;;  %7420 = vmatprep.mubr.msk.f32.mxu0 %vm39_vm2, %v5337_v6 }
0x15c9   :  { %7379 = vmatmul.mubr.msk.f32.gmra.mrb[70].mxu1 %vm39_vm2, %v5339_v5  ;;  %7421 = vmatmul.mubr.msk.f32.gmra.mrb[78].mxu0 %vm39_vm2, %v5339_v5 }
0x15ca   :  { %7403 = vmatprep.mubr.msk.f32.mxu1 %vm39_vm2, %v5782_v26 }
0x15cd   :  { %7404 = vmatmul.mubr.msk.f32.vlgmr.msra.gmra.mrb[72].mxu1 %vm39_vm2, %v5783_v48 }
0x15ce   :  { %7406 = vmatprep.mubr.msk.f32.mxu1 %vm39_vm2, %v5784_v20  ;;  %7695 = vmatpush3.bf16.msra.mxu1 %v8159_v53 }
0x15cf   :  { %7694 = vmatprep.subr.bf16.mxu1 %v8171_v61 }
0x15d1   :  { %7407 = vmatmul.mubr.msk.f32.gmra.mrb[74].mxu1 %vm39_vm2, %v5785_v29 }
0x15d2   :  { %7696 = vmatpush3.bf16.msra.mxu1 %v8171_v61 }
0x1692   :  { %v7377_v55 = vpop.f32.mrb[68].mxu1  ;;  %v7419_v46 = vpop.f32.mrb[76].mxu0 }
0x1693   :  { %v5420_v0 = vadd.f32 %v9555_v60, %v7377_v55  ;;  %v5414_v57 = vpop.f32.mrb[69].mxu1  ;;  %v5949_v50 = vpop.f32.mrb[77].mxu0  ;;  %v9996_v31 = vadd.f32 %v9984_v9, %v7419_v46 }
0x1694   :  { %v5415_v3 = vadd.f32 %v9555_v60, %v5414_v57  ;;  %v9987_v53 = vadd.f32 %v9984_v9, %v5949_v50 }
0x1695   :  { %v5486_v51 = vcombine.high %v5420_v0, %v5420_v0  ;;  %v5493_v24 = vrot.slane %v5420_v0, %v8233_v47 }
0x1696   :  { %v5437_v61 = vcombine.high %v5415_v3, %v5415_v3  ;;  %v5444_v54 = vrot.slane %v5415_v3, %v8233_v47  ;;  %6000 = vrot.lane.b32.xlu0 %v9987_v53, %s7914_s27 }
0x1697   :  { %v5500_v58 = vrot.slane %v5486_v51, %v8233_v47  ;;  %v5501_v4 = vcombine.high %v5493_v24, %v5493_v24  ;;  %v5509_v23 = vrot.slane %v5493_v24, %v8233_v47 }
0x1698   :  { %v5451_v52 = vrot.slane %v5437_v61, %v8233_v47  ;;  %v5452_v11 = vcombine.high %v5444_v54, %v5444_v54  ;;  %v5460_v16 = vrot.slane %v5444_v54, %v8233_v47 }
0x1699   :  { %v5502_v8 = vcombine.high %v5500_v58, %v5500_v58  ;;  %v5516_v37 = vrot.slane %v5500_v58, %v8233_v47  ;;  %v5523_v7 = vrot.slane %v5501_v4, %v8233_v47  ;;  %v5531_v22 = vcombine.high %v5509_v23, %v5509_v23  ;;  %5673 = vst.msk [vmem:[%s10349_s10 + $0x46] sm:$0x1] %vm1200_vm3, %v5509_v23 }
0x169a   :  { %v5453_v43 = vcombine.high %v5451_v52, %v5451_v52  ;;  %v5467_v25 = vrot.slane %v5451_v52, %v8233_v47  ;;  %v5474_v44 = vrot.slane %v5452_v11, %v8233_v47  ;;  %v5482_v30 = vcombine.high %v5460_v16, %v5460_v16  ;;  %5665 = vst.msk [vmem:[%s10349_s10 + $0x6] sm:$0x1] %vm1200_vm3, %v5460_v16 }
0x169b   :  { %6002 = vrot.lane.b32.xlu0 %v9996_v31, %s7914_s27  ;;  %v5530_v41 = vrot.slane %v5502_v8, %v8233_v47  ;;  %v5532_v38 = vcombine.high %v5516_v37, %v5516_v37  ;;  %v5533_v21 = vcombine.high %v5523_v7, %v5523_v7  ;;  %5674 = vst.msk [vmem:[%s10349_s10 + $0x4e] sm:$0x1] %vm1200_vm3, %v5523_v7  ;;  %5675 = vst.msk [vmem:[%s10349_s10 + $0x56] sm:$0x1] %vm1200_vm3, %v5531_v22 }
0x169c   :  { %5677 = vst.msk [vmem:[%s10349_s10 + $0x66] sm:$0x1] %vm1200_vm3, %v5516_v37  ;;  %v5481_v36 = vrot.slane %v5453_v43, %v8233_v47  ;;  %v5483_v34 = vcombine.high %v5467_v25, %v5467_v25  ;;  %v5484_v56 = vcombine.high %v5474_v44, %v5474_v44  ;;  %5666 = vst.msk [vmem:[%s10349_s10 + $0xe] sm:$0x1] %vm1200_vm3, %v5474_v44  ;;  %v7380_v10 = vpop.f32.mrb[70].mxu1  ;;  %v7422_v39 = vpop.f32.mrb[78].mxu0 }
0x169d   :  { %5667 = vst.msk [vmem:[%s10349_s10 + $0x16] sm:$0x1] %vm1200_vm3, %v5482_v30  ;;  %5669 = vst.msk [vmem:[%s10349_s10 + $0x26] sm:$0x1] %vm1200_vm3, %v5467_v25  ;;  %v5534_v35 = vcombine.high %v5530_v41, %v5530_v41  ;;  %v5430_v19 = vadd.f32 %v9555_v60, %v7380_v10  ;;  %v5424_v45 = vpop.f32.mrb[71].mxu1  ;;  %v5959_v18 = vpop.f32.mrb[79].mxu0  ;;  %v5965_v14 = vadd.f32 %v9984_v9, %v7422_v39 }
0x169e   :  { %5676 = vst.msk [vmem:[%s10349_s10 + $0x5e] sm:$0x1] %vm1200_vm3, %v5533_v21  ;;  %5678 = vst.msk [vmem:[%s10349_s10 + $0x6e] sm:$0x1] %vm1200_vm3, %v5530_v41  ;;  %v5485_v27 = vcombine.high %v5481_v36, %v5481_v36  ;;  %v5425_v62 = vadd.f32 %v9555_v60, %v5424_v45  ;;  %v5960_v49 = vadd.f32 %v9984_v9, %v5959_v18 }
0x169f   :  { %5679 = vst.msk [vmem:[%s10349_s10 + $0x76] sm:$0x1] %vm1200_vm3, %v5532_v38  ;;  %5668 = vst.msk [vmem:[%s10349_s10 + $0x1e] sm:$0x1] %vm1200_vm3, %v5484_v56  ;;  %v5584_v12 = vcombine.high %v5430_v19, %v5430_v19  ;;  %v5591_v63 = vrot.slane %v5430_v19, %v8233_v47 }
0x16a0   :  { %5670 = vst.msk [vmem:[%s10349_s10 + $0x2e] sm:$0x1] %vm1200_vm3, %v5481_v36  ;;  %5671 = vst.msk [vmem:[%s10349_s10 + $0x36] sm:$0x1] %vm1200_vm3, %v5483_v34  ;;  %v5535_v40 = vcombine.high %v5425_v62, %v5425_v62  ;;  %v5542_v1 = vrot.slane %v5425_v62, %v8233_v47  ;;  %6004 = vrot.lane.b32.xlu1 %v5960_v49, %s7914_s27  ;;  %v7405_v60 = vpop.f32.mrb[72].mxu1 }
0x16a1   :  { %5680 = vst.msk [vmem:[%s10349_s10 + $0x7e] sm:$0x1] %vm1200_vm3, %v5534_v35  ;;  %5672 = vst.msk [vmem:[%s10349_s10 + $0x3e] sm:$0x1] %vm1200_vm3, %v5485_v27  ;;  %v5598_v15 = vrot.slane %v5584_v12, %v8233_v47  ;;  %v5599_v33 = vcombine.high %v5591_v63, %v5591_v63  ;;  %v5607_v2 = vrot.slane %v5591_v63, %v8233_v47  ;;  %v5864_v26 = vpop.f32.mrb[73].mxu1 }
0x16a2   :  { %v5549_v6 = vrot.slane %v5535_v40, %v8233_v47  ;;  %v5550_v5 = vcombine.high %v5542_v1, %v5542_v1  ;;  %v5558_v48 = vrot.slane %v5542_v1, %v8233_v47  ;;  %v5865_v11 = vadd.f32 %v9668_v28, %v5864_v26 }
0x16a3   :  { %v5600_v42 = vcombine.high %v5598_v15, %v5598_v15  ;;  %v5614_v20 = vrot.slane %v5598_v15, %v8233_v47  ;;  %v5621_v29 = vrot.slane %v5599_v33, %v8233_v47  ;;  %v5629_v55 = vcombine.high %v5607_v2, %v5607_v2  ;;  %5689 = vst.msk [vmem:[%s10349_s10 + $0xc6] sm:$0x1] %vm1200_vm3, %v5607_v2 }
0x16a4   :  { %v5551_v46 = vcombine.high %v5549_v6, %v5549_v6  ;;  %v5565_v0 = vrot.slane %v5549_v6, %v8233_v47  ;;  %v5572_v57 = vrot.slane %v5550_v5, %v8233_v47  ;;  %v5580_v50 = vcombine.high %v5558_v48, %v5558_v48  ;;  %5681 = vst.msk [vmem:[%s10349_s10 + $0x86] sm:$0x1] %vm1200_vm3, %v5558_v48  ;;  %v7408_v3 = vpop.f32.mrb[74].mxu1 }
0x16a5   :  { %6006 = vrot.lane.b32.xlu1 %v5965_v14, %s7914_s27  ;;  %v5628_v9 = vrot.slane %v5600_v42, %v8233_v47  ;;  %v5630_v51 = vcombine.high %v5614_v20, %v5614_v20  ;;  %v5631_v24 = vcombine.high %v5621_v29, %v5621_v29  ;;  %5690 = vst.msk [vmem:[%s10349_s10 + $0xce] sm:$0x1] %vm1200_vm3, %v5621_v29  ;;  %5691 = vst.msk [vmem:[%s10349_s10 + $0xd6] sm:$0x1] %vm1200_vm3, %v5629_v55  ;;  %v5874_v61 = vpop.f32.mrb[75].mxu1 }
0x16a6   :  { %5693 = vst.msk [vmem:[%s10349_s10 + $0xe6] sm:$0x1] %vm1200_vm3, %v5614_v20  ;;  %v5579_v54 = vrot.slane %v5551_v46, %v8233_v47  ;;  %v5581_v58 = vcombine.high %v5565_v0, %v5565_v0  ;;  %v5582_v4 = vcombine.high %v5572_v57, %v5572_v57  ;;  %5682 = vst.msk [vmem:[%s10349_s10 + $0x8e] sm:$0x1] %vm1200_vm3, %v5572_v57 }
0x16a7   :  { %5683 = vst.msk [vmem:[%s10349_s10 + $0x96] sm:$0x1] %vm1200_vm3, %v5580_v50  ;;  %5685 = vst.msk [vmem:[%s10349_s10 + $0xa6] sm:$0x1] %vm1200_vm3, %v5565_v0  ;;  %v5632_v23 = vcombine.high %v5628_v9, %v5628_v9  ;;  %v5870_v16 = vadd.f32 %v9668_v28, %v7405_v60  ;;  %v5968_v8 = vadd.f32 %v9987_v53, %v5865_v11 }
0x16a8   :  { %5692 = vst.msk [vmem:[%s10349_s10 + $0xde] sm:$0x1] %vm1200_vm3, %v5631_v24  ;;  %5694 = vst.msk [vmem:[%s10349_s10 + $0xee] sm:$0x1] %vm1200_vm3, %v5628_v9  ;;  %v5583_v52 = vcombine.high %v5579_v54, %v5579_v54  ;;  %v5875_v22 = vadd.f32 %v9668_v28, %v5874_v61  ;;  %v5880_v25 = vadd.f32 %v9668_v28, %v7408_v3 }
0x16a9   :  { %5695 = vst.msk [vmem:[%s10349_s10 + $0xf6] sm:$0x1] %vm1200_vm3, %v5630_v51  ;;  %5684 = vst.msk [vmem:[%s10349_s10 + $0x9e] sm:$0x1] %vm1200_vm3, %v5582_v4  ;;  %v5969_v37 = vadd.f32 %v9996_v31, %v5870_v16  ;;  %v6642_v7 = vmul.f32 -1.442695, %v5968_v8 }
0x16aa   :  { %5686 = vst.msk [vmem:[%s10349_s10 + $0xae] sm:$0x1] %vm1200_vm3, %v5579_v54  ;;  %5687 = vst.msk [vmem:[%s10349_s10 + $0xb6] sm:$0x1] %vm1200_vm3, %v5581_v58  ;;  %v5970_v44 = vadd.f32 %v5960_v49, %v5875_v22  ;;  %v5971_v30 = vadd.f32 %v5965_v14, %v5880_v25 }
0x16ab   :  { %5696 = vst.msk [vmem:[%s10349_s10 + $0xfe] sm:$0x1] %vm1200_vm3, %v5632_v23  ;;  %5688 = vst.msk [vmem:[%s10349_s10 + $0xbe] sm:$0x1] %vm1200_vm3, %v5583_v52  ;;  %v6643_v43 = vmul.f32 -1.442695, %v5969_v37  ;;  %7870 = vpow2.f32 %v6642_v7 }
0x16ac   :  { %v6644_v41 = vmul.f32 -1.442695, %v5970_v44  ;;  %v6645_v21 = vmul.f32 -1.442695, %v5971_v30 }
0x16ad   :  { %7872 = vpow2.f32 %v6643_v43  ;;  %v7912_v43 = vld [vmem:[%s10348_s9] ss:$0 sm:$0xff] }
0x16ae   :  { %7874 = vpow2.f32 %v6644_v41 }
0x16af   :  { %7876 = vpow2.f32 %v6645_v21 }
0x16b5   :  { %v7871_v38 = vpop.eup %7870 }
0x16b6   :  { %v5984_v36 = vadd.f32 1.0, %v7871_v38 }
0x16b7   :  { %v7873_v34 = vpop.eup %7872 }
0x16b8   :  { %v5985_v53 = vadd.f32 1.0, %v7873_v34  ;;  %7878 = vrcp.f32 %v5984_v36  ;;  %v7875_v31 = vpop.eup %7874 }
0x16b9   :  { %v5986_v56 = vadd.f32 1.0, %v7875_v31  ;;  %v7877_v10 = vpop.eup %7876 }
0x16ba   :  { %7880 = vrcp.f32 %v5985_v53  ;;  %v5987_v35 = vadd.f32 1.0, %v7877_v10 }
0x16bb   :  { %7882 = vrcp.f32 %v5986_v56 }
0x16bc   :  { %7884 = vrcp.f32 %v5987_v35 }
0x16c2   :  { %v7879_v39 = vpop.eup %7878 }
0x16c3   :  { %v6040_v55 = vsub.f32 1.0, %v7879_v39  ;;  %v6064_v0 = vmul.f32 %v7879_v39, %v9938_v17 }
0x16c4   :  { %v7881_v45 = vpop.eup %7880 }
0x16c5   :  { %v7883_v62 = vpop.eup %7882  ;;  %v6041_v3 = vsub.f32 1.0, %v7881_v45  ;;  %v6065_v51 = vmul.f32 %v7881_v45, %v9936_v13 }
0x16c6   :  { %v7885_v63 = vpop.eup %7884  ;;  %v6042_v54 = vsub.f32 1.0, %v7883_v62  ;;  %v6066_v4 = vmul.f32 %v7883_v62, %v9948_v32 }
0x1708   :  { %v6001_v28 = vpop.permute.xlu0 %6000 }
0x1709   :  { %v6012_v19 = vmul.f32 %v7879_v39, %v6001_v28 }
0x170b   :  { %6020 = vrot.lane.b32.xlu0 %v6012_v19, %s7914_s27 }
0x170d   :  { %v6003_v18 = vpop.permute.xlu0 %6002 }
0x170e   :  { %v6013_v27 = vmul.f32 %v7881_v45, %v6003_v18 }
0x1710   :  { %6022 = vrot.lane.b32.xlu0 %v6013_v27, %s7914_s27 }
0x1712   :  { %v6005_v49 = vpop.permute.xlu1 %6004 }
0x1713   :  { %v6014_v12 = vmul.f32 %v7883_v62, %v6005_v49 }
0x1715   :  { %6024 = vrot.lane.b32.xlu1 %v6014_v12, %s7914_s27 }
0x1717   :  { %v6007_v40 = vpop.permute.xlu1 %6006 }
0x1718   :  { %v6015_v1 = vmul.f32 %v7885_v63, %v6007_v40 }
0x171a   :  { %6026 = vrot.lane.b32.xlu1 %v6015_v1, %s7914_s27 }
0x177d   :  { %v6021_v60 = vpop.permute.xlu0 %6020 }
0x177e   :  { %v6032_v15 = vadd.f32 %v6021_v60, %v5865_v11  ;;  %v6043_v11 = vsub.f32 1.0, %v7885_v63 }
0x1780   :  { %7886 = vtanh.f32 %v6032_v15 }
0x1782   :  { %v6023_v33 = vpop.permute.xlu0 %6022 }
0x1783   :  { %v6033_v2 = vadd.f32 %v6023_v33, %v5870_v16  ;;  %v6067_v16 = vmul.f32 %v7885_v63, %v9946_v59 }
0x1785   :  { %7888 = vtanh.f32 %v6033_v2 }
0x1787   :  { %v6025_v26 = vpop.permute.xlu1 %6024 }
0x1788   :  { %v6034_v14 = vadd.f32 %v6025_v26, %v5875_v22 }
0x178a   :  { %v7887_v6 = vpop.eup %7886  ;;  %7890 = vtanh.f32 %v6034_v14 }
0x178b   :  { %6048 = vrot.lane.b32.xlu0 %v7887_v6, %s7916_s19 }
0x178c   :  { %v6027_v5 = vpop.permute.xlu1 %6026 }
0x178d   :  { %v6035_v48 = vadd.f32 %v6027_v5, %v5880_v25 }
0x178f   :  { %v7889_v42 = vpop.eup %7888  ;;  %7892 = vtanh.f32 %v6035_v48 }
0x1790   :  { %6050 = vrot.lane.b32.xlu0 %v7889_v42, %s7916_s19 }
0x1794   :  { %v7891_v20 = vpop.eup %7890 }
0x1795   :  { %6052 = vrot.lane.b32.xlu1 %v7891_v20, %s7916_s19 }
0x1799   :  { %v7893_v29 = vpop.eup %7892 }
0x179a   :  { %6054 = vrot.lane.b32.xlu1 %v7893_v29, %s7916_s19 }
0x17fd   :  { %v6049_v46 = vpop.permute.xlu0 %6048 }
0x17fe   :  { %v6060_v57 = vmul.f32 %v6049_v46, %v6040_v55 }
0x1800   :  { %v6068_v50 = vadd.f32 %v6064_v0, %v6060_v57 }
0x1802   :  { %v6051_v9 = vpop.permute.xlu0 %6050  ;;  %6076 = vrot.lane.b32.xlu0 %v6068_v50, %s7916_s19 }
0x1803   :  { %v6061_v24 = vmul.f32 %v6051_v9, %v6041_v3 }
0x1805   :  { %v6069_v61 = vadd.f32 %v6065_v51, %v6061_v24 }
0x1807   :  { %6078 = vrot.lane.b32.xlu0 %v6069_v61, %s7916_s19  ;;  %v6053_v58 = vpop.permute.xlu1 %6052 }
0x1808   :  { %v6062_v23 = vmul.f32 %v6053_v58, %v6042_v54 }
0x180a   :  { %v6070_v52 = vadd.f32 %v6066_v4, %v6062_v23 }
0x180c   :  { %v6055_v17 = vpop.permute.xlu1 %6054  ;;  %6080 = vrot.lane.b32.xlu1 %v6070_v52, %s7916_s19 }
0x180d   :  { %v6063_v8 = vmul.f32 %v6055_v17, %v6043_v11 }
0x180f   :  { %v6071_v13 = vadd.f32 %v6067_v16, %v6063_v8 }
0x1811   :  { %6082 = vrot.lane.b32.xlu1 %v6071_v13, %s7916_s19 }
0x1874   :  { %v6077_v37 = vpop.permute.xlu0 %6076 }
0x1875   :  { %6445 = vst.msk [vmem:[#allocation2] sm:$0xff] %vm39_vm2, %v6077_v37  ;;  %7431 = vmatprep.mubr.msk.f32.mxu0 %vm39_vm2, %v6077_v37 }
0x1879   :  { %v6079_v7 = vpop.permute.xlu0 %6078 }
0x187a   :  { %6446 = vst.msk [vmem:[#allocation2 + $0x8] sm:$0xff] %vm39_vm2, %v6079_v7  ;;  %7432 = vmatmul.mubr.msk.f32.vlgmr.msra.gmra.mrb[80].mxu0 %vm39_vm2, %v6079_v7 }
0x187e   :  { %v6081_v32 = vpop.permute.xlu1 %6080 }
0x187f   :  { %6447 = vst.msk [vmem:[#allocation2 + $0x10] sm:$0xff] %vm39_vm2, %v6081_v32  ;;  %7434 = vmatprep.mubr.msk.f32.mxu1 %vm39_vm2, %v6081_v32 }
0x1883   :  { %v6083_v59 = vpop.permute.xlu1 %6082 }
0x1884   :  { %6448 = vst.msk [vmem:[#allocation2 + $0x18] sm:$0xff] %vm39_vm2, %v6083_v59  ;;  %7435 = vmatmul.mubr.msk.f32.vlgmr.msra.gmra.mrb[76].mxu1 %vm39_vm2, %v6083_v59 }
0x194d   :  { %v7433_v22 = vpop.f32.mrb[80].mxu0 }
0x194e   :  { %v6164_v25 = vadd.f32 %v7912_v43, %v7433_v22  ;;  %v6158_v44 = vpop.f32.mrb[81].mxu0 }
0x194f   :  { %v6159_v30 = vadd.f32 %v7912_v43, %v6158_v44 }
0x1950   :  { %v6230_v41 = vcombine.high %v6164_v25, %v6164_v25  ;;  %v6237_v38 = vrot.slane %v6164_v25, %v8233_v47 }
0x1951   :  { %v6181_v21 = vcombine.high %v6159_v30, %v6159_v30  ;;  %v6188_v36 = vrot.slane %v6159_v30, %v8233_v47 }
0x1952   :  { %v6244_v34 = vrot.slane %v6230_v41, %v8233_v47  ;;  %v6245_v53 = vcombine.high %v6237_v38, %v6237_v38  ;;  %v6253_v31 = vrot.slane %v6237_v38, %v8233_v47 }
0x1953   :  { %v6195_v56 = vrot.slane %v6181_v21, %v8233_v47  ;;  %v6196_v10 = vcombine.high %v6188_v36, %v6188_v36  ;;  %v6204_v39 = vrot.slane %v6188_v36, %v8233_v47 }
0x1954   :  { %v6246_v35 = vcombine.high %v6244_v34, %v6244_v34  ;;  %v6260_v28 = vrot.slane %v6244_v34, %v8233_v47  ;;  %v6267_v19 = vrot.slane %v6245_v53, %v8233_v47  ;;  %v6275_v45 = vcombine.high %v6253_v31, %v6253_v31  ;;  %6417 = vst.msk [vmem:[%s10349_s10 + $0x47] sm:$0x1] %vm1200_vm3, %v6253_v31 }
0x1955   :  { %v6197_v18 = vcombine.high %v6195_v56, %v6195_v56  ;;  %v6211_v27 = vrot.slane %v6195_v56, %v8233_v47  ;;  %v6218_v62 = vrot.slane %v6196_v10, %v8233_v47  ;;  %v6226_v49 = vcombine.high %v6204_v39, %v6204_v39  ;;  %6409 = vst.msk [vmem:[%s10349_s10 + $0x7] sm:$0x1] %vm1200_vm3, %v6204_v39 }
0x1956   :  { %v6274_v12 = vrot.slane %v6246_v35, %v8233_v47  ;;  %v6276_v63 = vcombine.high %v6260_v28, %v6260_v28  ;;  %v6277_v40 = vcombine.high %v6267_v19, %v6267_v19  ;;  %6418 = vst.msk [vmem:[%s10349_s10 + $0x4f] sm:$0x1] %vm1200_vm3, %v6267_v19  ;;  %6419 = vst.msk [vmem:[%s10349_s10 + $0x57] sm:$0x1] %vm1200_vm3, %v6275_v45 }
0x1957   :  { %6421 = vst.msk [vmem:[%s10349_s10 + $0x67] sm:$0x1] %vm1200_vm3, %v6260_v28  ;;  %v6225_v1 = vrot.slane %v6197_v18, %v8233_v47  ;;  %v6227_v60 = vcombine.high %v6211_v27, %v6211_v27  ;;  %v6228_v15 = vcombine.high %v6218_v62, %v6218_v62  ;;  %6410 = vst.msk [vmem:[%s10349_s10 + $0xf] sm:$0x1] %vm1200_vm3, %v6218_v62  ;;  %v7436_v33 = vpop.f32.mrb[76].mxu1 }
0x1958   :  { %6411 = vst.msk [vmem:[%s10349_s10 + $0x17] sm:$0x1] %vm1200_vm3, %v6226_v49  ;;  %6413 = vst.msk [vmem:[%s10349_s10 + $0x27] sm:$0x1] %vm1200_vm3, %v6211_v27  ;;  %v6278_v2 = vcombine.high %v6274_v12, %v6274_v12  ;;  %v6174_v26 = vadd.f32 %v7912_v43, %v7436_v33  ;;  %v6168_v14 = vpop.f32.mrb[77].mxu1 }
0x1959   :  { %6420 = vst.msk [vmem:[%s10349_s10 + $0x5f] sm:$0x1] %vm1200_vm3, %v6277_v40  ;;  %6422 = vst.msk [vmem:[%s10349_s10 + $0x6f] sm:$0x1] %vm1200_vm3, %v6274_v12  ;;  %v6229_v6 = vcombine.high %v6225_v1, %v6225_v1  ;;  %v6169_v5 = vadd.f32 %v7912_v43, %v6168_v14 }
0x195a   :  { %6423 = vst.msk [vmem:[%s10349_s10 + $0x77] sm:$0x1] %vm1200_vm3, %v6276_v63  ;;  %6412 = vst.msk [vmem:[%s10349_s10 + $0x1f] sm:$0x1] %vm1200_vm3, %v6228_v15  ;;  %v6328_v48 = vcombine.high %v6174_v26, %v6174_v26  ;;  %v6335_v42 = vrot.slane %v6174_v26, %v8233_v47 }
0x195b   :  { %6414 = vst.msk [vmem:[%s10349_s10 + $0x2f] sm:$0x1] %vm1200_vm3, %v6225_v1  ;;  %6415 = vst.msk [vmem:[%s10349_s10 + $0x37] sm:$0x1] %vm1200_vm3, %v6227_v60  ;;  %v6279_v20 = vcombine.high %v6169_v5, %v6169_v5  ;;  %v6286_v29 = vrot.slane %v6169_v5, %v8233_v47 }
0x195c   :  { %6424 = vst.msk [vmem:[%s10349_s10 + $0x7f] sm:$0x1] %vm1200_vm3, %v6278_v2  ;;  %6416 = vst.msk [vmem:[%s10349_s10 + $0x3f] sm:$0x1] %vm1200_vm3, %v6229_v6  ;;  %v6342_v55 = vrot.slane %v6328_v48, %v8233_v47  ;;  %v6343_v46 = vcombine.high %v6335_v42, %v6335_v42  ;;  %v6351_v0 = vrot.slane %v6335_v42, %v8233_v47 }
0x195d   :  { %v6293_v57 = vrot.slane %v6279_v20, %v8233_v47  ;;  %v6294_v50 = vcombine.high %v6286_v29, %v6286_v29  ;;  %v6302_v3 = vrot.slane %v6286_v29, %v8233_v47 }
0x195e   :  { %v6344_v9 = vcombine.high %v6342_v55, %v6342_v55  ;;  %v6358_v51 = vrot.slane %v6342_v55, %v8233_v47  ;;  %v6365_v24 = vrot.slane %v6343_v46, %v8233_v47  ;;  %v6373_v61 = vcombine.high %v6351_v0, %v6351_v0  ;;  %6433 = vst.msk [vmem:[%s10349_s10 + $0xc7] sm:$0x1] %vm1200_vm3, %v6351_v0 }
0x195f   :  { %v6295_v54 = vcombine.high %v6293_v57, %v6293_v57  ;;  %v6309_v58 = vrot.slane %v6293_v57, %v8233_v47  ;;  %v6316_v4 = vrot.slane %v6294_v50, %v8233_v47  ;;  %v6324_v23 = vcombine.high %v6302_v3, %v6302_v3  ;;  %6425 = vst.msk [vmem:[%s10349_s10 + $0x87] sm:$0x1] %vm1200_vm3, %v6302_v3 }
0x1960   :  { %v6372_v52 = vrot.slane %v6344_v9, %v8233_v47  ;;  %v6374_v11 = vcombine.high %v6358_v51, %v6358_v51  ;;  %v6375_v17 = vcombine.high %v6365_v24, %v6365_v24  ;;  %6434 = vst.msk [vmem:[%s10349_s10 + $0xcf] sm:$0x1] %vm1200_vm3, %v6365_v24  ;;  %6435 = vst.msk [vmem:[%s10349_s10 + $0xd7] sm:$0x1] %vm1200_vm3, %v6373_v61 }
0x1961   :  { %6437 = vst.msk [vmem:[%s10349_s10 + $0xe7] sm:$0x1] %vm1200_vm3, %v6358_v51  ;;  %v6323_v16 = vrot.slane %v6295_v54, %v8233_v47  ;;  %v6325_v8 = vcombine.high %v6309_v58, %v6309_v58  ;;  %v6326_v13 = vcombine.high %v6316_v4, %v6316_v4  ;;  %6426 = vst.msk [vmem:[%s10349_s10 + $0x8f] sm:$0x1] %vm1200_vm3, %v6316_v4 }
0x1962   :  { %6427 = vst.msk [vmem:[%s10349_s10 + $0x97] sm:$0x1] %vm1200_vm3, %v6324_v23  ;;  %6429 = vst.msk [vmem:[%s10349_s10 + $0xa7] sm:$0x1] %vm1200_vm3, %v6309_v58  ;;  %v6376_v37 = vcombine.high %v6372_v52, %v6372_v52 }
0x1963   :  { %6436 = vst.msk [vmem:[%s10349_s10 + $0xdf] sm:$0x1] %vm1200_vm3, %v6375_v17  ;;  %6438 = vst.msk [vmem:[%s10349_s10 + $0xef] sm:$0x1] %vm1200_vm3, %v6372_v52  ;;  %v6327_v47 = vcombine.high %v6323_v16, %v6323_v16 }
0x1964   :  { %6439 = vst.msk [vmem:[%s10349_s10 + $0xf7] sm:$0x1] %vm1200_vm3, %v6374_v11  ;;  %6428 = vst.msk [vmem:[%s10349_s10 + $0x9f] sm:$0x1] %vm1200_vm3, %v6326_v13 }
0x1965   :  { %6430 = vst.msk [vmem:[%s10349_s10 + $0xaf] sm:$0x1] %vm1200_vm3, %v6323_v16  ;;  %6431 = vst.msk [vmem:[%s10349_s10 + $0xb7] sm:$0x1] %vm1200_vm3, %v6325_v8 }
0x1966   :  { %6440 = vst.msk [vmem:[%s10349_s10 + $0xff] sm:$0x1] %vm1200_vm3, %v6376_v37  ;;  %6432 = vst.msk [vmem:[%s10349_s10 + $0xbf] sm:$0x1] %vm1200_vm3, %v6327_v47 }

</bundles_post_ra>
